<compile_context>
chip_gen: v5e
topology: v5e:2x2
jax: 0.10.0
libtpu: 0.0.40
codegen_flags: <defaults>
</compile_context>

<pallas_src>
import functools

import jax
import jax.numpy as jnp
from jax.experimental import pallas as pl
from jax.experimental.pallas import tpu as pltpu


def _round_up(x, m):
    return (x + m - 1) // m * m


# --------------------------- fused Linear stack ------------------------------


def _mlp_kernel(x_ref, w1_ref, b1_ref, w2_ref, b2_ref, w3_ref, b3_ref, o_ref):
    h = jnp.dot(x_ref[...], w1_ref[...], preferred_element_type=jnp.float32)
    h = jnp.maximum(h + b1_ref[...], 0.0)
    h = jnp.dot(h, w2_ref[...], preferred_element_type=jnp.float32)
    h = jnp.maximum(h + b2_ref[...], 0.0)
    h = jnp.dot(h, w3_ref[...], preferred_element_type=jnp.float32)
    h = jnp.maximum(h + b3_ref[...], 0.0)
    o_ref[...] = h.astype(o_ref.dtype)


def fused_mlp(x, p, out_dtype=jnp.bfloat16):
    """relu(relu(relu(x@w1+b1)@w2+b2)@w3+b3) in a single pallas_call."""
    bsz = x.shape[0]
    n_out = p["w3"].shape[1]
    return pl.pallas_call(
        _mlp_kernel,
        out_shape=jax.ShapeDtypeStruct((bsz, n_out), out_dtype),
    )(
        x.astype(jnp.float32),
        p["w1"].astype(jnp.float32), p["b1"].reshape(1, -1).astype(jnp.float32),
        p["w2"].astype(jnp.float32), p["b2"].reshape(1, -1).astype(jnp.float32),
        p["w3"].astype(jnp.float32), p["b3"].reshape(1, -1).astype(jnp.float32),
    )


# ------------------------- matmul + bias (+ReLU) -----------------------------


def _matmul_bias_kernel(x_ref, w_ref, b_ref, o_ref, *, relu):
    acc = jnp.dot(x_ref[...], w_ref[...], preferred_element_type=jnp.float32)
    acc = acc + b_ref[...]
    if relu:
        acc = jnp.maximum(acc, 0.0)
    o_ref[...] = acc.astype(o_ref.dtype)


def matmul_bias(x, w, b, relu, out_dtype):
    """y = x @ w + b (optional ReLU).  x:(M,K) w:(K,N) b:(N,) -> (M,N).

    bf16 operands, f32 MXU accumulation, f32 bias/ReLU epilogue, cast on
    store.  Rows are padded to an even grid of ~1024-row tiles (v7x megacore
    split); K/N are full-dim blocks (multiples of 128).
    """
    M, K = x.shape
    N = w.shape[1]
    if M <= 1024:
        g = 1
        tm = _round_up(M, 16)
    else:
        g = pl.cdiv(M, 1024)
        g = g + (g & 1)                       # even grid for 2-TC split
        tm = _round_up(pl.cdiv(M, g), 16)
    m_pad = tm * g

    xb = x.astype(jnp.bfloat16)
    if m_pad != M:
        xb = jnp.pad(xb, ((0, m_pad - M), (0, 0)))
    wb = w.astype(jnp.bfloat16)
    b2 = b.reshape(1, N).astype(jnp.float32)

    out = pl.pallas_call(
        functools.partial(_matmul_bias_kernel, relu=relu),
        out_shape=jax.ShapeDtypeStruct((m_pad, N), out_dtype),
        grid_spec=pltpu.PrefetchScalarGridSpec(
            num_scalar_prefetch=0,
            grid=(g,),
            in_specs=[
                pl.BlockSpec((tm, K), lambda i: (i, 0)),
                pl.BlockSpec((K, N), lambda i: (0, 0)),
                pl.BlockSpec((1, N), lambda i: (0, 0)),
            ],
            out_specs=pl.BlockSpec((tm, N), lambda i: (i, 0)),
        ),
        compiler_params=pltpu.CompilerParams(
            dimension_semantics=("parallel",)),
    )(xb, wb, b2)
    return out[:M] if m_pad != M else out


# -------- ConvTranspose2d(k=4, s=2, p=1) via sub-pixel phase decomposition ---
# For output row oh = 2s + r - 1 (r in {0,1}) the taps come from padded input
# rows {s, s+1} with kernel row kh = r + 2 - 2a (a = patch row), and likewise
# for columns.  So one 2x2 patch of the 1-padded input produces a 2x2 output
# block via a (4*ic, 4*oc) matrix; the full output is the pixel-shuffled
# blocks cropped by one row/col on each side.


def _phase_weight(ct_w):
    """(ic, oc, 4, 4) PyTorch ConvTranspose2d weight -> (4*ic, 4*oc) matrix."""
    row_blocks = []
    for a in range(2):
        for bb in range(2):
            col_blocks = []
            for r in range(2):
                for c in range(2):
                    kh = r + 2 - 2 * a
                    kw = c + 2 - 2 * bb
                    col_blocks.append(ct_w[:, :, kh, kw])        # (ic, oc)
            row_blocks.append(jnp.concatenate(col_blocks, axis=1))  # (ic, 4*oc)
    return jnp.concatenate(row_blocks, axis=0)                      # (4*ic, 4*oc)


def conv_transpose_s2k4p1(x_nhwc, ct_w, bias, relu, out_dtype,
                          pad_n_to=None):
    n, h, w, ic = x_nhwc.shape
    oc = ct_w.shape[1]

    # Build patches directly in bf16 so only one bf16 copy ever hits HBM.
    xp = jnp.pad(x_nhwc.astype(jnp.bfloat16),
                 ((0, 0), (1, 1), (1, 1), (0, 0)))
    # 2x2 patches at all (h+1)x(w+1) window positions, channel-concatenated
    # in (a, b) order to match _phase_weight's row blocks.
    p00 = xp[:, 0:h + 1, 0:w + 1, :]
    p01 = xp[:, 0:h + 1, 1:w + 2, :]
    p10 = xp[:, 1:h + 2, 0:w + 1, :]
    p11 = xp[:, 1:h + 2, 1:w + 2, :]
    cols = jnp.concatenate([p00, p01, p10, p11], axis=-1)
    cols = cols.reshape(n * (h + 1) * (w + 1), 4 * ic)

    w_mat = _phase_weight(ct_w)                       # (4*ic, 4*oc)
    b_vec = jnp.tile(bias, 4)                         # (4*oc,)
    n_true = 4 * oc
    if pad_n_to is not None and n_true < pad_n_to:    # lane-dense final stage
        w_mat = jnp.pad(w_mat, ((0, 0), (0, pad_n_to - n_true)))
        b_vec = jnp.pad(b_vec, (0, pad_n_to - n_true))

    out = matmul_bias(cols, w_mat, b_vec, relu, out_dtype)
    out = out[:, :n_true]

    # pixel shuffle: (rows, (r,c,oc)) -> (n, 2h+2, 2w+2, oc), crop 1 each side.
    out = out.reshape(n, h + 1, w + 1, 2, 2, oc)
    out = jnp.transpose(out, (0, 1, 3, 2, 4, 5)).reshape(
        n, 2 * h + 2, 2 * w + 2, oc)
    return out[:, 1:2 * h + 1, 1:2 * w + 1, :]


# ------------------------------ full forward ---------------------------------


def simpleconv64d_forward(x, params):
    h = fused_mlp(x, params, out_dtype=jnp.bfloat16)    # (B, 1024) bf16

    bsz = x.shape[0]
    h = h.reshape(bsz, 64, 4, 4)                        # nn.Unflatten -> NCHW
    h = jnp.transpose(h, (0, 2, 3, 1))                  # NHWC for the convs

    h = conv_transpose_s2k4p1(h, params["ct1_w"], params["ct1_b"],
                              relu=True, out_dtype=jnp.bfloat16)   # 8x8x64
    h = conv_transpose_s2k4p1(h, params["ct2_w"], params["ct2_b"],
                              relu=True, out_dtype=jnp.bfloat16)   # 16x16x32
    h = conv_transpose_s2k4p1(h, params["ct3_w"], params["ct3_b"],
                              relu=True, out_dtype=jnp.bfloat16)   # 32x32x32
    h = conv_transpose_s2k4p1(h, params["ct4_w"], params["ct4_b"],
                              relu=False, out_dtype=jnp.float32,
                              pad_n_to=128)                        # 64x64xC

    return jnp.transpose(h, (0, 3, 1, 2))               # NCHW output


# ------------------------------ parameters ------------------------------------


def _uniform(key, shape, fan_in):
    bound = 1.0 / float(fan_in) ** 0.5
    return jax.random.uniform(key, shape, jnp.float32, -bound, bound)


def init_params(key, latent_dim, num_channels):
    ks = jax.random.split(key, 14)
    p = {}
    # Linear weights stored as (in, out)
    p["w1"] = _uniform(ks[0], (latent_dim, 256), latent_dim)
    p["b1"] = _uniform(ks[1], (256,), latent_dim)
    p["w2"] = _uniform(ks[2], (256, 256), 256)
    p["b2"] = _uniform(ks[3], (256,), 256)
    p["w3"] = _uniform(ks[4], (256, 64 * 4 * 4), 256)
    p["b3"] = _uniform(ks[5], (64 * 4 * 4,), 256)
    # ConvTranspose2d weights in PyTorch layout (IC, OC, kH, kW)
    p["ct1_w"] = _uniform(ks[6], (64, 64, 4, 4), 64 * 16)
    p["ct1_b"] = _uniform(ks[7], (64,), 64 * 16)
    p["ct2_w"] = _uniform(ks[8], (64, 32, 4, 4), 64 * 16)
    p["ct2_b"] = _uniform(ks[9], (32,), 64 * 16)
    p["ct3_w"] = _uniform(ks[10], (32, 32, 4, 4), 32 * 16)
    p["ct3_b"] = _uniform(ks[11], (32,), 32 * 16)
    p["ct4_w"] = _uniform(ks[12], (32, num_channels, 4, 4), 32 * 16)
    p["ct4_b"] = _uniform(ks[13], (num_channels,), 32 * 16)
    return p


# --------------------------------- main ---------------------------------------

if __name__ == "__main__":
    latent_dim = 16
    num_channels = 3
    image_size = 64   # model only supports 64x64 output
    batch = 2

    key = jax.random.PRNGKey(0)
    pkey, xkey = jax.random.split(key)
    params = init_params(pkey, latent_dim, num_channels)
    x = jax.random.normal(xkey, (batch, latent_dim), jnp.float32)

    fwd = jax.jit(simpleconv64d_forward)
    out = fwd(x, params)
    out = jax.block_until_ready(out)

    assert out.shape == (batch, num_channels, image_size, image_size), out.shape
    assert out.dtype == jnp.float32
    print("KERNEL_OK")
</pallas_src>

<mosaic_0001>
module attributes {stable_mosaic.version = 11 : i64} {
  func.func @_mlp_kernel(%arg0: memref<2x16xf32, #tpu.memory_space<vmem>>, %arg1: memref<16x256xf32, #tpu.memory_space<vmem>>, %arg2: memref<1x256xf32, #tpu.memory_space<vmem>>, %arg3: memref<256x256xf32, #tpu.memory_space<vmem>>, %arg4: memref<1x256xf32, #tpu.memory_space<vmem>>, %arg5: memref<256x1024xf32, #tpu.memory_space<vmem>>, %arg6: memref<1x1024xf32, #tpu.memory_space<vmem>>, %arg7: memref<2x1024xbf16, #tpu.memory_space<vmem>>) attributes {dimension_semantics = [], scalar_prefetch = 0 : i64, scratch_operands = 0 : i64, tpu.core_type = #tpu.core_type<tc>} {
    %c0 = arith.constant 0 : index
    %c0_0 = arith.constant 0 : index
    %0 = vector.load %arg0[%c0, %c0_0] : memref<2x16xf32, #tpu.memory_space<vmem>>, vector<2x16xf32>
    %c0_1 = arith.constant 0 : index
    %c0_2 = arith.constant 0 : index
    %1 = vector.load %arg1[%c0_1, %c0_2] : memref<16x256xf32, #tpu.memory_space<vmem>>, vector<16x256xf32>
    %cst = arith.constant dense<0.000000e+00> : vector<2x256xf32>
    %2 = tpu.matmul %0, %1, %cst {dimension_numbers = #tpu.dot_dimension_numbers<[1], [0], [0], [1], [0, 0, 1, 1], [], []>} : vector<2x16xf32>, vector<16x256xf32>, vector<2x256xf32> -> vector<2x256xf32>
    %c0_3 = arith.constant 0 : index
    %c0_4 = arith.constant 0 : index
    %3 = vector.load %arg2[%c0_3, %c0_4] : memref<1x256xf32, #tpu.memory_space<vmem>>, vector<1x256xf32>
    %4 = vector.broadcast %3 : vector<1x256xf32> to vector<2x256xf32>
    %5 = arith.addf %2, %4 : vector<2x256xf32>
    %cst_5 = arith.constant 0.000000e+00 : f32
    %6 = vector.broadcast %cst_5 : f32 to vector<2x256xf32>
    %7 = arith.maximumf %5, %6 : vector<2x256xf32>
    %c0_6 = arith.constant 0 : index
    %c0_7 = arith.constant 0 : index
    %8 = vector.load %arg3[%c0_6, %c0_7] : memref<256x256xf32, #tpu.memory_space<vmem>>, vector<256x256xf32>
    %cst_8 = arith.constant dense<0.000000e+00> : vector<2x256xf32>
    %9 = tpu.matmul %7, %8, %cst_8 {dimension_numbers = #tpu.dot_dimension_numbers<[1], [0], [0], [1], [0, 0, 1, 1], [], []>} : vector<2x256xf32>, vector<256x256xf32>, vector<2x256xf32> -> vector<2x256xf32>
    %c0_9 = arith.constant 0 : index
    %c0_10 = arith.constant 0 : index
    %10 = vector.load %arg4[%c0_9, %c0_10] : memref<1x256xf32, #tpu.memory_space<vmem>>, vector<1x256xf32>
    %11 = vector.broadcast %10 : vector<1x256xf32> to vector<2x256xf32>
    %12 = arith.addf %9, %11 : vector<2x256xf32>
    %cst_11 = arith.constant 0.000000e+00 : f32
    %13 = vector.broadcast %cst_11 : f32 to vector<2x256xf32>
    %14 = arith.maximumf %12, %13 : vector<2x256xf32>
    %c0_12 = arith.constant 0 : index
    %c0_13 = arith.constant 0 : index
    %15 = vector.load %arg5[%c0_12, %c0_13] : memref<256x1024xf32, #tpu.memory_space<vmem>>, vector<256x1024xf32>
    %cst_14 = arith.constant dense<0.000000e+00> : vector<2x1024xf32>
    %16 = tpu.matmul %14, %15, %cst_14 {dimension_numbers = #tpu.dot_dimension_numbers<[1], [0], [0], [1], [0, 0, 1, 1], [], []>} : vector<2x256xf32>, vector<256x1024xf32>, vector<2x1024xf32> -> vector<2x1024xf32>
    %c0_15 = arith.constant 0 : index
    %c0_16 = arith.constant 0 : index
    %17 = vector.load %arg6[%c0_15, %c0_16] : memref<1x1024xf32, #tpu.memory_space<vmem>>, vector<1x1024xf32>
    %18 = vector.broadcast %17 : vector<1x1024xf32> to vector<2x1024xf32>
    %19 = arith.addf %16, %18 : vector<2x1024xf32>
    %cst_17 = arith.constant 0.000000e+00 : f32
    %20 = vector.broadcast %cst_17 : f32 to vector<2x1024xf32>
    %21 = arith.maximumf %19, %20 : vector<2x1024xf32>
    %22 = arith.truncf %21 : vector<2x1024xf32> to vector<2x1024xbf16>
    %c0_18 = arith.constant 0 : index
    %c0_19 = arith.constant 0 : index
    %23 = vector.load %arg7[%c0_18, %c0_19] : memref<2x1024xbf16, #tpu.memory_space<vmem>>, vector<2x1024xbf16>
    tpu.vector_store %arg7[%c0_18, %c0_19], %22 {strides = array<i32>} : memref<2x1024xbf16, #tpu.memory_space<vmem>>, vector<2x1024xbf16>,
    return
  }
}

module attributes {stable_mosaic.version = 11 : i64} {
  func.func @_matmul_bias_kernel(%arg0: i32, %arg1: memref<64x256xbf16, #tpu.memory_space<vmem>>, %arg2: memref<256x256xbf16, #tpu.memory_space<vmem>>, %arg3: memref<1x256xf32, #tpu.memory_space<vmem>>, %arg4: memref<64x256xbf16, #tpu.memory_space<vmem>>) attributes {dimension_semantics = [#tpu.dimension_semantics<parallel>], iteration_bounds = array<i64: 1>, scalar_prefetch = 0 : i64, scratch_operands = 0 : i64, tpu.core_type = #tpu.core_type<tc>, window_params = [{transform_indices = @transform_0, window_bounds = array<i64: 64, 256>}, {pipeline_mode = #tpu.pipeline_mode<synchronous>, transform_indices = @transform_1, window_bounds = array<i64: 256, 256>}, {pipeline_mode = #tpu.pipeline_mode<synchronous>, transform_indices = @transform_2, window_bounds = array<i64: 1, 256>}, {transform_indices = @transform_3, window_bounds = array<i64: 64, 256>}]} {
    %c0 = arith.constant 0 : index
    %c0_0 = arith.constant 0 : index
    %0 = vector.load %arg1[%c0, %c0_0] : memref<64x256xbf16, #tpu.memory_space<vmem>>, vector<64x256xbf16>
    %c0_1 = arith.constant 0 : index
    %c0_2 = arith.constant 0 : index
    %1 = vector.load %arg2[%c0_1, %c0_2] : memref<256x256xbf16, #tpu.memory_space<vmem>>, vector<256x256xbf16>
    %cst = arith.constant dense<0.000000e+00> : vector<64x256xf32>
    %2 = tpu.matmul %0, %1, %cst {dimension_numbers = #tpu.dot_dimension_numbers<[1], [0], [0], [1], [0, 0, 1, 1], [], []>} : vector<64x256xbf16>, vector<256x256xbf16>, vector<64x256xf32> -> vector<64x256xf32>
    %c0_3 = arith.constant 0 : index
    %c0_4 = arith.constant 0 : index
    %3 = vector.load %arg3[%c0_3, %c0_4] : memref<1x256xf32, #tpu.memory_space<vmem>>, vector<1x256xf32>
    %4 = vector.broadcast %3 : vector<1x256xf32> to vector<64x256xf32>
    %5 = arith.addf %2, %4 : vector<64x256xf32>
    %cst_5 = arith.constant 0.000000e+00 : f32
    %6 = vector.broadcast %cst_5 : f32 to vector<64x256xf32>
    %7 = arith.maximumf %5, %6 : vector<64x256xf32>
    %8 = arith.truncf %7 : vector<64x256xf32> to vector<64x256xbf16>
    %c0_6 = arith.constant 0 : index
    %c0_7 = arith.constant 0 : index
    %9 = vector.load %arg4[%c0_6, %c0_7] : memref<64x256xbf16, #tpu.memory_space<vmem>>, vector<64x256xbf16>
    tpu.vector_store %arg4[%c0_6, %c0_7], %8 {strides = array<i32>} : memref<64x256xbf16, #tpu.memory_space<vmem>>, vector<64x256xbf16>,
    return
  }
  func.func @transform_0(%arg0: i32) -> (i32, i32) {
    %c0_i32 = arith.constant 0 : i32
    %c0_i32_0 = arith.constant 0 : i32
    return %arg0, %c0_i32 : i32, i32
  }
  func.func @transform_1(%arg0: i32) -> (i32, i32) {
    %c0_i32 = arith.constant 0 : i32
    %c0_i32_0 = arith.constant 0 : i32
    %c0_i32_1 = arith.constant 0 : i32
    return %c0_i32, %c0_i32_0 : i32, i32
  }
  func.func @transform_2(%arg0: i32) -> (i32, i32) {
    %c0_i32 = arith.constant 0 : i32
    %c0_i32_0 = arith.constant 0 : i32
    %c0_i32_1 = arith.constant 0 : i32
    return %c0_i32, %c0_i32_0 : i32, i32
  }
  func.func @transform_3(%arg0: i32) -> (i32, i32) {
    %c0_i32 = arith.constant 0 : i32
    %c0_i32_0 = arith.constant 0 : i32
    return %arg0, %c0_i32 : i32, i32
  }
}

module attributes {stable_mosaic.version = 11 : i64} {
  func.func @_matmul_bias_kernel(%arg0: i32, %arg1: memref<176x256xbf16, #tpu.memory_space<vmem>>, %arg2: memref<256x128xbf16, #tpu.memory_space<vmem>>, %arg3: memref<1x128xf32, #tpu.memory_space<vmem>>, %arg4: memref<176x128xbf16, #tpu.memory_space<vmem>>) attributes {dimension_semantics = [#tpu.dimension_semantics<parallel>], iteration_bounds = array<i64: 1>, scalar_prefetch = 0 : i64, scratch_operands = 0 : i64, tpu.core_type = #tpu.core_type<tc>, window_params = [{transform_indices = @transform_0, window_bounds = array<i64: 176, 256>}, {pipeline_mode = #tpu.pipeline_mode<synchronous>, transform_indices = @transform_1, window_bounds = array<i64: 256, 128>}, {pipeline_mode = #tpu.pipeline_mode<synchronous>, transform_indices = @transform_2, window_bounds = array<i64: 1, 128>}, {transform_indices = @transform_3, window_bounds = array<i64: 176, 128>}]} {
    %c0 = arith.constant 0 : index
    %c0_0 = arith.constant 0 : index
    %0 = vector.load %arg1[%c0, %c0_0] : memref<176x256xbf16, #tpu.memory_space<vmem>>, vector<176x256xbf16>
    %c0_1 = arith.constant 0 : index
    %c0_2 = arith.constant 0 : index
    %1 = vector.load %arg2[%c0_1, %c0_2] : memref<256x128xbf16, #tpu.memory_space<vmem>>, vector<256x128xbf16>
    %cst = arith.constant dense<0.000000e+00> : vector<176x128xf32>
    %2 = tpu.matmul %0, %1, %cst {dimension_numbers = #tpu.dot_dimension_numbers<[1], [0], [0], [1], [0, 0, 1, 1], [], []>} : vector<176x256xbf16>, vector<256x128xbf16>, vector<176x128xf32> -> vector<176x128xf32>
    %c0_3 = arith.constant 0 : index
    %c0_4 = arith.constant 0 : index
    %3 = vector.load %arg3[%c0_3, %c0_4] : memref<1x128xf32, #tpu.memory_space<vmem>>, vector<1x128xf32>
    %4 = vector.broadcast %3 : vector<1x128xf32> to vector<176x128xf32>
    %5 = arith.addf %2, %4 : vector<176x128xf32>
    %cst_5 = arith.constant 0.000000e+00 : f32
    %6 = vector.broadcast %cst_5 : f32 to vector<176x128xf32>
    %7 = arith.maximumf %5, %6 : vector<176x128xf32>
    %8 = arith.truncf %7 : vector<176x128xf32> to vector<176x128xbf16>
    %c0_6 = arith.constant 0 : index
    %c0_7 = arith.constant 0 : index
    %9 = vector.load %arg4[%c0_6, %c0_7] : memref<176x128xbf16, #tpu.memory_space<vmem>>, vector<176x128xbf16>
    tpu.vector_store %arg4[%c0_6, %c0_7], %8 {strides = array<i32>} : memref<176x128xbf16, #tpu.memory_space<vmem>>, vector<176x128xbf16>,
    return
  }
  func.func @transform_0(%arg0: i32) -> (i32, i32) {
    %c0_i32 = arith.constant 0 : i32
    %c0_i32_0 = arith.constant 0 : i32
    return %arg0, %c0_i32 : i32, i32
  }
  func.func @transform_1(%arg0: i32) -> (i32, i32) {
    %c0_i32 = arith.constant 0 : i32
    %c0_i32_0 = arith.constant 0 : i32
    %c0_i32_1 = arith.constant 0 : i32
    return %c0_i32, %c0_i32_0 : i32, i32
  }
  func.func @transform_2(%arg0: i32) -> (i32, i32) {
    %c0_i32 = arith.constant 0 : i32
    %c0_i32_0 = arith.constant 0 : i32
    %c0_i32_1 = arith.constant 0 : i32
    return %c0_i32, %c0_i32_0 : i32, i32
  }
  func.func @transform_3(%arg0: i32) -> (i32, i32) {
    %c0_i32 = arith.constant 0 : i32
    %c0_i32_0 = arith.constant 0 : i32
    return %arg0, %c0_i32 : i32, i32
  }
}

module attributes {stable_mosaic.version = 11 : i64} {
  func.func @_matmul_bias_kernel(%arg0: i32, %arg1: memref<592x128xbf16, #tpu.memory_space<vmem>>, %arg2: memref<128x128xbf16, #tpu.memory_space<vmem>>, %arg3: memref<1x128xf32, #tpu.memory_space<vmem>>, %arg4: memref<592x128xbf16, #tpu.memory_space<vmem>>) attributes {dimension_semantics = [#tpu.dimension_semantics<parallel>], iteration_bounds = array<i64: 1>, scalar_prefetch = 0 : i64, scratch_operands = 0 : i64, tpu.core_type = #tpu.core_type<tc>, window_params = [{transform_indices = @transform_0, window_bounds = array<i64: 592, 128>}, {pipeline_mode = #tpu.pipeline_mode<synchronous>, transform_indices = @transform_1, window_bounds = array<i64: 128, 128>}, {pipeline_mode = #tpu.pipeline_mode<synchronous>, transform_indices = @transform_2, window_bounds = array<i64: 1, 128>}, {transform_indices = @transform_3, window_bounds = array<i64: 592, 128>}]} {
    %c0 = arith.constant 0 : index
    %c0_0 = arith.constant 0 : index
    %0 = vector.load %arg1[%c0, %c0_0] : memref<592x128xbf16, #tpu.memory_space<vmem>>, vector<592x128xbf16>
    %c0_1 = arith.constant 0 : index
    %c0_2 = arith.constant 0 : index
    %1 = vector.load %arg2[%c0_1, %c0_2] : memref<128x128xbf16, #tpu.memory_space<vmem>>, vector<128x128xbf16>
    %cst = arith.constant dense<0.000000e+00> : vector<592x128xf32>
    %2 = tpu.matmul %0, %1, %cst {dimension_numbers = #tpu.dot_dimension_numbers<[1], [0], [0], [1], [0, 0, 1, 1], [], []>} : vector<592x128xbf16>, vector<128x128xbf16>, vector<592x128xf32> -> vector<592x128xf32>
    %c0_3 = arith.constant 0 : index
    %c0_4 = arith.constant 0 : index
    %3 = vector.load %arg3[%c0_3, %c0_4] : memref<1x128xf32, #tpu.memory_space<vmem>>, vector<1x128xf32>
    %4 = vector.broadcast %3 : vector<1x128xf32> to vector<592x128xf32>
    %5 = arith.addf %2, %4 : vector<592x128xf32>
    %cst_5 = arith.constant 0.000000e+00 : f32
    %6 = vector.broadcast %cst_5 : f32 to vector<592x128xf32>
    %7 = arith.maximumf %5, %6 : vector<592x128xf32>
    %8 = arith.truncf %7 : vector<592x128xf32> to vector<592x128xbf16>
    %c0_6 = arith.constant 0 : index
    %c0_7 = arith.constant 0 : index
    %9 = vector.load %arg4[%c0_6, %c0_7] : memref<592x128xbf16, #tpu.memory_space<vmem>>, vector<592x128xbf16>
    tpu.vector_store %arg4[%c0_6, %c0_7], %8 {strides = array<i32>} : memref<592x128xbf16, #tpu.memory_space<vmem>>, vector<592x128xbf16>,
    return
  }
  func.func @transform_0(%arg0: i32) -> (i32, i32) {
    %c0_i32 = arith.constant 0 : i32
    %c0_i32_0 = arith.constant 0 : i32
    return %arg0, %c0_i32 : i32, i32
  }
  func.func @transform_1(%arg0: i32) -> (i32, i32) {
    %c0_i32 = arith.constant 0 : i32
    %c0_i32_0 = arith.constant 0 : i32
    %c0_i32_1 = arith.constant 0 : i32
    return %c0_i32, %c0_i32_0 : i32, i32
  }
  func.func @transform_2(%arg0: i32) -> (i32, i32) {
    %c0_i32 = arith.constant 0 : i32
    %c0_i32_0 = arith.constant 0 : i32
    %c0_i32_1 = arith.constant 0 : i32
    return %c0_i32, %c0_i32_0 : i32, i32
  }
  func.func @transform_3(%arg0: i32) -> (i32, i32) {
    %c0_i32 = arith.constant 0 : i32
    %c0_i32_0 = arith.constant 0 : i32
    return %arg0, %c0_i32 : i32, i32
  }
}

module attributes {stable_mosaic.version = 11 : i64} {
  func.func @_matmul_bias_kernel(%arg0: i32, %arg1: memref<560x128xbf16, #tpu.memory_space<vmem>>, %arg2: memref<128x128xbf16, #tpu.memory_space<vmem>>, %arg3: memref<1x128xf32, #tpu.memory_space<vmem>>, %arg4: memref<560x128xf32, #tpu.memory_space<vmem>>) attributes {dimension_semantics = [#tpu.dimension_semantics<parallel>], iteration_bounds = array<i64: 4>, scalar_prefetch = 0 : i64, scratch_operands = 0 : i64, tpu.core_type = #tpu.core_type<tc>, window_params = [{transform_indices = @transform_0, window_bounds = array<i64: 560, 128>}, {pipeline_mode = #tpu.pipeline_mode<synchronous>, transform_indices = @transform_1, window_bounds = array<i64: 128, 128>}, {pipeline_mode = #tpu.pipeline_mode<synchronous>, transform_indices = @transform_2, window_bounds = array<i64: 1, 128>}, {transform_indices = @transform_3, window_bounds = array<i64: 560, 128>}]} {
    %c0 = arith.constant 0 : index
    %c0_0 = arith.constant 0 : index
    %0 = vector.load %arg1[%c0, %c0_0] : memref<560x128xbf16, #tpu.memory_space<vmem>>, vector<560x128xbf16>
    %c0_1 = arith.constant 0 : index
    %c0_2 = arith.constant 0 : index
    %1 = vector.load %arg2[%c0_1, %c0_2] : memref<128x128xbf16, #tpu.memory_space<vmem>>, vector<128x128xbf16>
    %cst = arith.constant dense<0.000000e+00> : vector<560x128xf32>
    %2 = tpu.matmul %0, %1, %cst {dimension_numbers = #tpu.dot_dimension_numbers<[1], [0], [0], [1], [0, 0, 1, 1], [], []>} : vector<560x128xbf16>, vector<128x128xbf16>, vector<560x128xf32> -> vector<560x128xf32>
    %c0_3 = arith.constant 0 : index
    %c0_4 = arith.constant 0 : index
    %3 = vector.load %arg3[%c0_3, %c0_4] : memref<1x128xf32, #tpu.memory_space<vmem>>, vector<1x128xf32>
    %4 = vector.broadcast %3 : vector<1x128xf32> to vector<560x128xf32>
    %5 = arith.addf %2, %4 : vector<560x128xf32>
    %c0_5 = arith.constant 0 : index
    %c0_6 = arith.constant 0 : index
    %6 = vector.load %arg4[%c0_5, %c0_6] : memref<560x128xf32, #tpu.memory_space<vmem>>, vector<560x128xf32>
    tpu.vector_store %arg4[%c0_5, %c0_6], %5 {strides = array<i32>} : memref<560x128xf32, #tpu.memory_space<vmem>>, vector<560x128xf32>,
    return
  }
  func.func @transform_0(%arg0: i32) -> (i32, i32) {
    %c0_i32 = arith.constant 0 : i32
    %c0_i32_0 = arith.constant 0 : i32
    return %arg0, %c0_i32 : i32, i32
  }
  func.func @transform_1(%arg0: i32) -> (i32, i32) {
    %c0_i32 = arith.constant 0 : i32
    %c0_i32_0 = arith.constant 0 : i32
    %c0_i32_1 = arith.constant 0 : i32
    return %c0_i32, %c0_i32_0 : i32, i32
  }
  func.func @transform_2(%arg0: i32) -> (i32, i32) {
    %c0_i32 = arith.constant 0 : i32
    %c0_i32_0 = arith.constant 0 : i32
    %c0_i32_1 = arith.constant 0 : i32
    return %c0_i32, %c0_i32_0 : i32, i32
  }
  func.func @transform_3(%arg0: i32) -> (i32, i32) {
    %c0_i32 = arith.constant 0 : i32
    %c0_i32_0 = arith.constant 0 : i32
    return %arg0, %c0_i32 : i32, i32
  }
}

</mosaic_0001>

<bundles_post_ra>
// kernel: tile.29
= control target key start
LH: loop header
LB: loop body
LE: loop exit
PB: predicated region body
PF: predicated region fallthrough
CT: control target
= control target key end

     0   :  { %s37_s8 = smov 32   ;;  %s38_s9 = smov 64   ;;  %vm7_vm0 = vcmask 261120   ;;  %vm13_vm1 = vcmask 1048320   ;;  %vm19_vm2 = vcmask 785920   ;;  %vm25_vm3 = vcmask 523520   ;;  %s55_s0 = inlined_call_operand.vmem [shape: f32[4,32], index: 0, kind: input, shape index: {}]   ;;  %s56_s1 = inlined_call_operand.vmem [shape: f32[1,128], index: 1, kind: output, shape index: {}]  }
   0x1   :  { %v4_v0 = vld [vmem:[%s55_s0] sm:$0xf]  ;;  %s36_s0 = smov 96  }
   0x2   :  { %5 = vst [vmem:[#allocation1] sm:$0xf] %v4_v0 }
   0x9   :  { %v10_v1 = vld [vmem:[#allocation1 + $0x3] sm:$0x1]   ;;  %v22_v2 = vld [vmem:[#allocation1 + $0x1] sm:$0x1]   ;;  %v16_v3 = vld [vmem:[#allocation1 + $0x2] sm:$0x1]  }
   0xa   :  { %11 = vrot.lane.b32.xlu0 %v10_v1, %s36_s0  ;;  %23 = vrot.lane.b32.xlu1 %v22_v2, %s37_s8  ;;  %v6_v4 = vld [vmem:[#allocation1] sm:$0x1]  }
   0xb   :  { %8 = vst.msk [vmem:[#allocation0] sm:$0x1] %vm7_vm0, %v6_v4  }
  0x12   :  { %17 = vrot.lane.b32.xlu0 %v16_v3, %s38_s9 }
  0x7c   :  { %v12_v5 = vpop.permute.xlu0 %11   ;;  %v24_v6 = vpop.permute.xlu1 %23  }
  0x7d   :  { %14 = vst.msk [vmem:[#allocation0] sm:$0x1] %vm13_vm1, %v12_v5  }
  0x84   :  { %v18_v7 = vpop.permute.xlu0 %17  }
  0x85   :  { %20 = vst.msk [vmem:[#allocation0] sm:$0x1] %vm19_vm2, %v18_v7  }
  0x86   :  { %26 = vst.msk [vmem:[#allocation0] sm:$0x1] %vm25_vm3, %v24_v6  }
  0x8d   :  { %v29_v8 = vld [vmem:[#allocation0] sm:$0x1] }
  0x8e   :  { %32 = vst [vmem:[%s56_s1] sm:$0x1] %v29_v8 }

// kernel: tile.24
= control target key start
LH: loop header
LB: loop body
LE: loop exit
PB: predicated region body
PF: predicated region fallthrough
CT: control target
= control target key end

     0   :  { %s6_s8 = smov 3  ;;  %vm8_vm0 = vcmask 523264   ;;  %s31_s9 = smov 64   ;;  %vm15_vm1 = vcmask 1048064   ;;  %s51_s0 = inlined_call_operand.vmem [shape: f32[4,64], index: 0, kind: input, shape index: {}]   ;;  %s52_s1 = inlined_call_operand.vmem [shape: f32[1,256], index: 1, kind: output, shape index: {}]  }
   0x1   :  { %v4_v0 = vld [vmem:[%s51_s0] sm:$0xf]  ;;  %s11_s0 = smov 3 }
   0x2   :  { %5 = vst [vmem:[#allocation1] sm:$0xf] %v4_v0 }
   0x9   :  { %v12_v1 = vld [vmem:[#allocation1 + $0x1] ss:$2 sm:%s11_s0]   ;;  %v7_v2 = vld [vmem:[#allocation1] ss:$2 sm:%s6_s8]  }
   0xa   :  { %13 = vrot.lane.b32.xlu0 %v12_v1, %s31_s9  ;;  %9 = vst.msk [vmem:[#allocation0] ss:$8 sm:$0x3] %vm8_vm0, %v7_v2  }
  0x7c   :  { %v14_v3 = vpop.permute.xlu0 %13  }
  0x7d   :  { %16 = vst.msk [vmem:[#allocation0] ss:$8 sm:$0x3] %vm15_vm1, %v14_v3  }
  0x84   :  { %v19_v4 = vld [vmem:[#allocation0] sm:$0x1]  ;;  %v24_v5 = vld [vmem:[#allocation0 + $0x8] sm:$0x1] }
  0x85   :  { %22 = vst [vmem:[%s52_s1] sm:$0x1] %v19_v4 }
  0x86   :  { %29 = vst [vmem:[%s52_s1 + $0x1] sm:$0x1] %v24_v5 }

// kernel: tile.23
= control target key start
LH: loop header
LB: loop body
LE: loop exit
PB: predicated region body
PF: predicated region fallthrough
CT: control target
= control target key end

     0   :  { %2 = vsyncpa [#allocation1], 0  ;;  %s48_s8 = smov [#allocation0]   ;;  %s65_s0 = inlined_call_operand.hbm [shape: f32[64], index: 0, kind: input, shape index: {}]   ;;  %s66_s1 = inlined_call_operand.vmem [shape: f32[4,64], index: 1, kind: output, shape index: {}]  }
   0x1   :  { %s8_s0 = sshll.u32 %s65_s0, 4  ;;  %s10_s9 = sshll.u32 %s48_s8, 4  ;;  %s9_s0 = int_to_ptr.hbm [resolvable:$true] %s8_s0  ;;  %s11_s9 = int_to_ptr.vmem [resolvable:$true] %s10_s9 }
   0x2   :  { %13 = dma.hbm_to_vmem [thread:$0]  %s9_s0, 16, %s11_s9, [#allocation1]  }
   0x3   :  { %46 = dma.done.wait [#allocation1], 16  }
   0x4   :  { %47 = vsyncadd [#allocation1], 4294967280  ;;  %v18_v0 = vld [vmem:[#allocation0] ss:$0 sm:$0xff] }
   0x5   :  { %19 = vst [vmem:[%s66_s1] sm:$0xf] %v18_v0 }
   0x6   :  { %20 = vsyncpa [#allocation1], 1 }

// kernel: tile.28
= control target key start
LH: loop header
LB: loop body
LE: loop exit
PB: predicated region body
PF: predicated region fallthrough
CT: control target
= control target key end

     0   :  { %2 = vsyncpa [#allocation1], 0  ;;  %s48_s8 = smov [#allocation0]   ;;  %s65_s0 = inlined_call_operand.hbm [shape: f32[32], index: 0, kind: input, shape index: {}]   ;;  %s66_s1 = inlined_call_operand.vmem [shape: f32[4,32], index: 1, kind: output, shape index: {}]  }
   0x1   :  { %s8_s0 = sshll.u32 %s65_s0, 4  ;;  %s10_s9 = sshll.u32 %s48_s8, 4  ;;  %s9_s0 = int_to_ptr.hbm [resolvable:$true] %s8_s0  ;;  %s11_s9 = int_to_ptr.vmem [resolvable:$true] %s10_s9 }
   0x2   :  { %13 = dma.hbm_to_vmem [thread:$0]  %s9_s0, 16, %s11_s9, [#allocation1]  }
   0x3   :  { %46 = dma.done.wait [#allocation1], 16  }
   0x4   :  { %47 = vsyncadd [#allocation1], 4294967280  ;;  %v18_v0 = vld [vmem:[#allocation0] ss:$0 sm:$0xff] }
   0x5   :  { %19 = vst [vmem:[%s66_s1] sm:$0xf] %v18_v0 }
   0x6   :  { %20 = vsyncpa [#allocation1], 1 }

// kernel: tile.39
= control target key start
LH: loop header
LB: loop body
LE: loop exit
PB: predicated region body
PF: predicated region fallthrough
CT: control target
= control target key end

     0   :  { %s37_s8 = smov 3   ;;  %s38_s9 = smov 6   ;;  %vm7_vm0 = vcmask 23552   ;;  %vm13_vm1 = vcmask 97352   ;;  %vm19_vm2 = vcmask 72752   ;;  %vm25_vm3 = vcmask 48152   ;;  %s55_s0 = inlined_call_operand.vmem [shape: f32[4,3], index: 0, kind: input, shape index: {}]   ;;  %s56_s1 = inlined_call_operand.vmem [shape: f32[12], index: 1, kind: output, shape index: {}]  }
   0x1   :  { %v4_v0 = vld [vmem:[%s55_s0] sm:$0xf]  ;;  %s36_s0 = smov 9  }
   0x2   :  { %5 = vst [vmem:[#allocation1] sm:$0xf] %v4_v0 }
   0x9   :  { %v10_v1 = vld [vmem:[#allocation1 + $0x3] sm:$0x1]   ;;  %v22_v2 = vld [vmem:[#allocation1 + $0x1] sm:$0x1]   ;;  %v16_v3 = vld [vmem:[#allocation1 + $0x2] sm:$0x1]  }
   0xa   :  { %11 = vrot.lane.b32.xlu0 %v10_v1, %s36_s0  ;;  %23 = vrot.lane.b32.xlu1 %v22_v2, %s37_s8  ;;  %v6_v4 = vld [vmem:[#allocation1] sm:$0x1]  }
   0xb   :  { %8 = vst.msk [vmem:[#allocation0] sm:$0x1] %vm7_vm0, %v6_v4  }
  0x12   :  { %17 = vrot.lane.b32.xlu0 %v16_v3, %s38_s9 }
  0x7c   :  { %v12_v5 = vpop.permute.xlu0 %11   ;;  %v24_v6 = vpop.permute.xlu1 %23  }
  0x7d   :  { %14 = vst.msk [vmem:[#allocation0] sm:$0x1] %vm13_vm1, %v12_v5  }
  0x84   :  { %v18_v7 = vpop.permute.xlu0 %17  }
  0x85   :  { %20 = vst.msk [vmem:[#allocation0] sm:$0x1] %vm19_vm2, %v18_v7  }
  0x86   :  { %26 = vst.msk [vmem:[#allocation0] sm:$0x1] %vm25_vm3, %v24_v6  }
  0x8d   :  { %v29_v8 = vld [vmem:[#allocation0] sm:$0x1] }
  0x8e   :  { %32 = vst [vmem:[%s56_s1] sm:$0x1] %v29_v8 }

// kernel: tile.38
= control target key start
LH: loop header
LB: loop body
LE: loop exit
PB: predicated region body
PF: predicated region fallthrough
CT: control target
= control target key end

     0   :  { %2 = vsyncpa [#allocation1], 0  ;;  %s48_s8 = smov [#allocation0]   ;;  %s65_s0 = inlined_call_operand.hbm [shape: f32[3], index: 0, kind: input, shape index: {}]   ;;  %s66_s1 = inlined_call_operand.vmem [shape: f32[4,3], index: 1, kind: output, shape index: {}]  }
   0x1   :  { %s8_s0 = sshll.u32 %s65_s0, 4  ;;  %s10_s9 = sshll.u32 %s48_s8, 4  ;;  %s9_s0 = int_to_ptr.hbm [resolvable:$true] %s8_s0  ;;  %s11_s9 = int_to_ptr.vmem [resolvable:$true] %s10_s9 }
   0x2   :  { %13 = dma.hbm_to_vmem [thread:$0]  %s9_s0, 16, %s11_s9, [#allocation1]  }
   0x3   :  { %46 = dma.done.wait [#allocation1], 16  }
   0x4   :  { %47 = vsyncadd [#allocation1], 4294967280  ;;  %v18_v0 = vld [vmem:[#allocation0] ss:$0 sm:$0xff] }
   0x5   :  { %19 = vst [vmem:[%s66_s1] sm:$0xf] %v18_v0 }
   0x6   :  { %20 = vsyncpa [#allocation1], 1 }

// kernel: simpleconv64d_forward.5
= control target key start
LH: loop header
LB: loop body
LE: loop exit
PB: predicated region body
PF: predicated region fallthrough
CT: control target
= control target key end

     0   :  { %12 = vsyncpa [#allocation3], 0  ;;  %s1269_s0 = inlined_call_operand.hbm [shape: f32[2,16], index: 0, kind: input, shape index: {}]   ;;  %s1270_s1 = inlined_call_operand.hbm [shape: f32[16,256], index: 1, kind: input, shape index: {}]   ;;  %s1271_s2 = inlined_call_operand.hbm [shape: f32[1,256], index: 2, kind: input, shape index: {}]   ;;  %s1272_s3 = inlined_call_operand.hbm [shape: f32[256,256], index: 3, kind: input, shape index: {}]   ;;  %s1273_s4 = inlined_call_operand.hbm [shape: f32[1,256], index: 4, kind: input, shape index: {}]   ;;  %s1274_s5 = inlined_call_operand.hbm [shape: f32[256,1024], index: 5, kind: input, shape index: {}]   ;;  %s1275_s6 = inlined_call_operand.hbm [shape: f32[1,1024], index: 6, kind: input, shape index: {}]   ;;  %s1276_s7 = inlined_call_operand.vmem [shape: bf16[2,1024], index: 7, kind: output, shape index: {}]  }
   0x1   :  { %13 = vsyncpa [#allocation5], 0 }
   0x2   :  { %14 = vsyncpa [#allocation8], 0  ;;  %s31_s26 = sshll.u32 %s1270_s1, 4  ;;  %s32_s26 = int_to_ptr.hbm [resolvable:$true] %s31_s26 }
   0x3   :  { %15 = vsyncpa [#allocation11], 0  ;;  %s1174_s27 = smov [#allocation4]   ;;  %s55_s8 = sshll.u32 %s1272_s3, 4  ;;  %s56_s8 = int_to_ptr.hbm [resolvable:$true] %s55_s8 }
   0x4   :  { %s33_s28 = sshll.u32 %s1174_s27, 4  ;;  %s1175_s9 = smov 256   ;;  %s34_s28 = int_to_ptr.vmem [resolvable:$true] %s33_s28 }
   0x5   :  { %s1176_s10 = smov 16   ;;  %s1177_s11 = smov [#allocation7]  }
   0x6   :  { %39 = dma.hbm_to_vmem [thread:$0]  %s32_s26, 512, %s34_s28, [#allocation5], %s1175_s9, %s1175_s9, %s1176_s10  }
   0x7   :  { %s57_s12 = sshll.u32 %s1177_s11, 4  ;;  %s79_s15 = sshll.u32 %s1274_s5, 4  ;;  %s58_s12 = int_to_ptr.vmem [resolvable:$true] %s57_s12  ;;  %s80_s15 = int_to_ptr.hbm [resolvable:$true] %s79_s15 }
   0x8   :  { %63 = dma.hbm_to_vmem [thread:$0]  %s56_s8, 8192, %s58_s12, [#allocation8], %s1175_s9, %s1175_s9, %s1176_s10  }
   0x9   :  { %s1178_s1 = smov [#allocation10]   ;;  %s21_s3 = sshll.u32 %s1269_s0, 4  ;;  %s22_s3 = int_to_ptr.hbm [resolvable:$true] %s21_s3 }
   0xa   :  { %s81_s16 = sshll.u32 %s1178_s1, 4  ;;  %s1179_s19 = smov 1024   ;;  %s82_s16 = int_to_ptr.vmem [resolvable:$true] %s81_s16 }
   0xb   :  { %s1180_s20 = smov 64   ;;  %s1181_s21 = smov [#allocation2]  }
   0xc   :  { %87 = dma.hbm_to_vmem [thread:$0]  %s80_s15, 32768, %s82_s16, [#allocation11], %s1179_s19, %s1179_s19, %s1180_s20  }
   0xd   :  { %s23_s22 = sshll.u32 %s1181_s21, 4  ;;  %s45_s5 = sshll.u32 %s1271_s2, 4  ;;  %s24_s22 = int_to_ptr.vmem [resolvable:$true] %s23_s22  ;;  %s46_s5 = int_to_ptr.hbm [resolvable:$true] %s45_s5 }
   0xe   :  { %26 = dma.hbm_to_vmem [thread:$0]  %s22_s3, 32, %s24_s22, [#allocation3]  }
   0xf   :  { %s69_s27 = sshll.u32 %s1273_s4, 4  ;;  %s1182_s28 = smov [#allocation6]   ;;  %s70_s27 = int_to_ptr.hbm [resolvable:$true] %s69_s27 }
  0x10   :  { %s47_s29 = sshll.u32 %s1182_s28, 4  ;;  %s1183_s0 = smov [#allocation9]   ;;  %s48_s29 = int_to_ptr.vmem [resolvable:$true] %s47_s29 }
  0x11   :  { %50 = dma.hbm_to_vmem [thread:$0]  %s46_s5, 32, %s48_s29, [#allocation5]  }
  0x12   :  { %s71_s30 = sshll.u32 %s1183_s0, 4  ;;  %s93_s10 = sshll.u32 %s1275_s6, 4  ;;  %s72_s30 = int_to_ptr.vmem [resolvable:$true] %s71_s30  ;;  %s94_s10 = int_to_ptr.hbm [resolvable:$true] %s93_s10 }
  0x13   :  { %74 = dma.hbm_to_vmem [thread:$0]  %s70_s27, 32, %s72_s30, [#allocation8]  }
  0x14   :  { %s1184_s2 = smov [#allocation12]  }
  0x15   :  { %s95_s11 = sshll.u32 %s1184_s2, 4  ;;  %s96_s11 = int_to_ptr.vmem [resolvable:$true] %s95_s11 }
  0x16   :  { %98 = dma.hbm_to_vmem [thread:$0]  %s94_s10, 128, %s96_s11, [#allocation11]  }
  0x17   :  { %1166 = dma.done.wait [#allocation3], 32  }
  0x18   :  { %1167 = vsyncadd [#allocation3], 4294967264 }
  0x19   :  { %1168 = dma.done.wait [#allocation5], 544  }
  0x1a   :  { %1169 = vsyncadd [#allocation5], 4294966752 }
  0x1b   :  { %1170 = dma.done.wait [#allocation8], 8224  }
  0x1c   :  { %1171 = vsyncadd [#allocation8], 4294959072 }
  0x1d   :  { %1172 = dma.done.wait [#allocation11], 32896  }
  0x1e   :  { %1173 = vsyncadd [#allocation11], 4294934400  ;;  %v130_v0 = vld [vmem:[#allocation4 + $0x10] sm:$0xff]  ;;  %v128_v1 = vld [vmem:[#allocation4] sm:$0xff]  ;;  %vm138_vm0 = vcmask 130048   ;;  %vm957_vm1 = vcmask 1042434  }
  0x1f   :  { %v131_v2 = vld [vmem:[#allocation4 + $0x18] sm:$0xff]  ;;  %156 = vmatpush.msra.mxu0 %v130_v0  ;;  %v129_v4 = vld [vmem:[#allocation4 + $0x8] sm:$0xff]  ;;  %vm953_vm2 = vcmask 1040384   ;;  %vm961_vm3 = vcmask 1041408   ;;  %vm963_vm4 = vcmask 1044484   ;;  %vm967_vm5 = vcmask 1046534  }
  0x20   :  { %176 = vmatpush.msra.mxu1 %v131_v2  ;;  %v127_v3 = vld [vmem:[#allocation2] sm:$0x3]  ;;  %v214_v5 = vld [vmem:[#allocation7 + $0xf0] sm:$0xff]  ;;  %v212_v7 = vld [vmem:[#allocation7 + $0xe0] sm:$0xff]  ;;  %vm971_vm6 = vcmask 1045508   ;;  %vm973_vm7 = vcmask 1043456  }
  0x21   :  { %254 = vmatpush.msra.mxu2 %v214_v5  ;;  %v215_v6 = vld [vmem:[#allocation7 + $0xf8] sm:$0xff]  ;;  %157 = vmatpush.msra.mxu0 %v128_v1  ;;  %v246_v8 = vld [vmem:[#allocation7 + $0x1f0] sm:$0xff]  ;;  %v213_v10 = vld [vmem:[#allocation7 + $0xe8] sm:$0xff] }
  0x22   :  { %177 = vmatpush.msra.mxu1 %v129_v4  ;;  %v247_v9 = vld [vmem:[#allocation7 + $0x1f8] sm:$0xff]  ;;  %985 = vmatmul.msk.f32.vlgmr.msra.gmra.mxu0 %vm138_vm0, %v127_v3  ;;  %v210_v11 = vld [vmem:[#allocation7 + $0xd0] sm:$0xff]  ;;  %v244_v12 = vld [vmem:[#allocation7 + $0x1e0] sm:$0xff] }
  0x23   :  { %986 = vmatmul.msk.f32.vlgmr.msra.gmra.mxu1 %vm138_vm0, %v127_v3  ;;  %294 = vmatpush.msrb.mxu0 %v215_v6  ;;  %v245_v13 = vld [vmem:[#allocation7 + $0x1e8] sm:$0xff]  ;;  %v211_v14 = vld [vmem:[#allocation7 + $0xd8] sm:$0xff]  ;;  %v208_v15 = vld [vmem:[#allocation7 + $0xc0] sm:$0xff] }
  0x24   :  { %255 = vmatpush.msra.mxu2 %v212_v7  ;;  %274 = vmatpush.msra.mxu3 %v246_v8  ;;  %v242_v16 = vld [vmem:[#allocation7 + $0x1d0] sm:$0xff]  ;;  %v243_v17 = vld [vmem:[#allocation7 + $0x1d8] sm:$0xff]  ;;  %v209_v18 = vld [vmem:[#allocation7 + $0xc8] sm:$0xff] }
  0x25   :  { %314 = vmatpush.msrb.mxu1 %v247_v9  ;;  %295 = vmatpush.msrb.mxu0 %v213_v10  ;;  %v206_v19 = vld [vmem:[#allocation7 + $0xb0] sm:$0xff]  ;;  %v240_v20 = vld [vmem:[#allocation7 + $0x1c0] sm:$0xff]  ;;  %v241_v21 = vld [vmem:[#allocation7 + $0x1c8] sm:$0xff] }
  0x26   :  { %256 = vmatpush.msra.mxu2 %v210_v11  ;;  %275 = vmatpush.msra.mxu3 %v244_v12  ;;  %v207_v22 = vld [vmem:[#allocation7 + $0xb8] sm:$0xff]  ;;  %v204_v23 = vld [vmem:[#allocation7 + $0xa0] sm:$0xff]  ;;  %v238_v24 = vld [vmem:[#allocation7 + $0x1b0] sm:$0xff] }
  0x27   :  { %315 = vmatpush.msrb.mxu1 %v245_v13  ;;  %296 = vmatpush.msrb.mxu0 %v211_v14  ;;  %v239_v25 = vld [vmem:[#allocation7 + $0x1b8] sm:$0xff]  ;;  %v205_v26 = vld [vmem:[#allocation7 + $0xa8] sm:$0xff]  ;;  %v202_v27 = vld [vmem:[#allocation7 + $0x90] sm:$0xff] }
  0x28   :  { %257 = vmatpush.msra.mxu2 %v208_v15  ;;  %276 = vmatpush.msra.mxu3 %v242_v16  ;;  %v236_v28 = vld [vmem:[#allocation7 + $0x1a0] sm:$0xff]  ;;  %v237_v29 = vld [vmem:[#allocation7 + $0x1a8] sm:$0xff]  ;;  %v203_v30 = vld [vmem:[#allocation7 + $0x98] sm:$0xff] }
  0x29   :  { %316 = vmatpush.msrb.mxu1 %v243_v17  ;;  %297 = vmatpush.msrb.mxu0 %v209_v18  ;;  %v200_v31 = vld [vmem:[#allocation7 + $0x80] sm:$0xff]  ;;  %v234_v32 = vld [vmem:[#allocation7 + $0x190] sm:$0xff]  ;;  %v235_v33 = vld [vmem:[#allocation7 + $0x198] sm:$0xff] }
  0x2a   :  { %258 = vmatpush.msra.mxu2 %v206_v19  ;;  %277 = vmatpush.msra.mxu3 %v240_v20  ;;  %v201_v34 = vld [vmem:[#allocation7 + $0x88] sm:$0xff]  ;;  %v198_v35 = vld [vmem:[#allocation7 + $0x70] sm:$0xff]  ;;  %v232_v36 = vld [vmem:[#allocation7 + $0x180] sm:$0xff] }
  0x2b   :  { %317 = vmatpush.msrb.mxu1 %v241_v21  ;;  %298 = vmatpush.msrb.mxu0 %v207_v22  ;;  %v233_v37 = vld [vmem:[#allocation7 + $0x188] sm:$0xff]  ;;  %v199_v38 = vld [vmem:[#allocation7 + $0x78] sm:$0xff]  ;;  %v196_v39 = vld [vmem:[#allocation7 + $0x60] sm:$0xff] }
  0x2c   :  { %259 = vmatpush.msra.mxu2 %v204_v23  ;;  %278 = vmatpush.msra.mxu3 %v238_v24  ;;  %v230_v40 = vld [vmem:[#allocation7 + $0x170] sm:$0xff]  ;;  %v231_v41 = vld [vmem:[#allocation7 + $0x178] sm:$0xff]  ;;  %v197_v42 = vld [vmem:[#allocation7 + $0x68] sm:$0xff] }
  0x2d   :  { %318 = vmatpush.msrb.mxu1 %v239_v25  ;;  %299 = vmatpush.msrb.mxu0 %v205_v26  ;;  %v194_v43 = vld [vmem:[#allocation7 + $0x50] sm:$0xff]  ;;  %v228_v44 = vld [vmem:[#allocation7 + $0x160] sm:$0xff]  ;;  %v229_v45 = vld [vmem:[#allocation7 + $0x168] sm:$0xff] }
  0x2e   :  { %260 = vmatpush.msra.mxu2 %v202_v27  ;;  %279 = vmatpush.msra.mxu3 %v236_v28  ;;  %v195_v46 = vld [vmem:[#allocation7 + $0x58] sm:$0xff]  ;;  %v192_v47 = vld [vmem:[#allocation7 + $0x40] sm:$0xff]  ;;  %v226_v48 = vld [vmem:[#allocation7 + $0x150] sm:$0xff] }
  0x2f   :  { %319 = vmatpush.msrb.mxu1 %v237_v29  ;;  %300 = vmatpush.msrb.mxu0 %v203_v30  ;;  %v227_v49 = vld [vmem:[#allocation7 + $0x158] sm:$0xff]  ;;  %v193_v50 = vld [vmem:[#allocation7 + $0x48] sm:$0xff]  ;;  %v190_v51 = vld [vmem:[#allocation7 + $0x30] sm:$0xff] }
  0x30   :  { %261 = vmatpush.msra.mxu2 %v200_v31  ;;  %280 = vmatpush.msra.mxu3 %v234_v32  ;;  %v224_v52 = vld [vmem:[#allocation7 + $0x140] sm:$0xff]  ;;  %v225_v53 = vld [vmem:[#allocation7 + $0x148] sm:$0xff]  ;;  %v191_v54 = vld [vmem:[#allocation7 + $0x38] sm:$0xff] }
  0x31   :  { %320 = vmatpush.msrb.mxu1 %v235_v33  ;;  %301 = vmatpush.msrb.mxu0 %v201_v34  ;;  %v188_v55 = vld [vmem:[#allocation7 + $0x20] sm:$0xff]  ;;  %v222_v56 = vld [vmem:[#allocation7 + $0x130] sm:$0xff]  ;;  %v189_v57 = vld [vmem:[#allocation7 + $0x28] sm:$0xff] }
  0x32   :  { %262 = vmatpush.msra.mxu2 %v198_v35  ;;  %281 = vmatpush.msra.mxu3 %v232_v36  ;;  %v223_v58 = vld [vmem:[#allocation7 + $0x138] sm:$0xff]  ;;  %v186_v59 = vld [vmem:[#allocation7 + $0x10] sm:$0xff]  ;;  %v220_v60 = vld [vmem:[#allocation7 + $0x120] sm:$0xff] }
  0x33   :  { %321 = vmatpush.msrb.mxu1 %v233_v37  ;;  %302 = vmatpush.msrb.mxu0 %v199_v38  ;;  %v187_v61 = vld [vmem:[#allocation7 + $0x18] sm:$0xff]  ;;  %v221_v62 = vld [vmem:[#allocation7 + $0x128] sm:$0xff]  ;;  %v184_v63 = vld [vmem:[#allocation7] sm:$0xff] }
  0x34   :  { %263 = vmatpush.msra.mxu2 %v196_v39  ;;  %282 = vmatpush.msra.mxu3 %v230_v40  ;;  %v218_v0 = vld [vmem:[#allocation7 + $0x110] sm:$0xff]  ;;  %v185_v1 = vld [vmem:[#allocation7 + $0x8] sm:$0xff]  ;;  %v219_v2 = vld [vmem:[#allocation7 + $0x118] sm:$0xff] }
  0x35   :  { %322 = vmatpush.msrb.mxu1 %v231_v41  ;;  %303 = vmatpush.msrb.mxu0 %v197_v42  ;;  %v216_v3 = vld [vmem:[#allocation7 + $0x100] sm:$0xff]  ;;  %v217_v4 = vld [vmem:[#allocation7 + $0x108] sm:$0xff] }
  0x36   :  { %264 = vmatpush.msra.mxu2 %v194_v43  ;;  %283 = vmatpush.msra.mxu3 %v228_v44  ;;  %v584_v5 = vld [vmem:[#allocation10 + $0x7c0] sm:$0xff]  ;;  %v585_v6 = vld [vmem:[#allocation10 + $0x7c8] sm:$0xff] }
  0x37   :  { %323 = vmatpush.msrb.mxu1 %v229_v45  ;;  %304 = vmatpush.msrb.mxu0 %v195_v46  ;;  %v576_v7 = vld [vmem:[#allocation10 + $0x780] sm:$0xff]  ;;  %v577_v8 = vld [vmem:[#allocation10 + $0x788] sm:$0xff] }
  0x38   :  { %265 = vmatpush.msra.mxu2 %v192_v47  ;;  %284 = vmatpush.msra.mxu3 %v226_v48  ;;  %v568_v9 = vld [vmem:[#allocation10 + $0x740] sm:$0xff]  ;;  %v457_v11 = vld [vmem:[#allocation10 + $0x3c8] sm:$0xff]  ;;  %v132_v47 = vld [vmem:[#allocation6] sm:$0x3] }
  0x39   :  { %324 = vmatpush.msrb.mxu1 %v227_v49  ;;  %305 = vmatpush.msrb.mxu0 %v193_v50  ;;  %v456_v10 = vld [vmem:[#allocation10 + $0x3c0] sm:$0xff]  ;;  %v569_v12 = vld [vmem:[#allocation10 + $0x748] sm:$0xff] }
  0x3a   :  { %266 = vmatpush.msra.mxu2 %v190_v51  ;;  %285 = vmatpush.msra.mxu3 %v224_v52  ;;  %v448_v13 = vld [vmem:[#allocation10 + $0x380] sm:$0xff]  ;;  %v449_v15 = vld [vmem:[#allocation10 + $0x388] sm:$0xff] }
  0x3b   :  { %325 = vmatpush.msrb.mxu1 %v225_v53  ;;  %306 = vmatpush.msrb.mxu0 %v191_v54  ;;  %v560_v14 = vld [vmem:[#allocation10 + $0x700] sm:$0xff]  ;;  %v561_v17 = vld [vmem:[#allocation10 + $0x708] sm:$0xff]  ;;  %v134_v54 = vperm.slane %v132_v47, 0 }
  0x3c   :  { %267 = vmatpush.msra.mxu2 %v188_v55  ;;  %286 = vmatpush.msra.mxu3 %v222_v56  ;;  %v440_v16 = vld [vmem:[#allocation10 + $0x340] sm:$0xff]  ;;  %v441_v18 = vld [vmem:[#allocation10 + $0x348] sm:$0xff]  ;;  %v135_v55 = vperm.slane %v132_v47, 1  ;;  %v515_v47 = vld [vmem:[#allocation10 + $0x598] sm:$0xff] }
  0x3d   :  { %307 = vmatpush.msrb.mxu0 %v189_v57  ;;  %326 = vmatpush.msrb.mxu1 %v223_v58  ;;  %v552_v19 = vld [vmem:[#allocation10 + $0x6c0] sm:$0xff]  ;;  %v553_v21 = vld [vmem:[#allocation10 + $0x6c8] sm:$0xff] }
  0x3e   :  { %268 = vmatpush.msra.mxu2 %v186_v59  ;;  %287 = vmatpush.msra.mxu3 %v220_v60  ;;  %v432_v20 = vld [vmem:[#allocation10 + $0x300] sm:$0xff]  ;;  %v433_v22 = vld [vmem:[#allocation10 + $0x308] sm:$0xff] }
  0x3f   :  { %308 = vmatpush.msrb.mxu0 %v187_v61  ;;  %327 = vmatpush.msrb.mxu1 %v221_v62  ;;  %v544_v23 = vld [vmem:[#allocation10 + $0x680] sm:$0xff]  ;;  %v545_v25 = vld [vmem:[#allocation10 + $0x688] sm:$0xff] }
  0x40   :  { %269 = vmatpush.msra.mxu2 %v184_v63  ;;  %288 = vmatpush.msra.mxu3 %v218_v0  ;;  %v424_v24 = vld [vmem:[#allocation10 + $0x2c0] sm:$0xff]  ;;  %v425_v26 = vld [vmem:[#allocation10 + $0x2c8] sm:$0xff] }
  0x41   :  { %309 = vmatpush.msrb.mxu0 %v185_v1  ;;  %328 = vmatpush.msrb.mxu1 %v219_v2  ;;  %v536_v27 = vld [vmem:[#allocation10 + $0x640] sm:$0xff]  ;;  %v537_v29 = vld [vmem:[#allocation10 + $0x648] sm:$0xff] }
  0x42   :  { %289 = vmatpush.msra.mxu3 %v216_v3  ;;  %610 = vmatpush.msrb.mxu2 %v456_v10  ;;  %v416_v28 = vld [vmem:[#allocation10 + $0x280] sm:$0xff]  ;;  %v417_v30 = vld [vmem:[#allocation10 + $0x288] sm:$0xff]  ;;  %v586_v10 = vld [vmem:[#allocation10 + $0x7d0] sm:$0xff] }
  0x43   :  { %329 = vmatpush.msrb.mxu1 %v217_v4  ;;  %650 = vmatpush.msra.mxu0 %v457_v11  ;;  %v528_v31 = vld [vmem:[#allocation10 + $0x600] sm:$0xff]  ;;  %v529_v33 = vld [vmem:[#allocation10 + $0x608] sm:$0xff]  ;;  %v587_v11 = vld [vmem:[#allocation10 + $0x7d8] sm:$0xff] }
  0x44   :  { %630 = vmatpush.msrb.mxu3 %v584_v5  ;;  %611 = vmatpush.msrb.mxu2 %v448_v13  ;;  %v408_v32 = vld [vmem:[#allocation10 + $0x240] sm:$0xff]  ;;  %v409_v34 = vld [vmem:[#allocation10 + $0x248] sm:$0xff] }
  0x45   :  { %670 = vmatpush.msra.mxu1 %v585_v6  ;;  %651 = vmatpush.msra.mxu0 %v449_v15  ;;  %v520_v35 = vld [vmem:[#allocation10 + $0x5c0] sm:$0xff]  ;;  %v521_v37 = vld [vmem:[#allocation10 + $0x5c8] sm:$0xff]  ;;  %v579_v15 = vld [vmem:[#allocation10 + $0x798] sm:$0xff] }
  0x46   :  { %631 = vmatpush.msrb.mxu3 %v576_v7  ;;  %612 = vmatpush.msrb.mxu2 %v440_v16  ;;  %v400_v36 = vld [vmem:[#allocation10 + $0x200] sm:$0xff]  ;;  %v401_v38 = vld [vmem:[#allocation10 + $0x208] sm:$0xff] }
  0x47   :  { %671 = vmatpush.msra.mxu1 %v577_v8  ;;  %652 = vmatpush.msra.mxu0 %v441_v18  ;;  %v512_v39 = vld [vmem:[#allocation10 + $0x580] sm:$0xff]  ;;  %v513_v41 = vld [vmem:[#allocation10 + $0x588] sm:$0xff]  ;;  %v570_v18 = vld [vmem:[#allocation10 + $0x750] sm:$0xff] }
  0x48   :  { %632 = vmatpush.msrb.mxu3 %v568_v9  ;;  %613 = vmatpush.msrb.mxu2 %v432_v20  ;;  %v392_v40 = vld [vmem:[#allocation10 + $0x1c0] sm:$0xff]  ;;  %v393_v42 = vld [vmem:[#allocation10 + $0x1c8] sm:$0xff]  ;;  %v458_v20 = vld [vmem:[#allocation10 + $0x3d0] sm:$0xff] }
  0x49   :  { %672 = vmatpush.msra.mxu1 %v569_v12  ;;  %653 = vmatpush.msra.mxu0 %v433_v22  ;;  %v504_v43 = vld [vmem:[#allocation10 + $0x540] sm:$0xff]  ;;  %v505_v45 = vld [vmem:[#allocation10 + $0x548] sm:$0xff]  ;;  %v562_v22 = vld [vmem:[#allocation10 + $0x710] sm:$0xff] }
  0x4a   :  { %633 = vmatpush.msrb.mxu3 %v560_v14  ;;  %614 = vmatpush.msrb.mxu2 %v424_v24  ;;  %v384_v44 = vld [vmem:[#allocation10 + $0x180] sm:$0xff]  ;;  %v385_v46 = vld [vmem:[#allocation10 + $0x188] sm:$0xff]  ;;  %v578_v14 = vld [vmem:[#allocation10 + $0x790] sm:$0xff] }
  0x4b   :  { %673 = vmatpush.msra.mxu1 %v561_v17  ;;  %654 = vmatpush.msra.mxu0 %v425_v26  ;;  %v496_v48 = vld [vmem:[#allocation10 + $0x500] sm:$0xff]  ;;  %v497_v50 = vld [vmem:[#allocation10 + $0x508] sm:$0xff]  ;;  %v450_v24 = vld [vmem:[#allocation10 + $0x390] sm:$0xff] }
  0x4c   :  { %634 = vmatpush.msrb.mxu3 %v552_v19  ;;  %615 = vmatpush.msrb.mxu2 %v416_v28  ;;  %v376_v49 = vld [vmem:[#allocation10 + $0x140] sm:$0xff]  ;;  %v377_v51 = vld [vmem:[#allocation10 + $0x148] sm:$0xff]  ;;  %v571_v19 = vld [vmem:[#allocation10 + $0x758] sm:$0xff] }
  0x4d   :  { %674 = vmatpush.msra.mxu1 %v553_v21  ;;  %655 = vmatpush.msra.mxu0 %v417_v30  ;;  %v488_v52 = vld [vmem:[#allocation10 + $0x4c0] sm:$0xff]  ;;  %v489_v56 = vld [vmem:[#allocation10 + $0x4c8] sm:$0xff]  ;;  %v459_v21 = vld [vmem:[#allocation10 + $0x3d8] sm:$0xff] }
  0x4e   :  { %635 = vmatpush.msrb.mxu3 %v544_v23  ;;  %616 = vmatpush.msrb.mxu2 %v408_v32  ;;  %v368_v53 = vld [vmem:[#allocation10 + $0x100] sm:$0xff]  ;;  %v369_v57 = vld [vmem:[#allocation10 + $0x108] sm:$0xff]  ;;  %v563_v23 = vld [vmem:[#allocation10 + $0x718] sm:$0xff] }
  0x4f   :  { %675 = vmatpush.msra.mxu1 %v545_v25  ;;  %656 = vmatpush.msra.mxu0 %v409_v34  ;;  %v480_v58 = vld [vmem:[#allocation10 + $0x480] sm:$0xff]  ;;  %v481_v60 = vld [vmem:[#allocation10 + $0x488] sm:$0xff]  ;;  %v451_v25 = vld [vmem:[#allocation10 + $0x398] sm:$0xff] }
  0x50   :  { %636 = vmatpush.msrb.mxu3 %v536_v27  ;;  %617 = vmatpush.msrb.mxu2 %v400_v36  ;;  %v360_v59 = vld [vmem:[#allocation10 + $0xc0] sm:$0xff]  ;;  %v361_v61 = vld [vmem:[#allocation10 + $0xc8] sm:$0xff]  ;;  %v554_v26 = vld [vmem:[#allocation10 + $0x6d0] sm:$0xff] }
  0x51   :  { %676 = vmatpush.msra.mxu1 %v537_v29  ;;  %657 = vmatpush.msra.mxu0 %v401_v38  ;;  %v472_v0 = vld [vmem:[#allocation10 + $0x440] sm:$0xff]  ;;  %v473_v4 = vld [vmem:[#allocation10 + $0x448] sm:$0xff]  ;;  %v555_v27 = vld [vmem:[#allocation10 + $0x6d8] sm:$0xff] }
  0x52   :  { %637 = vmatpush.msrb.mxu3 %v528_v31  ;;  %618 = vmatpush.msrb.mxu2 %v392_v40  ;;  %v352_v1 = vld [vmem:[#allocation10 + $0x80] sm:$0xff]  ;;  %v353_v5 = vld [vmem:[#allocation10 + $0x88] sm:$0xff]  ;;  %v442_v28 = vld [vmem:[#allocation10 + $0x350] sm:$0xff] }
  0x53   :  { %677 = vmatpush.msra.mxu1 %v529_v33  ;;  %658 = vmatpush.msra.mxu0 %v393_v42  ;;  %v464_v8 = vld [vmem:[#allocation10 + $0x400] sm:$0xff]  ;;  %v465_v9 = vld [vmem:[#allocation10 + $0x408] sm:$0xff]  ;;  %v443_v29 = vld [vmem:[#allocation10 + $0x358] sm:$0xff] }
  0x54   :  { %638 = vmatpush.msrb.mxu3 %v520_v35  ;;  %619 = vmatpush.msrb.mxu2 %v384_v44  ;;  %v344_v12 = vld [vmem:[#allocation10 + $0x40] sm:$0xff]  ;;  %v345_v13 = vld [vmem:[#allocation10 + $0x48] sm:$0xff]  ;;  %v546_v30 = vld [vmem:[#allocation10 + $0x690] sm:$0xff] }
  0x55   :  { %678 = vmatpush.msra.mxu1 %v521_v37  ;;  %659 = vmatpush.msra.mxu0 %v385_v46  ;;  %v336_v16 = vld [vmem:[#allocation10] sm:$0xff]  ;;  %v337_v17 = vld [vmem:[#allocation10 + $0x8] sm:$0xff]  ;;  %v547_v31 = vld [vmem:[#allocation10 + $0x698] sm:$0xff] }
  0x56   :  { %639 = vmatpush.msrb.mxu3 %v512_v39  ;;  %620 = vmatpush.msrb.mxu2 %v376_v49  ;;  %v434_v32 = vld [vmem:[#allocation10 + $0x310] sm:$0xff]  ;;  %v435_v33 = vld [vmem:[#allocation10 + $0x318] sm:$0xff] }
  0x57   :  { %679 = vmatpush.msra.mxu1 %v513_v41  ;;  %660 = vmatpush.msra.mxu0 %v377_v51  ;;  %v538_v34 = vld [vmem:[#allocation10 + $0x650] sm:$0xff]  ;;  %v539_v35 = vld [vmem:[#allocation10 + $0x658] sm:$0xff] }
  0x58   :  { %640 = vmatpush.msrb.mxu3 %v504_v43  ;;  %621 = vmatpush.msrb.mxu2 %v368_v53  ;;  %v426_v36 = vld [vmem:[#allocation10 + $0x2d0] sm:$0xff]  ;;  %v427_v37 = vld [vmem:[#allocation10 + $0x2d8] sm:$0xff] }
  0x59   :  { %680 = vmatpush.msra.mxu1 %v505_v45  ;;  %661 = vmatpush.msra.mxu0 %v369_v57  ;;  %v530_v38 = vld [vmem:[#allocation10 + $0x610] sm:$0xff]  ;;  %v531_v39 = vld [vmem:[#allocation10 + $0x618] sm:$0xff] }
  0x5a   :  { %641 = vmatpush.msrb.mxu3 %v496_v48  ;;  %622 = vmatpush.msrb.mxu2 %v360_v59  ;;  %v418_v40 = vld [vmem:[#allocation10 + $0x290] sm:$0xff]  ;;  %v419_v41 = vld [vmem:[#allocation10 + $0x298] sm:$0xff] }
  0x5b   :  { %681 = vmatpush.msra.mxu1 %v497_v50  ;;  %662 = vmatpush.msra.mxu0 %v361_v61  ;;  %v522_v42 = vld [vmem:[#allocation10 + $0x5d0] sm:$0xff]  ;;  %v523_v43 = vld [vmem:[#allocation10 + $0x5d8] sm:$0xff] }
  0x5c   :  { %642 = vmatpush.msrb.mxu3 %v488_v52  ;;  %623 = vmatpush.msrb.mxu2 %v352_v1  ;;  %v410_v44 = vld [vmem:[#allocation10 + $0x250] sm:$0xff]  ;;  %v411_v45 = vld [vmem:[#allocation10 + $0x258] sm:$0xff] }
  0x5d   :  { %682 = vmatpush.msra.mxu1 %v489_v56  ;;  %663 = vmatpush.msra.mxu0 %v353_v5  ;;  %v514_v46 = vld [vmem:[#allocation10 + $0x590] sm:$0xff]  ;;  %v403_v49 = vld [vmem:[#allocation10 + $0x218] sm:$0xff] }
  0x5e   :  { %643 = vmatpush.msrb.mxu3 %v480_v58  ;;  %624 = vmatpush.msrb.mxu2 %v344_v12  ;;  %v402_v48 = vld [vmem:[#allocation10 + $0x210] sm:$0xff]  ;;  %v507_v51 = vld [vmem:[#allocation10 + $0x558] sm:$0xff] }
  0x5f   :  { %683 = vmatpush.msra.mxu1 %v481_v60  ;;  %664 = vmatpush.msra.mxu0 %v345_v13  ;;  %v506_v50 = vld [vmem:[#allocation10 + $0x550] sm:$0xff]  ;;  %v395_v53 = vld [vmem:[#allocation10 + $0x1d8] sm:$0xff] }
  0x60   :  { %644 = vmatpush.msrb.mxu3 %v472_v0  ;;  %625 = vmatpush.msrb.mxu2 %v336_v16  ;;  %v394_v52 = vld [vmem:[#allocation10 + $0x1d0] sm:$0xff]  ;;  %v387_v58 = vld [vmem:[#allocation10 + $0x198] sm:$0xff] }
  0x61   :  { %684 = vmatpush.msra.mxu1 %v473_v4  ;;  %665 = vmatpush.msra.mxu0 %v337_v17  ;;  %v386_v56 = vld [vmem:[#allocation10 + $0x190] sm:$0xff]  ;;  %v491_v59 = vld [vmem:[#allocation10 + $0x4d8] sm:$0xff] }
  0x62   :  { %645 = vmatpush.msrb.mxu3 %v464_v8  ;;  %v490_v57 = vld [vmem:[#allocation10 + $0x4d0] sm:$0xff]  ;;  %v339_v13 = vld [vmem:[#allocation10 + $0x18] sm:$0xff] }
  0x63   :  { %685 = vmatpush.msra.mxu1 %v465_v9  ;;  %v378_v60 = vld [vmem:[#allocation10 + $0x150] sm:$0xff]  ;;  %v355_v9 = vld [vmem:[#allocation10 + $0x98] sm:$0xff] }
  0x64   :  { %v482_v61 = vld [vmem:[#allocation10 + $0x490] sm:$0xff] }
  0x65   :  { %v370_v0 = vld [vmem:[#allocation10 + $0x110] sm:$0xff] }
  0x66   :  { %v474_v1 = vld [vmem:[#allocation10 + $0x450] sm:$0xff] }
  0x67   :  { %v362_v4 = vld [vmem:[#allocation10 + $0xd0] sm:$0xff] }
  0x68   :  { %v466_v5 = vld [vmem:[#allocation10 + $0x410] sm:$0xff] }
  0x69   :  { %v354_v8 = vld [vmem:[#allocation10 + $0x90] sm:$0xff] }
  0x6a   :  { %v338_v12 = vld [vmem:[#allocation10 + $0x10] sm:$0xff] }
  0x9f   :  { %v159_v62 = vpop.f32.mrf.mxu0 }
  0xa0   :  { %v179_v63 = vpop.f32.mrf.mxu1  ;;  %v160_v2 = vadd.f32 %v159_v62, %v134_v54  ;;  %v498_v54 = vld [vmem:[#allocation10 + $0x510] sm:$0xff]  ;;  %v379_v62 = vld [vmem:[#allocation10 + $0x158] sm:$0xff] }
  0xa1   :  { %v180_v3 = vadd.f32 %v179_v63, %v135_v55  ;;  %v499_v55 = vld [vmem:[#allocation10 + $0x518] sm:$0xff] }
  0xa2   :  { %v182_v6 = vmax.f32 %v160_v2, 0.0  ;;  %v483_v63 = vld [vmem:[#allocation10 + $0x498] sm:$0xff] }
  0xa3   :  { %v183_v7 = vmax.f32 %v180_v3, 0.0  ;;  %v371_v2 = vld [vmem:[#allocation10 + $0x118] sm:$0xff] }
  0xa4   :  { %270 = vmatmul.f32.vlgmr.msra.gmra.mxu2 %v182_v6  ;;  %310 = vmatmul.f32.vlgmr.msrb.gmra.mxu0 %v182_v6  ;;  %v475_v3 = vld [vmem:[#allocation10 + $0x458] sm:$0xff] }
  0xa5   :  { %290 = vmatmul.f32.vlgmr.msra.gmra.mxu3 %v183_v7  ;;  %330 = vmatmul.f32.vlgmr.msrb.gmra.mxu1 %v183_v7  ;;  %v363_v6 = vld [vmem:[#allocation10 + $0xd8] sm:$0xff] }
  0xa6   :  { %710 = vmatpush.msra.mxu3 %v586_v10  ;;  %750 = vmatpush.msrb.mxu1 %v587_v11  ;;  %v467_v7 = vld [vmem:[#allocation10 + $0x418] sm:$0xff]  ;;  %v346_v10 = vld [vmem:[#allocation10 + $0x50] sm:$0xff] }
  0xa7   :  { %690 = vmatpush.msra.mxu2 %v458_v20  ;;  %730 = vmatpush.msrb.mxu0 %v459_v21  ;;  %v347_v11 = vld [vmem:[#allocation10 + $0x58] sm:$0xff] }
  0xa8   :  { %711 = vmatpush.msra.mxu3 %v578_v14  ;;  %751 = vmatpush.msrb.mxu1 %v579_v15  ;;  %v248_v14 = vld [vmem:[#allocation9] sm:$0x3] }
  0xa9   :  { %691 = vmatpush.msra.mxu2 %v450_v24  ;;  %731 = vmatpush.msrb.mxu0 %v451_v25  ;;  %v251_v15 = vperm.slane %v248_v14, 1  ;;  %v250_v20 = vperm.slane %v248_v14, 0  ;;  %v476_v14 = vld [vmem:[#allocation10 + $0x460] sm:$0xff] }
  0xaa   :  { %712 = vmatpush.msra.mxu3 %v570_v18  ;;  %752 = vmatpush.msrb.mxu1 %v571_v19 }
  0xab   :  { %692 = vmatpush.msra.mxu2 %v442_v28  ;;  %732 = vmatpush.msrb.mxu0 %v443_v29  ;;  %v581_v28 = vld [vmem:[#allocation10 + $0x7a8] sm:$0xff] }
  0xac   :  { %713 = vmatpush.msra.mxu3 %v562_v22  ;;  %753 = vmatpush.msrb.mxu1 %v563_v23  ;;  %v588_v22 = vld [vmem:[#allocation10 + $0x7e0] sm:$0xff]  ;;  %v589_v23 = vld [vmem:[#allocation10 + $0x7e8] sm:$0xff] }
  0xad   :  { %693 = vmatpush.msra.mxu2 %v434_v32  ;;  %733 = vmatpush.msrb.mxu0 %v435_v33  ;;  %v460_v33 = vld [vmem:[#allocation10 + $0x3e0] sm:$0xff] }
  0xae   :  { %714 = vmatpush.msra.mxu3 %v554_v26  ;;  %754 = vmatpush.msrb.mxu1 %v555_v27  ;;  %v580_v27 = vld [vmem:[#allocation10 + $0x7a0] sm:$0xff] }
  0xaf   :  { %694 = vmatpush.msra.mxu2 %v426_v36  ;;  %734 = vmatpush.msrb.mxu0 %v427_v37  ;;  %v565_v36 = vld [vmem:[#allocation10 + $0x728] sm:$0xff]  ;;  %v452_v37 = vld [vmem:[#allocation10 + $0x3a0] sm:$0xff] }
  0xb0   :  { %715 = vmatpush.msra.mxu3 %v546_v30  ;;  %755 = vmatpush.msrb.mxu1 %v547_v31  ;;  %v572_v30 = vld [vmem:[#allocation10 + $0x760] sm:$0xff]  ;;  %v573_v31 = vld [vmem:[#allocation10 + $0x768] sm:$0xff] }
  0xb1   :  { %695 = vmatpush.msra.mxu2 %v418_v40  ;;  %735 = vmatpush.msrb.mxu0 %v419_v41  ;;  %v557_v40 = vld [vmem:[#allocation10 + $0x6e8] sm:$0xff]  ;;  %v444_v41 = vld [vmem:[#allocation10 + $0x360] sm:$0xff] }
  0xb2   :  { %716 = vmatpush.msra.mxu3 %v538_v34  ;;  %756 = vmatpush.msrb.mxu1 %v539_v35  ;;  %v564_v34 = vld [vmem:[#allocation10 + $0x720] sm:$0xff]  ;;  %v461_v35 = vld [vmem:[#allocation10 + $0x3e8] sm:$0xff] }
  0xb3   :  { %696 = vmatpush.msra.mxu2 %v410_v44  ;;  %736 = vmatpush.msrb.mxu0 %v411_v45  ;;  %v549_v44 = vld [vmem:[#allocation10 + $0x6a8] sm:$0xff]  ;;  %v436_v45 = vld [vmem:[#allocation10 + $0x320] sm:$0xff] }
  0xb4   :  { %717 = vmatpush.msra.mxu3 %v530_v38  ;;  %757 = vmatpush.msrb.mxu1 %v531_v39  ;;  %v556_v38 = vld [vmem:[#allocation10 + $0x6e0] sm:$0xff]  ;;  %v453_v39 = vld [vmem:[#allocation10 + $0x3a8] sm:$0xff] }
  0xb5   :  { %697 = vmatpush.msra.mxu2 %v402_v48  ;;  %737 = vmatpush.msrb.mxu0 %v403_v49  ;;  %v541_v48 = vld [vmem:[#allocation10 + $0x668] sm:$0xff]  ;;  %v428_v49 = vld [vmem:[#allocation10 + $0x2e0] sm:$0xff] }
  0xb6   :  { %718 = vmatpush.msra.mxu3 %v522_v42  ;;  %758 = vmatpush.msrb.mxu1 %v523_v43  ;;  %v548_v42 = vld [vmem:[#allocation10 + $0x6a0] sm:$0xff]  ;;  %v445_v43 = vld [vmem:[#allocation10 + $0x368] sm:$0xff] }
  0xb7   :  { %698 = vmatpush.msra.mxu2 %v394_v52  ;;  %738 = vmatpush.msrb.mxu0 %v395_v53  ;;  %v533_v52 = vld [vmem:[#allocation10 + $0x628] sm:$0xff]  ;;  %v420_v53 = vld [vmem:[#allocation10 + $0x2a0] sm:$0xff] }
  0xb8   :  { %719 = vmatpush.msra.mxu3 %v514_v46  ;;  %759 = vmatpush.msrb.mxu1 %v515_v47  ;;  %v540_v46 = vld [vmem:[#allocation10 + $0x660] sm:$0xff]  ;;  %v437_v47 = vld [vmem:[#allocation10 + $0x328] sm:$0xff] }
  0xb9   :  { %699 = vmatpush.msra.mxu2 %v386_v56  ;;  %739 = vmatpush.msrb.mxu0 %v387_v58  ;;  %v525_v56 = vld [vmem:[#allocation10 + $0x5e8] sm:$0xff]  ;;  %v516_v58 = vld [vmem:[#allocation10 + $0x5a0] sm:$0xff] }
  0xba   :  { %720 = vmatpush.msra.mxu3 %v506_v50  ;;  %760 = vmatpush.msrb.mxu1 %v507_v51  ;;  %v532_v50 = vld [vmem:[#allocation10 + $0x620] sm:$0xff]  ;;  %v429_v51 = vld [vmem:[#allocation10 + $0x2e8] sm:$0xff] }
  0xbb   :  { %700 = vmatpush.msra.mxu2 %v378_v60  ;;  %740 = vmatpush.msrb.mxu0 %v379_v62  ;;  %v517_v60 = vld [vmem:[#allocation10 + $0x5a8] sm:$0xff]  ;;  %v508_v62 = vld [vmem:[#allocation10 + $0x560] sm:$0xff] }
  0xbc   :  { %721 = vmatpush.msra.mxu3 %v498_v54  ;;  %761 = vmatpush.msrb.mxu1 %v499_v55  ;;  %v524_v54 = vld [vmem:[#allocation10 + $0x5e0] sm:$0xff]  ;;  %v421_v55 = vld [vmem:[#allocation10 + $0x2a8] sm:$0xff] }
  0xbd   :  { %701 = vmatpush.msra.mxu2 %v370_v0  ;;  %741 = vmatpush.msrb.mxu0 %v371_v2  ;;  %v509_v0 = vld [vmem:[#allocation10 + $0x568] sm:$0xff]  ;;  %v500_v2 = vld [vmem:[#allocation10 + $0x520] sm:$0xff] }
  0xbe   :  { %722 = vmatpush.msra.mxu3 %v490_v57  ;;  %762 = vmatpush.msrb.mxu1 %v491_v59  ;;  %v412_v57 = vld [vmem:[#allocation10 + $0x260] sm:$0xff]  ;;  %v413_v59 = vld [vmem:[#allocation10 + $0x268] sm:$0xff] }
  0xbf   :  { %702 = vmatpush.msra.mxu2 %v362_v4  ;;  %742 = vmatpush.msrb.mxu0 %v363_v6  ;;  %v501_v4 = vld [vmem:[#allocation10 + $0x528] sm:$0xff]  ;;  %v492_v6 = vld [vmem:[#allocation10 + $0x4e0] sm:$0xff] }
  0xc0   :  { %723 = vmatpush.msra.mxu3 %v482_v61  ;;  %763 = vmatpush.msrb.mxu1 %v483_v63  ;;  %v404_v61 = vld [vmem:[#allocation10 + $0x220] sm:$0xff]  ;;  %v405_v63 = vld [vmem:[#allocation10 + $0x228] sm:$0xff] }
  0xc1   :  { %703 = vmatpush.msra.mxu2 %v354_v8  ;;  %743 = vmatpush.msrb.mxu0 %v355_v9  ;;  %v493_v8 = vld [vmem:[#allocation10 + $0x4e8] sm:$0xff]  ;;  %v380_v9 = vld [vmem:[#allocation10 + $0x160] sm:$0xff] }
  0xc2   :  { %724 = vmatpush.msra.mxu3 %v474_v1  ;;  %764 = vmatpush.msrb.mxu1 %v475_v3  ;;  %v396_v1 = vld [vmem:[#allocation10 + $0x1e0] sm:$0xff]  ;;  %v397_v3 = vld [vmem:[#allocation10 + $0x1e8] sm:$0xff] }
  0xc3   :  { %704 = vmatpush.msra.mxu2 %v346_v10  ;;  %744 = vmatpush.msrb.mxu0 %v347_v11  ;;  %v484_v10 = vld [vmem:[#allocation10 + $0x4a0] sm:$0xff]  ;;  %v381_v11 = vld [vmem:[#allocation10 + $0x168] sm:$0xff] }
  0xc4   :  { %725 = vmatpush.msra.mxu3 %v466_v5  ;;  %765 = vmatpush.msrb.mxu1 %v467_v7  ;;  %v388_v5 = vld [vmem:[#allocation10 + $0x1a0] sm:$0xff]  ;;  %v389_v7 = vld [vmem:[#allocation10 + $0x1a8] sm:$0xff] }
  0xc5   :  { %705 = vmatpush.msra.mxu2 %v338_v12  ;;  %745 = vmatpush.msrb.mxu0 %v339_v13  ;;  %v485_v12 = vld [vmem:[#allocation10 + $0x4a8] sm:$0xff]  ;;  %v372_v13 = vld [vmem:[#allocation10 + $0x120] sm:$0xff] }
 0x121   :  { %v311_v16 = vpop.f32.mrf.mxu0 }
 0x122   :  { %v312_v17 = vadd.f32 %v311_v16, %v251_v15  ;;  %v331_v18 = vpop.f32.mrf.mxu1  ;;  %v373_v15 = vld [vmem:[#allocation10 + $0x128] sm:$0xff] }
 0x123   :  { %v477_v16 = vld [vmem:[#allocation10 + $0x468] sm:$0xff] }
 0x124   :  { %v332_v19 = vadd.f32 %v331_v18, %v312_v17  ;;  %v364_v17 = vld [vmem:[#allocation10 + $0xe0] sm:$0xff] }
 0x125   :  { %v468_v18 = vld [vmem:[#allocation10 + $0x420] sm:$0xff] }
 0x126   :  { %v1246_v21 = vmax.f32 %v332_v19, 0.0  ;;  %v365_v19 = vld [vmem:[#allocation10 + $0xe8] sm:$0xff] }
 0x127   :  { %v271_v24 = vpop.f32.mrf.mxu2 }
 0x128   :  { %v272_v25 = vadd.f32 %v271_v24, %v250_v20  ;;  %646 = vmatmul.f32.vlgmr.msrb.gmra.mxu3 %v1246_v21  ;;  %686 = vmatmul.f32.vlgmr.msra.gmra.mxu1 %v1246_v21  ;;  %v291_v26 = vpop.f32.mrf.mxu3  ;;  %v469_v20 = vld [vmem:[#allocation10 + $0x428] sm:$0xff]  ;;  %v356_v24 = vld [vmem:[#allocation10 + $0xa0] sm:$0xff] }
 0x129   :  { %790 = vmatpush.msrb.mxu3 %v588_v22  ;;  %830 = vmatpush.msra.mxu1 %v589_v23  ;;  %v590_v22 = vld [vmem:[#allocation10 + $0x7f0] sm:$0xff]  ;;  %v591_v23 = vld [vmem:[#allocation10 + $0x7f8] sm:$0xff] }
 0x12a   :  { %v292_v29 = vadd.f32 %v291_v26, %v272_v25  ;;  %v357_v25 = vld [vmem:[#allocation10 + $0xa8] sm:$0xff]  ;;  %v582_v26 = vld [vmem:[#allocation10 + $0x7b0] sm:$0xff] }
 0x12b   :  { %791 = vmatpush.msrb.mxu3 %v580_v27  ;;  %831 = vmatpush.msra.mxu1 %v581_v28  ;;  %v583_v27 = vld [vmem:[#allocation10 + $0x7b8] sm:$0xff]  ;;  %v348_v28 = vld [vmem:[#allocation10 + $0x60] sm:$0xff] }
 0x12c   :  { %v1250_v32 = vmax.f32 %v292_v29, 0.0  ;;  %v349_v29 = vld [vmem:[#allocation10 + $0x68] sm:$0xff] }
 0x12d   :  { %792 = vmatpush.msrb.mxu3 %v572_v30  ;;  %832 = vmatpush.msra.mxu1 %v573_v31  ;;  %v574_v30 = vld [vmem:[#allocation10 + $0x770] sm:$0xff]  ;;  %v575_v31 = vld [vmem:[#allocation10 + $0x778] sm:$0xff] }
 0x12e   :  { %626 = vmatmul.f32.vlgmr.msrb.gmra.mxu2 %v1250_v32  ;;  %666 = vmatmul.f32.vlgmr.msra.gmra.mxu0 %v1250_v32 }
 0x12f   :  { %770 = vmatpush.msrb.mxu2 %v460_v33  ;;  %793 = vmatpush.msrb.mxu3 %v564_v34  ;;  %v340_v33 = vld [vmem:[#allocation10 + $0x20] sm:$0xff]  ;;  %v341_v34 = vld [vmem:[#allocation10 + $0x28] sm:$0xff] }
 0x130   :  { %810 = vmatpush.msra.mxu0 %v461_v35  ;;  %833 = vmatpush.msra.mxu1 %v565_v36  ;;  %v462_v35 = vld [vmem:[#allocation10 + $0x3f0] sm:$0xff] }
 0x131   :  { %726 = vmatmul.f32.vlgmr.msra.gmra.mxu3 %v1246_v21  ;;  %766 = vmatmul.f32.vlgmr.msrb.gmra.mxu1 %v1246_v21  ;;  %v566_v36 = vld [vmem:[#allocation10 + $0x730] sm:$0xff] }
 0x132   :  { %771 = vmatpush.msrb.mxu2 %v452_v37  ;;  %794 = vmatpush.msrb.mxu3 %v556_v38  ;;  %v463_v37 = vld [vmem:[#allocation10 + $0x3f8] sm:$0xff] }
 0x133   :  { %811 = vmatpush.msra.mxu0 %v453_v39  ;;  %834 = vmatpush.msra.mxu1 %v557_v40  ;;  %v567_v38 = vld [vmem:[#allocation10 + $0x738] sm:$0xff]  ;;  %v454_v39 = vld [vmem:[#allocation10 + $0x3b0] sm:$0xff] }
 0x134   :  { %772 = vmatpush.msrb.mxu2 %v444_v41  ;;  %795 = vmatpush.msrb.mxu3 %v548_v42  ;;  %v558_v40 = vld [vmem:[#allocation10 + $0x6f0] sm:$0xff]  ;;  %v455_v41 = vld [vmem:[#allocation10 + $0x3b8] sm:$0xff] }
 0x135   :  { %812 = vmatpush.msra.mxu0 %v445_v43  ;;  %835 = vmatpush.msra.mxu1 %v549_v44  ;;  %v559_v42 = vld [vmem:[#allocation10 + $0x6f8] sm:$0xff]  ;;  %v446_v43 = vld [vmem:[#allocation10 + $0x370] sm:$0xff] }
 0x136   :  { %773 = vmatpush.msrb.mxu2 %v436_v45  ;;  %796 = vmatpush.msrb.mxu3 %v540_v46  ;;  %v550_v44 = vld [vmem:[#allocation10 + $0x6b0] sm:$0xff]  ;;  %v447_v45 = vld [vmem:[#allocation10 + $0x378] sm:$0xff] }
 0x137   :  { %813 = vmatpush.msra.mxu0 %v437_v47  ;;  %836 = vmatpush.msra.mxu1 %v541_v48  ;;  %v551_v46 = vld [vmem:[#allocation10 + $0x6b8] sm:$0xff]  ;;  %v438_v47 = vld [vmem:[#allocation10 + $0x330] sm:$0xff] }
 0x138   :  { %706 = vmatmul.f32.vlgmr.msra.gmra.mxu2 %v1250_v32  ;;  %746 = vmatmul.f32.vlgmr.msrb.gmra.mxu0 %v1250_v32  ;;  %v542_v48 = vld [vmem:[#allocation10 + $0x670] sm:$0xff] }
 0x139   :  { %774 = vmatpush.msrb.mxu2 %v428_v49  ;;  %797 = vmatpush.msrb.mxu3 %v532_v50  ;;  %v439_v49 = vld [vmem:[#allocation10 + $0x338] sm:$0xff] }
 0x13a   :  { %814 = vmatpush.msra.mxu0 %v429_v51  ;;  %837 = vmatpush.msra.mxu1 %v533_v52  ;;  %v543_v50 = vld [vmem:[#allocation10 + $0x678] sm:$0xff]  ;;  %v430_v51 = vld [vmem:[#allocation10 + $0x2f0] sm:$0xff] }
 0x13b   :  { %775 = vmatpush.msrb.mxu2 %v420_v53  ;;  %798 = vmatpush.msrb.mxu3 %v524_v54  ;;  %v534_v52 = vld [vmem:[#allocation10 + $0x630] sm:$0xff]  ;;  %v431_v53 = vld [vmem:[#allocation10 + $0x2f8] sm:$0xff] }
 0x13c   :  { %815 = vmatpush.msra.mxu0 %v421_v55  ;;  %838 = vmatpush.msra.mxu1 %v525_v56  ;;  %v535_v54 = vld [vmem:[#allocation10 + $0x638] sm:$0xff]  ;;  %v422_v55 = vld [vmem:[#allocation10 + $0x2b0] sm:$0xff] }
 0x13d   :  { %776 = vmatpush.msrb.mxu2 %v412_v57  ;;  %799 = vmatpush.msrb.mxu3 %v516_v58  ;;  %v526_v56 = vld [vmem:[#allocation10 + $0x5f0] sm:$0xff]  ;;  %v423_v57 = vld [vmem:[#allocation10 + $0x2b8] sm:$0xff] }
 0x13e   :  { %816 = vmatpush.msra.mxu0 %v413_v59  ;;  %839 = vmatpush.msra.mxu1 %v517_v60  ;;  %v527_v58 = vld [vmem:[#allocation10 + $0x5f8] sm:$0xff]  ;;  %v414_v59 = vld [vmem:[#allocation10 + $0x270] sm:$0xff] }
 0x13f   :  { %777 = vmatpush.msrb.mxu2 %v404_v61  ;;  %800 = vmatpush.msrb.mxu3 %v508_v62  ;;  %v518_v60 = vld [vmem:[#allocation10 + $0x5b0] sm:$0xff]  ;;  %v415_v61 = vld [vmem:[#allocation10 + $0x278] sm:$0xff] }
 0x140   :  { %817 = vmatpush.msra.mxu0 %v405_v63  ;;  %840 = vmatpush.msra.mxu1 %v509_v0  ;;  %v519_v62 = vld [vmem:[#allocation10 + $0x5b8] sm:$0xff]  ;;  %v406_v63 = vld [vmem:[#allocation10 + $0x230] sm:$0xff] }
 0x141   :  { %778 = vmatpush.msrb.mxu2 %v396_v1  ;;  %801 = vmatpush.msrb.mxu3 %v500_v2  ;;  %v510_v0 = vld [vmem:[#allocation10 + $0x570] sm:$0xff]  ;;  %v407_v1 = vld [vmem:[#allocation10 + $0x238] sm:$0xff] }
 0x142   :  { %818 = vmatpush.msra.mxu0 %v397_v3  ;;  %841 = vmatpush.msra.mxu1 %v501_v4  ;;  %v511_v2 = vld [vmem:[#allocation10 + $0x578] sm:$0xff]  ;;  %v398_v3 = vld [vmem:[#allocation10 + $0x1f0] sm:$0xff] }
 0x143   :  { %779 = vmatpush.msrb.mxu2 %v388_v5  ;;  %802 = vmatpush.msrb.mxu3 %v492_v6  ;;  %v502_v4 = vld [vmem:[#allocation10 + $0x530] sm:$0xff]  ;;  %v399_v5 = vld [vmem:[#allocation10 + $0x1f8] sm:$0xff] }
 0x144   :  { %819 = vmatpush.msra.mxu0 %v389_v7  ;;  %842 = vmatpush.msra.mxu1 %v493_v8  ;;  %v503_v6 = vld [vmem:[#allocation10 + $0x538] sm:$0xff]  ;;  %v390_v7 = vld [vmem:[#allocation10 + $0x1b0] sm:$0xff] }
 0x145   :  { %780 = vmatpush.msrb.mxu2 %v380_v9  ;;  %803 = vmatpush.msrb.mxu3 %v484_v10  ;;  %v494_v8 = vld [vmem:[#allocation10 + $0x4f0] sm:$0xff]  ;;  %v391_v9 = vld [vmem:[#allocation10 + $0x1b8] sm:$0xff] }
 0x146   :  { %820 = vmatpush.msra.mxu0 %v381_v11  ;;  %843 = vmatpush.msra.mxu1 %v485_v12  ;;  %v495_v10 = vld [vmem:[#allocation10 + $0x4f8] sm:$0xff]  ;;  %v382_v11 = vld [vmem:[#allocation10 + $0x170] sm:$0xff] }
 0x147   :  { %781 = vmatpush.msrb.mxu2 %v372_v13  ;;  %804 = vmatpush.msrb.mxu3 %v476_v14  ;;  %v486_v12 = vld [vmem:[#allocation10 + $0x4b0] sm:$0xff]  ;;  %v383_v13 = vld [vmem:[#allocation10 + $0x178] sm:$0xff] }
 0x148   :  { %821 = vmatpush.msra.mxu0 %v373_v15  ;;  %844 = vmatpush.msra.mxu1 %v477_v16  ;;  %v487_v14 = vld [vmem:[#allocation10 + $0x4b8] sm:$0xff]  ;;  %v374_v15 = vld [vmem:[#allocation10 + $0x130] sm:$0xff] }
 0x149   :  { %782 = vmatpush.msrb.mxu2 %v364_v17  ;;  %805 = vmatpush.msrb.mxu3 %v468_v18  ;;  %v478_v16 = vld [vmem:[#allocation10 + $0x470] sm:$0xff]  ;;  %v375_v17 = vld [vmem:[#allocation10 + $0x138] sm:$0xff] }
 0x14a   :  { %822 = vmatpush.msra.mxu0 %v365_v19  ;;  %845 = vmatpush.msra.mxu1 %v469_v20  ;;  %v479_v18 = vld [vmem:[#allocation10 + $0x478] sm:$0xff]  ;;  %v366_v19 = vld [vmem:[#allocation10 + $0xf0] sm:$0xff] }
 0x14b   :  { %806 = vmatmul.f32.vlgmr.msrb.gmra.mxu3 %v1246_v21  ;;  %846 = vmatmul.f32.vlgmr.msra.gmra.mxu1 %v1246_v21  ;;  %v470_v20 = vld [vmem:[#allocation10 + $0x430] sm:$0xff] }
 0x14c   :  { %870 = vmatpush.msra.mxu3 %v590_v22  ;;  %910 = vmatpush.msrb.mxu1 %v591_v23  ;;  %v367_v22 = vld [vmem:[#allocation10 + $0xf8] sm:$0xff] }
 0x14d   :  { %783 = vmatpush.msrb.mxu2 %v356_v24  ;;  %823 = vmatpush.msra.mxu0 %v357_v25  ;;  %v471_v23 = vld [vmem:[#allocation10 + $0x438] sm:$0xff]  ;;  %v358_v24 = vld [vmem:[#allocation10 + $0xb0] sm:$0xff] }
 0x14e   :  { %871 = vmatpush.msra.mxu3 %v582_v26  ;;  %911 = vmatpush.msrb.mxu1 %v583_v27  ;;  %v359_v25 = vld [vmem:[#allocation10 + $0xb8] sm:$0xff]  ;;  %v350_v26 = vld [vmem:[#allocation10 + $0x70] sm:$0xff] }
 0x14f   :  { %784 = vmatpush.msrb.mxu2 %v348_v28  ;;  %824 = vmatpush.msra.mxu0 %v349_v29  ;;  %v351_v27 = vld [vmem:[#allocation10 + $0x78] sm:$0xff]  ;;  %v342_v28 = vld [vmem:[#allocation10 + $0x30] sm:$0xff] }
 0x150   :  { %872 = vmatpush.msra.mxu3 %v574_v30  ;;  %912 = vmatpush.msrb.mxu1 %v575_v31  ;;  %v343_v29 = vld [vmem:[#allocation10 + $0x38] sm:$0xff] }
 0x151   :  { %785 = vmatpush.msrb.mxu2 %v340_v33  ;;  %825 = vmatpush.msra.mxu0 %v341_v34 }
 0x152   :  { %786 = vmatmul.f32.vlgmr.msrb.gmra.mxu2 %v1250_v32  ;;  %826 = vmatmul.f32.vlgmr.msra.gmra.mxu0 %v1250_v32 }
 0x153   :  { %850 = vmatpush.msra.mxu2 %v462_v35  ;;  %873 = vmatpush.msra.mxu3 %v566_v36  ;;  %v592_v36 = vld [vmem:[#allocation12] sm:$0xff] }
 0x154   :  { %890 = vmatpush.msrb.mxu0 %v463_v37  ;;  %913 = vmatpush.msrb.mxu1 %v567_v38  ;;  %v596_v38 = vperm.slane %v592_v36, 2 }
 0x155   :  { %851 = vmatpush.msra.mxu2 %v454_v39  ;;  %874 = vmatpush.msra.mxu3 %v558_v40 }
 0x156   :  { %891 = vmatpush.msrb.mxu0 %v455_v41  ;;  %914 = vmatpush.msrb.mxu1 %v559_v42  ;;  %v594_v41 = vperm.slane %v592_v36, 0  ;;  %v597_v42 = vperm.slane %v592_v36, 3 }
 0x157   :  { %852 = vmatpush.msra.mxu2 %v446_v43  ;;  %875 = vmatpush.msra.mxu3 %v550_v44  ;;  %v598_v43 = vperm.slane %v592_v36, 4  ;;  %v595_v44 = vperm.slane %v592_v36, 1 }
 0x158   :  { %892 = vmatpush.msrb.mxu0 %v447_v45  ;;  %915 = vmatpush.msrb.mxu1 %v551_v46 }
 0x159   :  { %853 = vmatpush.msra.mxu2 %v438_v47  ;;  %876 = vmatpush.msra.mxu3 %v542_v48  ;;  %v599_v47 = vperm.slane %v592_v36, 5 }
 0x15a   :  { %893 = vmatpush.msrb.mxu0 %v439_v49  ;;  %916 = vmatpush.msrb.mxu1 %v543_v50 }
 0x15b   :  { %854 = vmatpush.msra.mxu2 %v430_v51  ;;  %877 = vmatpush.msra.mxu3 %v534_v52 }
 0x15c   :  { %894 = vmatpush.msrb.mxu0 %v431_v53  ;;  %917 = vmatpush.msrb.mxu1 %v535_v54  ;;  %v601_v54 = vperm.slane %v592_v36, 7 }
 0x15d   :  { %855 = vmatpush.msra.mxu2 %v422_v55  ;;  %878 = vmatpush.msra.mxu3 %v526_v56 }
 0x15e   :  { %895 = vmatpush.msrb.mxu0 %v423_v57  ;;  %918 = vmatpush.msrb.mxu1 %v527_v58 }
 0x15f   :  { %856 = vmatpush.msra.mxu2 %v414_v59  ;;  %879 = vmatpush.msra.mxu3 %v518_v60 }
 0x160   :  { %896 = vmatpush.msrb.mxu0 %v415_v61  ;;  %919 = vmatpush.msrb.mxu1 %v519_v62 }
 0x161   :  { %857 = vmatpush.msra.mxu2 %v406_v63  ;;  %880 = vmatpush.msra.mxu3 %v510_v0  ;;  %v600_v0 = vperm.slane %v592_v36, 6 }
 0x162   :  { %897 = vmatpush.msrb.mxu0 %v407_v1  ;;  %920 = vmatpush.msrb.mxu1 %v511_v2 }
 0x163   :  { %858 = vmatpush.msra.mxu2 %v398_v3  ;;  %881 = vmatpush.msra.mxu3 %v502_v4 }
 0x164   :  { %898 = vmatpush.msrb.mxu0 %v399_v5  ;;  %921 = vmatpush.msrb.mxu1 %v503_v6 }
 0x165   :  { %859 = vmatpush.msra.mxu2 %v390_v7  ;;  %882 = vmatpush.msra.mxu3 %v494_v8 }
 0x166   :  { %899 = vmatpush.msrb.mxu0 %v391_v9  ;;  %922 = vmatpush.msrb.mxu1 %v495_v10 }
 0x167   :  { %860 = vmatpush.msra.mxu2 %v382_v11  ;;  %883 = vmatpush.msra.mxu3 %v486_v12 }
 0x168   :  { %900 = vmatpush.msrb.mxu0 %v383_v13  ;;  %923 = vmatpush.msrb.mxu1 %v487_v14 }
 0x169   :  { %861 = vmatpush.msra.mxu2 %v374_v15  ;;  %884 = vmatpush.msra.mxu3 %v478_v16 }
 0x16a   :  { %901 = vmatpush.msrb.mxu0 %v375_v17  ;;  %924 = vmatpush.msrb.mxu1 %v479_v18 }
 0x16b   :  { %862 = vmatpush.msra.mxu2 %v366_v19  ;;  %885 = vmatpush.msra.mxu3 %v470_v20 }
 0x16c   :  { %902 = vmatpush.msrb.mxu0 %v367_v22  ;;  %925 = vmatpush.msrb.mxu1 %v471_v23 }
 0x16d   :  { %886 = vmatmul.f32.vlgmr.msra.gmra.mxu3 %v1246_v21  ;;  %926 = vmatmul.f32.vlgmr.msrb.gmra.mxu1 %v1246_v21 }
 0x16e   :  { %863 = vmatpush.msra.mxu2 %v358_v24  ;;  %903 = vmatpush.msrb.mxu0 %v359_v25 }
 0x170   :  { %864 = vmatpush.msra.mxu2 %v350_v26  ;;  %904 = vmatpush.msrb.mxu0 %v351_v27 }
 0x172   :  { %865 = vmatpush.msra.mxu2 %v342_v28  ;;  %905 = vmatpush.msrb.mxu0 %v343_v29 }
 0x173   :  { %866 = vmatmul.f32.vlgmr.msra.gmra.mxu2 %v1250_v32  ;;  %906 = vmatmul.f32.vlgmr.msrb.gmra.mxu0 %v1250_v32 }
 0x1a5   :  { %v687_v33 = vpop.f32.mrf.mxu1 }
 0x1ab   :  { %v667_v30 = vpop.f32.mrf.mxu0  ;;  %v647_v34 = vpop.f32.mrf.mxu3 }
 0x1ac   :  { %v668_v50 = vadd.f32 %v667_v30, %v595_v44 }
 0x1ae   :  { %v767_v37 = vpop.f32.mrf.mxu1  ;;  %v688_v60 = vadd.f32 %v687_v33, %v668_v50 }
 0x1b0   :  { %v931_v4 = vmax.f32 %v688_v60, 0.0 }
 0x1b1   :  { %v627_v31 = vpop.f32.mrf.mxu2 }
 0x1b2   :  { %v628_v48 = vadd.f32 %v627_v31, %v594_v41 }
 0x1b4   :  { %v727_v39 = vpop.f32.mrf.mxu3  ;;  %v648_v57 = vadd.f32 %v647_v34, %v628_v48 }
 0x1b5   :  { %v747_v35 = vpop.f32.mrf.mxu0 }
 0x1b6   :  { %v748_v32 = vadd.f32 %v747_v35, %v597_v42  ;;  %v930_v1 = vmax.f32 %v648_v57, 0.0 }
 0x1b8   :  { %v768_v58 = vadd.f32 %v767_v37, %v748_v32  ;;  %v938_v12 = vpack.c.bf16 %v931_v4, %v930_v1 }
 0x1ba   :  { %v933_v2 = vmax.f32 %v768_v58, 0.0  ;;  %v946_v19 = vrot.slane %v938_v12, 3 }
 0x1bb   :  { %v707_v21 = vpop.f32.mrf.mxu2 }
 0x1bc   :  { %v708_v46 = vadd.f32 %v707_v21, %v596_v38  ;;  %v956_v27 = vsel %vm953_vm2, %v938_v12, %v946_v19 }
 0x1be   :  { %v728_v52 = vadd.f32 %v727_v39, %v708_v46 }
 0x1c0   :  { %v932_v61 = vmax.f32 %v728_v52, 0.0 }
 0x1c2   :  { %v939_v7 = vpack.c.bf16 %v933_v2, %v932_v61 }
 0x1c4   :  { %v947_v15 = vrot.slane %v939_v7, 6  ;;  %v948_v16 = vrot.slane %v939_v7, 1 }
 0x1c6   :  { %v960_v24 = vsel %vm957_vm1, %v947_v15, %v948_v16 }
 0x1c7   :  { %v962_v30 = vsel %vm961_vm3, %v956_v27, %v960_v24 }
 0x1c8   :  { %v847_v51 = vpop.f32.mrf.mxu1 }
 0x1ce   :  { %v807_v55 = vpop.f32.mrf.mxu3 }
 0x1cf   :  { %v827_v40 = vpop.f32.mrf.mxu0 }
 0x1d0   :  { %v828_v53 = vadd.f32 %v827_v40, %v599_v47 }
 0x1d2   :  { %v848_v62 = vadd.f32 %v847_v51, %v828_v53 }
 0x1d4   :  { %v935_v8 = vmax.f32 %v848_v62, 0.0 }
 0x1d5   :  { %v787_v45 = vpop.f32.mrf.mxu2 }
 0x1d6   :  { %v788_v49 = vadd.f32 %v787_v45, %v598_v43 }
 0x1d8   :  { %v808_v59 = vadd.f32 %v807_v55, %v788_v49 }
 0x1da   :  { %v934_v3 = vmax.f32 %v808_v59, 0.0 }
 0x1dc   :  { %v940_v13 = vpack.c.bf16 %v935_v8, %v934_v3 }
 0x1de   :  { %v949_v20 = vrot.slane %v940_v13, 4  ;;  %v950_v22 = vrot.slane %v940_v13, 7 }
 0x1e0   :  { %v966_v28 = vsel %vm963_vm4, %v949_v20, %v950_v22 }
 0x1ea   :  { %v927_v5 = vpop.f32.mrf.mxu1 }
 0x1f0   :  { %v907_v56 = vpop.f32.mrf.mxu0  ;;  %v887_v11 = vpop.f32.mrf.mxu3 }
 0x1f1   :  { %v908_v63 = vadd.f32 %v907_v56, %v601_v54 }
 0x1f3   :  { %v928_v9 = vadd.f32 %v927_v5, %v908_v63 }
 0x1f5   :  { %v937_v17 = vmax.f32 %v928_v9, 0.0 }
 0x1f6   :  { %v867_v6 = vpop.f32.mrf.mxu2 }
 0x1f7   :  { %v868_v10 = vadd.f32 %v867_v6, %v600_v0 }
 0x1f9   :  { %v888_v14 = vadd.f32 %v887_v11, %v868_v10 }
 0x1fb   :  { %v936_v18 = vmax.f32 %v888_v14, 0.0 }
 0x1fd   :  { %v941_v23 = vpack.c.bf16 %v937_v17, %v936_v18 }
 0x1ff   :  { %v951_v25 = vrot.slane %v941_v23, 2  ;;  %v952_v26 = vrot.slane %v941_v23, 5 }
 0x201   :  { %v970_v29 = vsel %vm967_vm5, %v951_v25, %v952_v26 }
 0x202   :  { %v972_v31 = vsel %vm971_vm6, %v966_v28, %v970_v29 }
 0x203   :  { %v974_v33 = vsel %vm973_vm7, %v962_v30, %v972_v31 }
 0x204   :  { %976 = vst [vmem:[%s1276_s7] sm:$0xff] %v974_v33 }
 0x205   :  { %981 = vsyncpa [#allocation3], 1 }
 0x206   :  { %982 = vsyncpa [#allocation5], 1 }
 0x207   :  { %983 = vsyncpa [#allocation8], 1 }
 0x208   :  { %984 = vsyncpa [#allocation11], 1 }

// kernel: simpleconv64d_forward.6
= control target key start
LH: loop header
LB: loop body
LE: loop exit
PB: predicated region body
PF: predicated region fallthrough
CT: control target
= control target key end

     0   :  { %s919_s1 = inlined_call_operand.vmem [shape: bf16[256,256], index: 1, kind: input, shape index: {}]   ;;  %s920_s0 = inlined_call_operand.vmem [shape: bf16[64,256], index: 0, kind: input, shape index: {}]   ;;  %s921_s2 = inlined_call_operand.vmem [shape: f32[1,256], index: 2, kind: input, shape index: {}]   ;;  %s922_s3 = inlined_call_operand.vmem [shape: bf16[64,256], index: 3, kind: output, shape index: {}]  }
   0x1   :  { %v502_v0 = vld [vmem:[%s919_s1 + $0x70] sm:$0xf]  ;;  %v595_v1 = vld [vmem:[%s919_s1 + $0x74] sm:$0xf0]  ;;  %v594_v5 = vld [vmem:[%s919_s1 + $0x74] sm:$0xf] }
   0x2   :  { %v566_v2 = vld [vmem:[%s919_s1 + $0xf0] sm:$0xf]  ;;  %v503_v3 = vor.u32 %v595_v1, %v502_v0  ;;  %v611_v4 = vld [vmem:[%s919_s1 + $0xf4] sm:$0xf0]  ;;  %v504_v6 = vld [vmem:[%s919_s1 + $0x78] sm:$0xf0] }
   0x3   :  { %v567_v7 = vor.u32 %v611_v4, %v566_v2  ;;  %v507_v8 = vor.u32 %v594_v5, %v504_v6  ;;  %v610_v9 = vld [vmem:[%s919_s1 + $0xf4] sm:$0xf]  ;;  %v568_v10 = vld [vmem:[%s919_s1 + $0xf8] sm:$0xf0]  ;;  %v494_v11 = vld [vmem:[%s919_s1 + $0x60] sm:$0xf] }
   0x4   :  { %260 = vmatpush.bf16.msra.mxu0 %v503_v3  ;;  %v571_v12 = vor.u32 %v610_v9, %v568_v10  ;;  %v593_v13 = vld [vmem:[%s919_s1 + $0x64] sm:$0xf0]  ;;  %v558_v14 = vld [vmem:[%s919_s1 + $0xe0] sm:$0xf]  ;;  %v592_v18 = vld [vmem:[%s919_s1 + $0x64] sm:$0xf] }
   0x5   :  { %v609_v15 = vld [vmem:[%s919_s1 + $0xe4] sm:$0xf0]  ;;  %289 = vmatpush.bf16.msra.mxu1 %v567_v7  ;;  %318 = vmatpush.bf16.msra.mxu2 %v507_v8  ;;  %v495_v16 = vor.u32 %v593_v13, %v494_v11  ;;  %v496_v19 = vld [vmem:[%s919_s1 + $0x68] sm:$0xf0]  ;;  %v608_v20 = vld [vmem:[%s919_s1 + $0xe4] sm:$0xf] }
   0x6   :  { %v559_v17 = vor.u32 %v609_v15, %v558_v14  ;;  %347 = vmatpush.bf16.msra.mxu3 %v571_v12  ;;  %v499_v21 = vor.u32 %v592_v18, %v496_v19  ;;  %v560_v22 = vld [vmem:[%s919_s1 + $0xe8] sm:$0xf0]  ;;  %v486_v23 = vld [vmem:[%s919_s1 + $0x50] sm:$0xf]  ;;  %v591_v24 = vld [vmem:[%s919_s1 + $0x54] sm:$0xf0] }
   0x7   :  { %v563_v25 = vor.u32 %v608_v20, %v560_v22  ;;  %v550_v26 = vld [vmem:[%s919_s1 + $0xd0] sm:$0xf]  ;;  %v607_v27 = vld [vmem:[%s919_s1 + $0xd4] sm:$0xf0]  ;;  %v590_v28 = vld [vmem:[%s919_s1 + $0x54] sm:$0xf]  ;;  %v487_v29 = vor.u32 %v591_v24, %v486_v23 }
   0x8   :  { %261 = vmatpush.bf16.msra.mxu0 %v495_v16  ;;  %v488_v30 = vld [vmem:[%s919_s1 + $0x58] sm:$0xf0]  ;;  %v606_v31 = vld [vmem:[%s919_s1 + $0xd4] sm:$0xf]  ;;  %v551_v33 = vor.u32 %v607_v27, %v550_v26  ;;  %v478_v35 = vld [vmem:[%s919_s1 + $0x40] sm:$0xf] }
   0x9   :  { %v552_v32 = vld [vmem:[%s919_s1 + $0xd8] sm:$0xf0]  ;;  %290 = vmatpush.bf16.msra.mxu1 %v559_v17  ;;  %319 = vmatpush.bf16.msra.mxu2 %v499_v21  ;;  %v491_v34 = vor.u32 %v590_v28, %v488_v30  ;;  %v589_v36 = vld [vmem:[%s919_s1 + $0x44] sm:$0xf0]  ;;  %v542_v37 = vld [vmem:[%s919_s1 + $0xc0] sm:$0xf] }
   0xa   :  { %348 = vmatpush.bf16.msra.mxu3 %v563_v25  ;;  %v555_v38 = vor.u32 %v606_v31, %v552_v32  ;;  %v605_v39 = vld [vmem:[%s919_s1 + $0xc4] sm:$0xf0]  ;;  %v588_v40 = vld [vmem:[%s919_s1 + $0x44] sm:$0xf]  ;;  %v480_v41 = vld [vmem:[%s919_s1 + $0x48] sm:$0xf0]  ;;  %v479_v44 = vor.u32 %v589_v36, %v478_v35 }
   0xb   :  { %v604_v42 = vld [vmem:[%s919_s1 + $0xc4] sm:$0xf]  ;;  %v544_v43 = vld [vmem:[%s919_s1 + $0xc8] sm:$0xf0]  ;;  %v543_v45 = vor.u32 %v605_v39, %v542_v37  ;;  %v483_v46 = vor.u32 %v588_v40, %v480_v41  ;;  %v470_v47 = vld [vmem:[%s919_s1 + $0x30] sm:$0xf] }
   0xc   :  { %262 = vmatpush.bf16.msra.mxu0 %v487_v29  ;;  %v587_v48 = vld [vmem:[%s919_s1 + $0x34] sm:$0xf0]  ;;  %v534_v49 = vld [vmem:[%s919_s1 + $0xb0] sm:$0xf]  ;;  %v547_v50 = vor.u32 %v604_v42, %v544_v43  ;;  %v586_v52 = vld [vmem:[%s919_s1 + $0x34] sm:$0xf] }
   0xd   :  { %291 = vmatpush.bf16.msra.mxu1 %v551_v33  ;;  %320 = vmatpush.bf16.msra.mxu2 %v491_v34  ;;  %v603_v51 = vld [vmem:[%s919_s1 + $0xb4] sm:$0xf0]  ;;  %v472_v53 = vld [vmem:[%s919_s1 + $0x38] sm:$0xf0]  ;;  %v602_v54 = vld [vmem:[%s919_s1 + $0xb4] sm:$0xf]  ;;  %v471_v56 = vor.u32 %v587_v48, %v470_v47 }
   0xe   :  { %349 = vmatpush.bf16.msra.mxu3 %v555_v38  ;;  %v536_v55 = vld [vmem:[%s919_s1 + $0xb8] sm:$0xf0]  ;;  %v535_v57 = vor.u32 %v603_v51, %v534_v49  ;;  %v475_v58 = vor.u32 %v586_v52, %v472_v53  ;;  %v462_v59 = vld [vmem:[%s919_s1 + $0x20] sm:$0xf]  ;;  %v585_v60 = vld [vmem:[%s919_s1 + $0x24] sm:$0xf0] }
   0xf   :  { %v526_v61 = vld [vmem:[%s919_s1 + $0xa0] sm:$0xf]  ;;  %v539_v62 = vor.u32 %v602_v54, %v536_v55  ;;  %v601_v63 = vld [vmem:[%s919_s1 + $0xa4] sm:$0xf0]  ;;  %v584_v0 = vld [vmem:[%s919_s1 + $0x24] sm:$0xf]  ;;  %v463_v4 = vor.u32 %v585_v60, %v462_v59 }
  0x10   :  { %263 = vmatpush.bf16.msra.mxu0 %v479_v44  ;;  %v464_v1 = vld [vmem:[%s919_s1 + $0x28] sm:$0xf0]  ;;  %v600_v2 = vld [vmem:[%s919_s1 + $0xa4] sm:$0xf]  ;;  %v527_v5 = vor.u32 %v601_v63, %v526_v61  ;;  %v454_v7 = vld [vmem:[%s919_s1 + $0x10] sm:$0xf] }
  0x11   :  { %292 = vmatpush.bf16.msra.mxu1 %v543_v45  ;;  %321 = vmatpush.bf16.msra.mxu2 %v483_v46  ;;  %v528_v3 = vld [vmem:[%s919_s1 + $0xa8] sm:$0xf0]  ;;  %v467_v6 = vor.u32 %v584_v0, %v464_v1  ;;  %v583_v8 = vld [vmem:[%s919_s1 + $0x14] sm:$0xf0]  ;;  %v518_v9 = vld [vmem:[%s919_s1 + $0x90] sm:$0xf] }
  0x12   :  { %350 = vmatpush.bf16.msra.mxu3 %v547_v50  ;;  %v531_v10 = vor.u32 %v600_v2, %v528_v3  ;;  %v599_v11 = vld [vmem:[%s919_s1 + $0x94] sm:$0xf0]  ;;  %v582_v12 = vld [vmem:[%s919_s1 + $0x14] sm:$0xf]  ;;  %v456_v13 = vld [vmem:[%s919_s1 + $0x18] sm:$0xf0]  ;;  %v455_v16 = vor.u32 %v583_v8, %v454_v7 }
  0x13   :  { %v598_v14 = vld [vmem:[%s919_s1 + $0x94] sm:$0xf]  ;;  %v520_v15 = vld [vmem:[%s919_s1 + $0x98] sm:$0xf0]  ;;  %v519_v17 = vor.u32 %v599_v11, %v518_v9  ;;  %v459_v18 = vor.u32 %v582_v12, %v456_v13  ;;  %v446_v19 = vld [vmem:[%s919_s1] sm:$0xf] }
  0x14   :  { %264 = vmatpush.bf16.msra.mxu0 %v471_v56  ;;  %v581_v20 = vld [vmem:[%s919_s1 + $0x4] sm:$0xf0]  ;;  %v510_v21 = vld [vmem:[%s919_s1 + $0x80] sm:$0xf]  ;;  %v523_v22 = vor.u32 %v598_v14, %v520_v15  ;;  %v580_v24 = vld [vmem:[%s919_s1 + $0x4] sm:$0xf] }
  0x15   :  { %293 = vmatpush.bf16.msra.mxu1 %v535_v57  ;;  %322 = vmatpush.bf16.msra.mxu2 %v475_v58  ;;  %v597_v23 = vld [vmem:[%s919_s1 + $0x84] sm:$0xf0]  ;;  %v448_v25 = vld [vmem:[%s919_s1 + $0x8] sm:$0xf0]  ;;  %v596_v26 = vld [vmem:[%s919_s1 + $0x84] sm:$0xf]  ;;  %v447_v28 = vor.u32 %v581_v20, %v446_v19 }
  0x16   :  { %351 = vmatpush.bf16.msra.mxu3 %v539_v62  ;;  %v512_v27 = vld [vmem:[%s919_s1 + $0x88] sm:$0xf0]  ;;  %v414_v29 = vld [vmem:[%s920_s0] sm:$0xf]  ;;  %v573_v30 = vld [vmem:[%s920_s0 + $0x4] sm:$0xf0]  ;;  %v511_v31 = vor.u32 %v597_v23, %v510_v21  ;;  %v451_v32 = vor.u32 %v580_v24, %v448_v25 }
  0x17   :  { %v572_v33 = vld [vmem:[%s920_s0 + $0x4] sm:$0xf]  ;;  %v416_v34 = vld [vmem:[%s920_s0 + $0x8] sm:$0xf0]  ;;  %v515_v35 = vor.u32 %v596_v26, %v512_v27  ;;  %v415_v36 = vor.u32 %v573_v30, %v414_v29  ;;  %v422_v38 = vld [vmem:[%s920_s0 + $0x10] sm:$0xf] }
  0x18   :  { %265 = vmatpush.bf16.msra.mxu0 %v463_v4  ;;  %v419_v37 = vor.u32 %v572_v33, %v416_v34  ;;  %v575_v39 = vld [vmem:[%s920_s0 + $0x14] sm:$0xf0]  ;;  %v574_v40 = vld [vmem:[%s920_s0 + $0x14] sm:$0xf]  ;;  %v424_v41 = vld [vmem:[%s920_s0 + $0x18] sm:$0xf0] }
  0x19   :  { %294 = vmatpush.bf16.msra.mxu1 %v527_v5  ;;  %323 = vmatpush.bf16.msra.mxu2 %v467_v6  ;;  %v423_v42 = vor.u32 %v575_v39, %v422_v38  ;;  %v427_v43 = vor.u32 %v574_v40, %v424_v41  ;;  %v430_v44 = vld [vmem:[%s920_s0 + $0x20] sm:$0xf]  ;;  %v577_v45 = vld [vmem:[%s920_s0 + $0x24] sm:$0xf0]  ;;  %v576_v46 = vld [vmem:[%s920_s0 + $0x24] sm:$0xf] }
  0x1a   :  { %352 = vmatpush.bf16.msra.mxu3 %v531_v10  ;;  %v432_v47 = vld [vmem:[%s920_s0 + $0x28] sm:$0xf0]  ;;  %v431_v48 = vor.u32 %v577_v45, %v430_v44  ;;  %v438_v50 = vld [vmem:[%s920_s0 + $0x30] sm:$0xf]  ;;  %v579_v51 = vld [vmem:[%s920_s0 + $0x34] sm:$0xf0] }
  0x1b   :  { %v435_v49 = vor.u32 %v576_v46, %v432_v47  ;;  %v578_v52 = vld [vmem:[%s920_s0 + $0x34] sm:$0xf]  ;;  %v440_v53 = vld [vmem:[%s920_s0 + $0x38] sm:$0xf0]  ;;  %v439_v54 = vor.u32 %v579_v51, %v438_v50  ;;  %v54_v56 = vld [vmem:[%s921_s2] sm:$0x3] }
  0x1c   :  { %266 = vmatpush.bf16.msra.mxu0 %v455_v16  ;;  %v443_v55 = vor.u32 %v578_v52, %v440_v53  ;;  %v875_v57 = vperm.slane %v54_v56, 0  ;;  %v878_v61 = vperm.slane %v54_v56, 1 }
  0x1d   :  { %295 = vmatpush.bf16.msra.mxu1 %v519_v17  ;;  %324 = vmatpush.bf16.msra.mxu2 %v459_v18 }
  0x1e   :  { %353 = vmatpush.bf16.msra.mxu3 %v523_v22 }
  0x20   :  { %267 = vmatpush.bf16.msra.mxu0 %v447_v28 }
  0x21   :  { %296 = vmatpush.bf16.msra.mxu1 %v511_v31  ;;  %325 = vmatpush.bf16.msra.mxu2 %v451_v32 }
  0x22   :  { %354 = vmatpush.bf16.msra.mxu3 %v515_v35 }
  0x23   :  { %268 = vmatmul.bf16.vlgmr.msra.gmra.mxu0 %v415_v36 }
  0x24   :  { %297 = vmatmul.bf16.vlgmr.msra.gmra.mxu1 %v419_v37  ;;  %326 = vmatmul.bf16.vlgmr.msra.gmra.mxu2 %v415_v36 }
  0x25   :  { %355 = vmatmul.bf16.vlgmr.msra.gmra.mxu3 %v419_v37 }
  0x33   :  { %273 = vmatmul.bf16.gmra.mxu0 %v423_v42 }
  0x34   :  { %302 = vmatmul.bf16.gmra.mxu1 %v427_v43  ;;  %331 = vmatmul.bf16.gmra.mxu2 %v423_v42 }
  0x35   :  { %360 = vmatmul.bf16.gmra.mxu3 %v427_v43 }
  0x43   :  { %278 = vmatmul.bf16.gmra.mxu0 %v431_v48 }
  0x44   :  { %307 = vmatmul.bf16.gmra.mxu1 %v435_v49  ;;  %336 = vmatmul.bf16.gmra.mxu2 %v431_v48 }
  0x45   :  { %365 = vmatmul.bf16.gmra.mxu3 %v435_v49 }
  0x53   :  { %283 = vmatmul.bf16.gmra.mxu0 %v439_v54 }
  0x54   :  { %312 = vmatmul.bf16.gmra.mxu1 %v443_v55  ;;  %341 = vmatmul.bf16.gmra.mxu2 %v439_v54 }
  0x55   :  { %370 = vmatmul.bf16.gmra.mxu3 %v443_v55 }
  0xa0   :  { %v269_v58 = vpop.f32.mrf.mxu0 }
  0xa1   :  { %v298_v59 = vpop.f32.mrf.mxu1  ;;  %v270_v60 = vadd.f32 %v269_v58, %v875_v57 }
  0xa3   :  { %v299_v62 = vadd.f32 %v298_v59, %v270_v60 }
  0xa5   :  { %v376_v4 = vmax.f32 %v299_v62, 0.0 }
  0xa7   :  { %v327_v63 = vpop.f32.mrf.mxu2 }
  0xa8   :  { %v328_v0 = vadd.f32 %v327_v63, %v878_v61  ;;  %v356_v1 = vpop.f32.mrf.mxu3  ;;  %v271_v2 = vpop.f32.mrf.mxu0 }
  0xa9   :  { %v300_v3 = vpop.f32.mrf.mxu1  ;;  %v272_v7 = vadd.f32 %v271_v2, %v875_v57 }
  0xaa   :  { %v357_v5 = vadd.f32 %v356_v1, %v328_v0 }
  0xab   :  { %v301_v10 = vadd.f32 %v300_v3, %v272_v7 }
  0xac   :  { %v377_v6 = vmax.f32 %v357_v5, 0.0 }
  0xad   :  { %v378_v17 = vmax.f32 %v301_v10, 0.0 }
  0xae   :  { %v392_v8 = vpack.c.bf16 %v377_v6, %v376_v4 }
  0xaf   :  { %v329_v9 = vpop.f32.mrf.mxu2 }
  0xb0   :  { %400 = vst [vmem:[%s922_s3] sm:$0xff] %v392_v8  ;;  %v330_v11 = vadd.f32 %v329_v9, %v878_v61  ;;  %v358_v12 = vpop.f32.mrf.mxu3  ;;  %v274_v13 = vpop.f32.mrf.mxu0 }
  0xb1   :  { %v303_v14 = vpop.f32.mrf.mxu1  ;;  %v275_v16 = vadd.f32 %v274_v13, %v875_v57 }
  0xb2   :  { %v359_v15 = vadd.f32 %v358_v12, %v330_v11 }
  0xb3   :  { %v304_v20 = vadd.f32 %v303_v14, %v275_v16 }
  0xb4   :  { %v379_v18 = vmax.f32 %v359_v15, 0.0 }
  0xb5   :  { %v380_v26 = vmax.f32 %v304_v20, 0.0 }
  0xb6   :  { %v393_v19 = vpack.c.bf16 %v379_v18, %v378_v17 }
  0xb7   :  { %v332_v21 = vpop.f32.mrf.mxu2 }
  0xb8   :  { %401 = vst [vmem:[%s922_s3 + $0x8] sm:$0xff] %v393_v19  ;;  %v333_v22 = vadd.f32 %v332_v21, %v878_v61  ;;  %v361_v23 = vpop.f32.mrf.mxu3  ;;  %v276_v24 = vpop.f32.mrf.mxu0 }
  0xb9   :  { %v305_v25 = vpop.f32.mrf.mxu1  ;;  %v277_v29 = vadd.f32 %v276_v24, %v875_v57 }
  0xba   :  { %v362_v27 = vadd.f32 %v361_v23, %v333_v22 }
  0xbb   :  { %v306_v32 = vadd.f32 %v305_v25, %v277_v29 }
  0xbc   :  { %v381_v28 = vmax.f32 %v362_v27, 0.0 }
  0xbd   :  { %v382_v39 = vmax.f32 %v306_v32, 0.0 }
  0xbe   :  { %v394_v30 = vpack.c.bf16 %v381_v28, %v380_v26 }
  0xbf   :  { %v334_v31 = vpop.f32.mrf.mxu2 }
  0xc0   :  { %402 = vst [vmem:[%s922_s3 + $0x10] sm:$0xff] %v394_v30  ;;  %v335_v33 = vadd.f32 %v334_v31, %v878_v61  ;;  %v363_v34 = vpop.f32.mrf.mxu3  ;;  %v279_v35 = vpop.f32.mrf.mxu0 }
  0xc1   :  { %v308_v36 = vpop.f32.mrf.mxu1  ;;  %v280_v38 = vadd.f32 %v279_v35, %v875_v57 }
  0xc2   :  { %v364_v37 = vadd.f32 %v363_v34, %v335_v33 }
  0xc3   :  { %v309_v42 = vadd.f32 %v308_v36, %v280_v38 }
  0xc4   :  { %v383_v40 = vmax.f32 %v364_v37, 0.0 }
  0xc5   :  { %v384_v47 = vmax.f32 %v309_v42, 0.0 }
  0xc6   :  { %v395_v41 = vpack.c.bf16 %v383_v40, %v382_v39 }
  0xc7   :  { %v337_v43 = vpop.f32.mrf.mxu2 }
  0xc8   :  { %403 = vst [vmem:[%s922_s3 + $0x18] sm:$0xff] %v395_v41  ;;  %v338_v44 = vadd.f32 %v337_v43, %v878_v61  ;;  %v366_v45 = vpop.f32.mrf.mxu3  ;;  %v281_v46 = vpop.f32.mrf.mxu0 }
  0xc9   :  { %v310_v49 = vpop.f32.mrf.mxu1  ;;  %v282_v51 = vadd.f32 %v281_v46, %v875_v57 }
  0xca   :  { %v367_v48 = vadd.f32 %v366_v45, %v338_v44 }
  0xcb   :  { %v311_v54 = vadd.f32 %v310_v49, %v282_v51 }
  0xcc   :  { %v385_v50 = vmax.f32 %v367_v48, 0.0 }
  0xcd   :  { %v386_v62 = vmax.f32 %v311_v54, 0.0 }
  0xce   :  { %v396_v52 = vpack.c.bf16 %v385_v50, %v384_v47 }
  0xcf   :  { %v339_v53 = vpop.f32.mrf.mxu2 }
  0xd0   :  { %404 = vst [vmem:[%s922_s3 + $0x20] sm:$0xff] %v396_v52  ;;  %v340_v55 = vadd.f32 %v339_v53, %v878_v61  ;;  %v368_v56 = vpop.f32.mrf.mxu3  ;;  %v284_v58 = vpop.f32.mrf.mxu0 }
  0xd1   :  { %v285_v60 = vadd.f32 %v284_v58, %v875_v57  ;;  %v313_v0 = vpop.f32.mrf.mxu1 }
  0xd2   :  { %v369_v59 = vadd.f32 %v368_v56, %v340_v55 }
  0xd3   :  { %v314_v2 = vadd.f32 %v313_v0, %v285_v60 }
  0xd4   :  { %v387_v63 = vmax.f32 %v369_v59, 0.0 }
  0xd5   :  { %v388_v7 = vmax.f32 %v314_v2, 0.0 }
  0xd6   :  { %v397_v1 = vpack.c.bf16 %v387_v63, %v386_v62 }
  0xd7   :  { %v342_v3 = vpop.f32.mrf.mxu2 }
  0xd8   :  { %405 = vst [vmem:[%s922_s3 + $0x28] sm:$0xff] %v397_v1  ;;  %v343_v4 = vadd.f32 %v342_v3, %v878_v61  ;;  %v371_v5 = vpop.f32.mrf.mxu3  ;;  %v286_v6 = vpop.f32.mrf.mxu0 }
  0xd9   :  { %v287_v10 = vadd.f32 %v286_v6, %v875_v57  ;;  %v315_v12 = vpop.f32.mrf.mxu1 }
  0xda   :  { %v372_v8 = vadd.f32 %v371_v5, %v343_v4 }
  0xdb   :  { %v316_v14 = vadd.f32 %v315_v12, %v287_v10 }
  0xdc   :  { %v389_v9 = vmax.f32 %v372_v8, 0.0 }
  0xdd   :  { %v390_v18 = vmax.f32 %v316_v14, 0.0 }
  0xde   :  { %v398_v11 = vpack.c.bf16 %v389_v9, %v388_v7 }
  0xdf   :  { %v344_v13 = vpop.f32.mrf.mxu2 }
  0xe0   :  { %406 = vst [vmem:[%s922_s3 + $0x30] sm:$0xff] %v398_v11  ;;  %v345_v15 = vadd.f32 %v344_v13, %v878_v61  ;;  %v373_v16 = vpop.f32.mrf.mxu3 }
  0xe2   :  { %v374_v17 = vadd.f32 %v373_v16, %v345_v15 }
  0xe4   :  { %v391_v19 = vmax.f32 %v374_v17, 0.0 }
  0xe6   :  { %v399_v20 = vpack.c.bf16 %v391_v19, %v390_v18 }
  0xe8   :  { %407 = vst [vmem:[%s922_s3 + $0x38] sm:$0xff] %v399_v20 }

// kernel: simpleconv64d_forward.7
= control target key start
LH: loop header
LB: loop body
LE: loop exit
PB: predicated region body
PF: predicated region fallthrough
CT: control target
= control target key end

     0   :  { %s1014_s1 = inlined_call_operand.vmem [shape: bf16[256,128], index: 1, kind: input, shape index: {}]   ;;  %s1015_s2 = inlined_call_operand.vmem [shape: f32[1,128], index: 2, kind: input, shape index: {}]   ;;  %s1016_s0 = inlined_call_operand.vmem [shape: bf16[176,256], index: 0, kind: input, shape index: {}]   ;;  %s1017_s3 = inlined_call_operand.vmem [shape: bf16[176,128], index: 3, kind: output, shape index: {}]  }
   0x1   :  { %v657_v0 = vld [vmem:[%s1014_s1 + $0x38] sm:$0xff]  ;;  %v656_v2 = vld [vmem:[%s1014_s1 + $0x30] sm:$0xff]  ;;  %v655_v4 = vld [vmem:[%s1014_s1 + $0x28] sm:$0xff] }
   0x2   :  { %v665_v1 = vld [vmem:[%s1014_s1 + $0x78] sm:$0xff]  ;;  %278 = vmatpush.bf16.msra.mxu0 %v657_v0  ;;  %731 = vmatpush.bf16.msra.mxu2 %v657_v0  ;;  %v664_v3 = vld [vmem:[%s1014_s1 + $0x70] sm:$0xff]  ;;  %v663_v5 = vld [vmem:[%s1014_s1 + $0x68] sm:$0xff] }
   0x3   :  { %342 = vmatpush.bf16.msra.mxu1 %v665_v1  ;;  %739 = vmatpush.bf16.msra.mxu3 %v665_v1  ;;  %v654_v6 = vld [vmem:[%s1014_s1 + $0x20] sm:$0xff]  ;;  %v653_v8 = vld [vmem:[%s1014_s1 + $0x18] sm:$0xff]  ;;  %v652_v10 = vld [vmem:[%s1014_s1 + $0x10] sm:$0xff] }
   0x4   :  { %v662_v7 = vld [vmem:[%s1014_s1 + $0x60] sm:$0xff]  ;;  %v661_v9 = vld [vmem:[%s1014_s1 + $0x58] sm:$0xff]  ;;  %v660_v11 = vld [vmem:[%s1014_s1 + $0x50] sm:$0xff] }
   0x5   :  { %v651_v12 = vld [vmem:[%s1014_s1 + $0x8] sm:$0xff]  ;;  %v650_v14 = vld [vmem:[%s1014_s1] sm:$0xff]  ;;  %v518_v18 = vld [vmem:[%s1016_s0 + $0x50] sm:$0xf] }
   0x6   :  { %279 = vmatpush.bf16.msra.mxu0 %v656_v2  ;;  %732 = vmatpush.bf16.msra.mxu2 %v656_v2  ;;  %v659_v13 = vld [vmem:[%s1014_s1 + $0x48] sm:$0xff]  ;;  %v658_v15 = vld [vmem:[%s1014_s1 + $0x40] sm:$0xff]  ;;  %v639_v19 = vld [vmem:[%s1016_s0 + $0x54] sm:$0xf0] }
   0x7   :  { %343 = vmatpush.bf16.msra.mxu1 %v664_v3  ;;  %740 = vmatpush.bf16.msra.mxu3 %v664_v3  ;;  %v478_v16 = vld [vmem:[%s1016_s0] sm:$0xf]  ;;  %v629_v17 = vld [vmem:[%s1016_s0 + $0x4] sm:$0xf0]  ;;  %v628_v20 = vld [vmem:[%s1016_s0 + $0x4] sm:$0xf]  ;;  %v519_v25 = vor.u32 %v639_v19, %v518_v18 }
   0x8   :  { %v480_v21 = vld [vmem:[%s1016_s0 + $0x8] sm:$0xf0]  ;;  %v640_v22 = vld [vmem:[%s1016_s0 + $0x64] sm:$0xf]  ;;  %v479_v24 = vor.u32 %v629_v17, %v478_v16  ;;  %v486_v28 = vld [vmem:[%s1016_s0 + $0x10] sm:$0xf] }
   0x9   :  { %v528_v23 = vld [vmem:[%s1016_s0 + $0x68] sm:$0xf0]  ;;  %v483_v26 = vor.u32 %v628_v20, %v480_v21  ;;  %v631_v29 = vld [vmem:[%s1016_s0 + $0x14] sm:$0xf0]  ;;  %v526_v30 = vld [vmem:[%s1016_s0 + $0x60] sm:$0xf] }
   0xa   :  { %280 = vmatpush.bf16.msra.mxu0 %v655_v4  ;;  %733 = vmatpush.bf16.msra.mxu2 %v655_v4  ;;  %v531_v27 = vor.u32 %v640_v22, %v528_v23  ;;  %v641_v31 = vld [vmem:[%s1016_s0 + $0x64] sm:$0xf0]  ;;  %v630_v32 = vld [vmem:[%s1016_s0 + $0x14] sm:$0xf]  ;;  %v488_v33 = vld [vmem:[%s1016_s0 + $0x18] sm:$0xf0]  ;;  %v487_v36 = vor.u32 %v631_v29, %v486_v28 }
   0xb   :  { %344 = vmatpush.bf16.msra.mxu1 %v663_v5  ;;  %741 = vmatpush.bf16.msra.mxu3 %v663_v5  ;;  %v642_v34 = vld [vmem:[%s1016_s0 + $0x74] sm:$0xf]  ;;  %v536_v35 = vld [vmem:[%s1016_s0 + $0x78] sm:$0xf0]  ;;  %v527_v37 = vor.u32 %v641_v31, %v526_v30  ;;  %v491_v38 = vor.u32 %v630_v32, %v488_v33  ;;  %v494_v40 = vld [vmem:[%s1016_s0 + $0x20] sm:$0xf] }
   0xc   :  { %v539_v39 = vor.u32 %v642_v34, %v536_v35  ;;  %v633_v41 = vld [vmem:[%s1016_s0 + $0x24] sm:$0xf0]  ;;  %v534_v42 = vld [vmem:[%s1016_s0 + $0x70] sm:$0xf]  ;;  %v643_v43 = vld [vmem:[%s1016_s0 + $0x74] sm:$0xf0] }
   0xd   :  { %v632_v44 = vld [vmem:[%s1016_s0 + $0x24] sm:$0xf]  ;;  %v496_v45 = vld [vmem:[%s1016_s0 + $0x28] sm:$0xf0]  ;;  %v495_v48 = vor.u32 %v633_v41, %v494_v40  ;;  %v535_v49 = vor.u32 %v643_v43, %v534_v42  ;;  %v502_v52 = vld [vmem:[%s1016_s0 + $0x30] sm:$0xf] }
   0xe   :  { %281 = vmatpush.bf16.msra.mxu0 %v654_v6  ;;  %734 = vmatpush.bf16.msra.mxu2 %v654_v6  ;;  %v644_v46 = vld [vmem:[%s1016_s0 + $0x84] sm:$0xf]  ;;  %v544_v47 = vld [vmem:[%s1016_s0 + $0x88] sm:$0xf0]  ;;  %v499_v50 = vor.u32 %v632_v44, %v496_v45  ;;  %v635_v53 = vld [vmem:[%s1016_s0 + $0x34] sm:$0xf0] }
   0xf   :  { %345 = vmatpush.bf16.msra.mxu1 %v662_v7  ;;  %742 = vmatpush.bf16.msra.mxu3 %v662_v7  ;;  %v547_v51 = vor.u32 %v644_v46, %v544_v47  ;;  %v542_v54 = vld [vmem:[%s1016_s0 + $0x80] sm:$0xf]  ;;  %v645_v55 = vld [vmem:[%s1016_s0 + $0x84] sm:$0xf0]  ;;  %v634_v56 = vld [vmem:[%s1016_s0 + $0x34] sm:$0xf]  ;;  %v503_v60 = vor.u32 %v635_v53, %v502_v52 }
  0x10   :  { %v504_v57 = vld [vmem:[%s1016_s0 + $0x38] sm:$0xf0]  ;;  %v646_v58 = vld [vmem:[%s1016_s0 + $0x94] sm:$0xf]  ;;  %v543_v61 = vor.u32 %v645_v55, %v542_v54  ;;  %v510_v0 = vld [vmem:[%s1016_s0 + $0x40] sm:$0xf] }
  0x11   :  { %v552_v59 = vld [vmem:[%s1016_s0 + $0x98] sm:$0xf0]  ;;  %v507_v62 = vor.u32 %v634_v56, %v504_v57  ;;  %v637_v1 = vld [vmem:[%s1016_s0 + $0x44] sm:$0xf0]  ;;  %v550_v2 = vld [vmem:[%s1016_s0 + $0x90] sm:$0xf] }
  0x12   :  { %282 = vmatpush.bf16.msra.mxu0 %v653_v8  ;;  %735 = vmatpush.bf16.msra.mxu2 %v653_v8  ;;  %v555_v63 = vor.u32 %v646_v58, %v552_v59  ;;  %v647_v3 = vld [vmem:[%s1016_s0 + $0x94] sm:$0xf0]  ;;  %v636_v4 = vld [vmem:[%s1016_s0 + $0x44] sm:$0xf]  ;;  %v512_v5 = vld [vmem:[%s1016_s0 + $0x48] sm:$0xf0]  ;;  %v511_v8 = vor.u32 %v637_v1, %v510_v0 }
  0x13   :  { %346 = vmatpush.bf16.msra.mxu1 %v661_v9  ;;  %743 = vmatpush.bf16.msra.mxu3 %v661_v9  ;;  %v648_v6 = vld [vmem:[%s1016_s0 + $0xa4] sm:$0xf]  ;;  %v560_v7 = vld [vmem:[%s1016_s0 + $0xa8] sm:$0xf0]  ;;  %v551_v9 = vor.u32 %v647_v3, %v550_v2  ;;  %v951_v19 = vld [vmem:[%s1015_s2] ss:$0 sm:$0xff] }
  0x16   :  { %283 = vmatpush.bf16.msra.mxu0 %v652_v10  ;;  %736 = vmatpush.bf16.msra.mxu2 %v652_v10  ;;  %v515_v10 = vor.u32 %v636_v4, %v512_v5 }
  0x17   :  { %347 = vmatpush.bf16.msra.mxu1 %v660_v11  ;;  %744 = vmatpush.bf16.msra.mxu3 %v660_v11  ;;  %v563_v11 = vor.u32 %v648_v6, %v560_v7 }
  0x1a   :  { %284 = vmatpush.bf16.msra.mxu0 %v651_v12  ;;  %737 = vmatpush.bf16.msra.mxu2 %v651_v12  ;;  %v558_v12 = vld [vmem:[%s1016_s0 + $0xa0] sm:$0xf] }
  0x1b   :  { %348 = vmatpush.bf16.msra.mxu1 %v659_v13  ;;  %745 = vmatpush.bf16.msra.mxu3 %v659_v13  ;;  %v649_v13 = vld [vmem:[%s1016_s0 + $0xa4] sm:$0xf0] }
  0x1c   :  { %v559_v16 = vor.u32 %v649_v13, %v558_v12 }
  0x1e   :  { %285 = vmatpush.bf16.msra.mxu0 %v650_v14  ;;  %738 = vmatpush.bf16.msra.mxu2 %v650_v14  ;;  %v638_v14 = vld [vmem:[%s1016_s0 + $0x54] sm:$0xf] }
  0x1f   :  { %349 = vmatpush.bf16.msra.mxu1 %v658_v15  ;;  %746 = vmatpush.bf16.msra.mxu3 %v658_v15  ;;  %v520_v15 = vld [vmem:[%s1016_s0 + $0x58] sm:$0xf0] }
  0x20   :  { %v523_v17 = vor.u32 %v638_v14, %v520_v15 }
  0x21   :  { %286 = vmatmul.bf16.vlgmr.msra.gmra.mxu0 %v479_v24  ;;  %311 = vmatmul.bf16.vlgmr.msra.gmra.mxu2 %v519_v25 }
  0x22   :  { %350 = vmatmul.bf16.vlgmr.msra.gmra.mxu1 %v483_v26  ;;  %380 = vmatmul.bf16.vlgmr.msra.gmra.mxu3 %v531_v27 }
  0x31   :  { %291 = vmatmul.bf16.gmra.mxu0 %v487_v36  ;;  %316 = vmatmul.bf16.gmra.mxu2 %v527_v37 }
  0x32   :  { %355 = vmatmul.bf16.gmra.mxu1 %v491_v38  ;;  %385 = vmatmul.bf16.gmra.mxu3 %v539_v39 }
  0x41   :  { %296 = vmatmul.bf16.gmra.mxu0 %v495_v48  ;;  %321 = vmatmul.bf16.gmra.mxu2 %v535_v49 }
  0x42   :  { %360 = vmatmul.bf16.gmra.mxu1 %v499_v50  ;;  %390 = vmatmul.bf16.gmra.mxu3 %v547_v51 }
  0x51   :  { %301 = vmatmul.bf16.gmra.mxu0 %v503_v60  ;;  %326 = vmatmul.bf16.gmra.mxu2 %v543_v61 }
  0x52   :  { %365 = vmatmul.bf16.gmra.mxu1 %v507_v62  ;;  %395 = vmatmul.bf16.gmra.mxu3 %v555_v63 }
  0x61   :  { %306 = vmatmul.bf16.gmra.mxu0 %v511_v8  ;;  %331 = vmatmul.bf16.gmra.mxu2 %v551_v9 }
  0x62   :  { %370 = vmatmul.bf16.gmra.mxu1 %v515_v10  ;;  %400 = vmatmul.bf16.gmra.mxu3 %v563_v11 }
  0x71   :  { %336 = vmatmul.bf16.gmra.mxu2 %v559_v16 }
  0x72   :  { %375 = vmatmul.bf16.gmra.mxu1 %v523_v17 }
  0x9e   :  { %v287_v18 = vpop.f32.mrf.mxu0 }
  0x9f   :  { %v351_v20 = vpop.f32.mrf.mxu1  ;;  %v288_v21 = vadd.f32 %v951_v19, %v287_v18 }
  0xa1   :  { %v352_v25 = vadd.f32 %v351_v20, %v288_v21 }
  0xa3   :  { %v406_v29 = vmax.f32 %v352_v25, 0.0 }
  0xa4   :  { %v954_v22 = vpop.f32.mrf.mxu2 }
  0xa5   :  { %v381_v23 = vpop.f32.mrf.mxu3 }
  0xa6   :  { %v289_v24 = vpop.f32.mrf.mxu0 }
  0xa7   :  { %v290_v26 = vadd.f32 %v951_v19, %v289_v24  ;;  %v353_v27 = vpop.f32.mrf.mxu1 }
  0xa9   :  { %v354_v28 = vadd.f32 %v353_v27, %v290_v26 }
  0xab   :  { %v407_v30 = vmax.f32 %v354_v28, 0.0 }
  0xac   :  { %v957_v31 = vpop.f32.mrf.mxu2 }
  0xad   :  { %v669_v32 = vpack.c.bf16 %v407_v30, %v406_v29  ;;  %v383_v34 = vpop.f32.mrf.mxu3 }
  0xae   :  { %v292_v33 = vpop.f32.mrf.mxu0 }
  0xaf   :  { %670 = vst [vmem:[%s1017_s3] sm:$0xff] %v669_v32   ;;  %v356_v35 = vpop.f32.mrf.mxu1  ;;  %v293_v36 = vadd.f32 %v951_v19, %v292_v33 }
  0xb1   :  { %v357_v39 = vadd.f32 %v356_v35, %v293_v36 }
  0xb3   :  { %v408_v45 = vmax.f32 %v357_v39, 0.0 }
  0xb4   :  { %v317_v37 = vpop.f32.mrf.mxu2 }
  0xb5   :  { %v386_v42 = vpop.f32.mrf.mxu3  ;;  %v318_v43 = vadd.f32 %v951_v19, %v317_v37 }
  0xb6   :  { %v294_v38 = vpop.f32.mrf.mxu0 }
  0xb7   :  { %v295_v40 = vadd.f32 %v951_v19, %v294_v38  ;;  %v358_v41 = vpop.f32.mrf.mxu1  ;;  %v382_v48 = vadd.f32 %v381_v23, %v318_v43 }
  0xb9   :  { %v359_v44 = vadd.f32 %v358_v41, %v295_v40  ;;  %v418_v54 = vmax.f32 %v382_v48, 0.0 }
  0xbb   :  { %v409_v46 = vmax.f32 %v359_v44, 0.0 }
  0xbc   :  { %v319_v47 = vpop.f32.mrf.mxu2 }
  0xbd   :  { %v674_v49 = vpack.c.bf16 %v409_v46, %v408_v45  ;;  %v320_v50 = vadd.f32 %v951_v19, %v319_v47  ;;  %v388_v56 = vpop.f32.mrf.mxu3 }
  0xbe   :  { %v297_v51 = vpop.f32.mrf.mxu0 }
  0xbf   :  { %721 = vst [vmem:[%s1017_s3 + $0x8] sm:$0xff] %v674_v49   ;;  %v384_v52 = vadd.f32 %v383_v34, %v320_v50  ;;  %v361_v53 = vpop.f32.mrf.mxu1  ;;  %v298_v58 = vadd.f32 %v951_v19, %v297_v51 }
  0xc1   :  { %v419_v55 = vmax.f32 %v384_v52, 0.0  ;;  %v362_v61 = vadd.f32 %v361_v53, %v298_v58 }
  0xc3   :  { %v699_v57 = vpack.c.bf16 %v419_v55, %v418_v54  ;;  %v410_v2 = vmax.f32 %v362_v61, 0.0 }
  0xc4   :  { %v322_v59 = vpop.f32.mrf.mxu2 }
  0xc5   :  { %726 = vst [vmem:[%s1017_s3 + $0x30] sm:$0xff] %v699_v57   ;;  %v323_v0 = vadd.f32 %v951_v19, %v322_v59  ;;  %v391_v5 = vpop.f32.mrf.mxu3 }
  0xc6   :  { %v299_v60 = vpop.f32.mrf.mxu0 }
  0xc7   :  { %v300_v62 = vadd.f32 %v951_v19, %v299_v60  ;;  %v363_v63 = vpop.f32.mrf.mxu1  ;;  %v387_v6 = vadd.f32 %v386_v42, %v323_v0  ;;  %v313_v60 = vadd.f32 %v951_v19, %v954_v22 }
  0xc9   :  { %v364_v1 = vadd.f32 %v363_v63, %v300_v62  ;;  %v420_v12 = vmax.f32 %v387_v6, 0.0  ;;  %v315_v63 = vadd.f32 %v951_v19, %v957_v31 }
  0xcb   :  { %v411_v3 = vmax.f32 %v364_v1, 0.0 }
  0xcc   :  { %v324_v4 = vpop.f32.mrf.mxu2 }
  0xcd   :  { %v679_v7 = vpack.c.bf16 %v411_v3, %v410_v2  ;;  %v325_v8 = vadd.f32 %v951_v19, %v324_v4  ;;  %v393_v18 = vpop.f32.mrf.mxu3 }
  0xce   :  { %v302_v9 = vpop.f32.mrf.mxu0 }
  0xcf   :  { %722 = vst [vmem:[%s1017_s3 + $0x10] sm:$0xff] %v679_v7   ;;  %v389_v10 = vadd.f32 %v388_v56, %v325_v8  ;;  %v366_v11 = vpop.f32.mrf.mxu1  ;;  %v303_v15 = vadd.f32 %v951_v19, %v302_v9 }
  0xd1   :  { %v421_v13 = vmax.f32 %v389_v10, 0.0  ;;  %v367_v20 = vadd.f32 %v366_v11, %v303_v15 }
  0xd3   :  { %v704_v14 = vpack.c.bf16 %v421_v13, %v420_v12  ;;  %v412_v26 = vmax.f32 %v367_v20, 0.0 }
  0xd4   :  { %v327_v16 = vpop.f32.mrf.mxu2 }
  0xd5   :  { %727 = vst [vmem:[%s1017_s3 + $0x38] sm:$0xff] %v704_v14   ;;  %v328_v24 = vadd.f32 %v951_v19, %v327_v16  ;;  %v396_v36 = vpop.f32.mrf.mxu3 }
  0xd6   :  { %v304_v17 = vpop.f32.mrf.mxu0 }
  0xd7   :  { %v305_v21 = vadd.f32 %v951_v19, %v304_v17  ;;  %v368_v23 = vpop.f32.mrf.mxu1  ;;  %v392_v29 = vadd.f32 %v391_v5, %v328_v24 }
  0xd9   :  { %v369_v25 = vadd.f32 %v368_v23, %v305_v21  ;;  %v422_v37 = vmax.f32 %v392_v29, 0.0 }
  0xdb   :  { %v413_v27 = vmax.f32 %v369_v25, 0.0 }
  0xdc   :  { %v329_v28 = vpop.f32.mrf.mxu2 }
  0xdd   :  { %v684_v30 = vpack.c.bf16 %v413_v27, %v412_v26  ;;  %v330_v32 = vadd.f32 %v951_v19, %v329_v28  ;;  %v398_v48 = vpop.f32.mrf.mxu3 }
  0xde   :  { %v307_v33 = vpop.f32.mrf.mxu0 }
  0xdf   :  { %723 = vst [vmem:[%s1017_s3 + $0x18] sm:$0xff] %v684_v30   ;;  %v394_v34 = vadd.f32 %v393_v18, %v330_v32  ;;  %v371_v35 = vpop.f32.mrf.mxu1  ;;  %v308_v40 = vadd.f32 %v951_v19, %v307_v33 }
  0xe1   :  { %v423_v38 = vmax.f32 %v394_v34, 0.0  ;;  %v372_v43 = vadd.f32 %v371_v35, %v308_v40 }
  0xe3   :  { %v709_v39 = vpack.c.bf16 %v423_v38, %v422_v37  ;;  %v414_v49 = vmax.f32 %v372_v43, 0.0 }
  0xe4   :  { %v332_v41 = vpop.f32.mrf.mxu2 }
  0xe5   :  { %728 = vst [vmem:[%s1017_s3 + $0x40] sm:$0xff] %v709_v39   ;;  %v333_v46 = vadd.f32 %v951_v19, %v332_v41  ;;  %v401_v61 = vpop.f32.mrf.mxu3 }
  0xe6   :  { %v309_v42 = vpop.f32.mrf.mxu0 }
  0xe7   :  { %v310_v44 = vadd.f32 %v951_v19, %v309_v42  ;;  %v373_v45 = vpop.f32.mrf.mxu1  ;;  %v397_v52 = vadd.f32 %v396_v36, %v333_v46 }
  0xe9   :  { %v374_v47 = vadd.f32 %v373_v45, %v310_v44  ;;  %v424_v57 = vmax.f32 %v397_v52, 0.0 }
  0xeb   :  { %v415_v50 = vmax.f32 %v374_v47, 0.0 }
  0xec   :  { %v334_v51 = vpop.f32.mrf.mxu2 }
  0xed   :  { %v689_v53 = vpack.c.bf16 %v415_v50, %v414_v49  ;;  %v335_v54 = vadd.f32 %v951_v19, %v334_v51  ;;  %v403_v9 = vpop.f32.mrf.mxu3 }
  0xef   :  { %724 = vst [vmem:[%s1017_s3 + $0x20] sm:$0xff] %v689_v53   ;;  %v399_v55 = vadd.f32 %v398_v48, %v335_v54  ;;  %v376_v56 = vpop.f32.mrf.mxu1 }
  0xf0   :  { %v377_v0 = vadd.f32 %v376_v56, %v313_v60 }
  0xf1   :  { %v425_v58 = vmax.f32 %v399_v55, 0.0 }
  0xf2   :  { %v416_v4 = vmax.f32 %v377_v0, 0.0 }
  0xf3   :  { %v714_v59 = vpack.c.bf16 %v425_v58, %v424_v57 }
  0xf4   :  { %v337_v62 = vpop.f32.mrf.mxu2 }
  0xf5   :  { %729 = vst [vmem:[%s1017_s3 + $0x48] sm:$0xff] %v714_v59   ;;  %v338_v3 = vadd.f32 %v951_v19, %v337_v62 }
  0xf7   :  { %v378_v1 = vpop.f32.mrf.mxu1  ;;  %v402_v8 = vadd.f32 %v401_v61, %v338_v3 }
  0xf8   :  { %v379_v2 = vadd.f32 %v378_v1, %v315_v63 }
  0xf9   :  { %v426_v11 = vmax.f32 %v402_v8, 0.0 }
  0xfa   :  { %v417_v5 = vmax.f32 %v379_v2, 0.0 }
  0xfc   :  { %v694_v6 = vpack.c.bf16 %v417_v5, %v416_v4  ;;  %v339_v7 = vpop.f32.mrf.mxu2 }
  0xfd   :  { %v340_v22 = vadd.f32 %v951_v19, %v339_v7 }
  0xfe   :  { %725 = vst [vmem:[%s1017_s3 + $0x28] sm:$0xff] %v694_v6  }
  0xff   :  { %v404_v10 = vadd.f32 %v403_v9, %v340_v22 }
 0x101   :  { %v427_v31 = vmax.f32 %v404_v10, 0.0 }
 0x103   :  { %v719_v12 = vpack.c.bf16 %v427_v31, %v426_v11 }
 0x105   :  { %730 = vst [vmem:[%s1017_s3 + $0x50] sm:$0xff] %v719_v12  }

// kernel: simpleconv64d_forward.8
= control target key start
LH: loop header
LB: loop body
LE: loop exit
PB: predicated region body
PF: predicated region fallthrough
CT: control target
= control target key end

     0   :  { %s1614_s1 = inlined_call_operand.vmem [shape: bf16[128,128], index: 1, kind: input, shape index: {}]   ;;  %s1615_s0 = inlined_call_operand.vmem [shape: bf16[592,128], index: 0, kind: input, shape index: {}]   ;;  %s1616_s2 = inlined_call_operand.vmem [shape: f32[1,128], index: 2, kind: input, shape index: {}]   ;;  %s1617_s3 = inlined_call_operand.vmem [shape: bf16[592,128], index: 3, kind: output, shape index: {}]  }
   0x1   :  { %v1022_v0 = vld [vmem:[%s1614_s1 + $0x38] sm:$0xff]  ;;  %v1021_v1 = vld [vmem:[%s1614_s1 + $0x30] sm:$0xff]  ;;  %v1020_v2 = vld [vmem:[%s1614_s1 + $0x28] sm:$0xff] }
   0x2   :  { %1245 = vmatpush.bf16.msra.mxu2 %v1022_v0  ;;  %1246 = vmatpush.bf16.msra.mxu3 %v1022_v0  ;;  %v1019_v3 = vld [vmem:[%s1614_s1 + $0x20] sm:$0xff]  ;;  %v1018_v4 = vld [vmem:[%s1614_s1 + $0x18] sm:$0xff]  ;;  %v1017_v5 = vld [vmem:[%s1614_s1 + $0x10] sm:$0xff] }
   0x3   :  { %378 = vmatpush.bf16.msra.mxu0 %v1022_v0  ;;  %1244 = vmatpush.bf16.msra.mxu1 %v1022_v0  ;;  %v1016_v6 = vld [vmem:[%s1614_s1 + $0x8] sm:$0xff]  ;;  %v1015_v7 = vld [vmem:[%s1614_s1] sm:$0xff]  ;;  %v996_v8 = vld [vmem:[%s1615_s0 + $0x90] sm:$0xff] }
   0x4   :  { %v1006_v9 = vld [vmem:[%s1615_s0 + $0xe0] sm:$0xff]  ;;  %v987_v11 = vld [vmem:[%s1615_s0 + $0x48] sm:$0xff]  ;;  %v997_v12 = vld [vmem:[%s1615_s0 + $0x98] sm:$0xff] }
   0x5   :  { %v978_v10 = vld [vmem:[%s1615_s0] sm:$0xff]  ;;  %v1007_v13 = vld [vmem:[%s1615_s0 + $0xe8] sm:$0xff]  ;;  %v988_v15 = vld [vmem:[%s1615_s0 + $0x50] sm:$0xff] }
   0x6   :  { %1248 = vmatpush.bf16.msra.mxu2 %v1021_v1  ;;  %1249 = vmatpush.bf16.msra.mxu3 %v1021_v1  ;;  %v979_v14 = vld [vmem:[%s1615_s0 + $0x8] sm:$0xff]  ;;  %v998_v16 = vld [vmem:[%s1615_s0 + $0xa0] sm:$0xff]  ;;  %v1008_v17 = vld [vmem:[%s1615_s0 + $0xf0] sm:$0xff] }
   0x7   :  { %379 = vmatpush.bf16.msra.mxu0 %v1021_v1  ;;  %1247 = vmatpush.bf16.msra.mxu1 %v1021_v1  ;;  %v980_v18 = vld [vmem:[%s1615_s0 + $0x10] sm:$0xff]  ;;  %v989_v19 = vld [vmem:[%s1615_s0 + $0x58] sm:$0xff]  ;;  %v999_v20 = vld [vmem:[%s1615_s0 + $0xa8] sm:$0xff] }
   0x8   :  { %v1009_v21 = vld [vmem:[%s1615_s0 + $0xf8] sm:$0xff]  ;;  %v990_v23 = vld [vmem:[%s1615_s0 + $0x60] sm:$0xff]  ;;  %v1000_v24 = vld [vmem:[%s1615_s0 + $0xb0] sm:$0xff] }
   0x9   :  { %v981_v22 = vld [vmem:[%s1615_s0 + $0x18] sm:$0xff]  ;;  %v1010_v25 = vld [vmem:[%s1615_s0 + $0x100] sm:$0xff]  ;;  %v991_v27 = vld [vmem:[%s1615_s0 + $0x68] sm:$0xff] }
   0xa   :  { %1251 = vmatpush.bf16.msra.mxu2 %v1020_v2  ;;  %1252 = vmatpush.bf16.msra.mxu3 %v1020_v2  ;;  %v982_v26 = vld [vmem:[%s1615_s0 + $0x20] sm:$0xff]  ;;  %v1001_v28 = vld [vmem:[%s1615_s0 + $0xb8] sm:$0xff]  ;;  %v1011_v29 = vld [vmem:[%s1615_s0 + $0x108] sm:$0xff] }
   0xb   :  { %380 = vmatpush.bf16.msra.mxu0 %v1020_v2  ;;  %1250 = vmatpush.bf16.msra.mxu1 %v1020_v2  ;;  %v983_v30 = vld [vmem:[%s1615_s0 + $0x28] sm:$0xff]  ;;  %v992_v31 = vld [vmem:[%s1615_s0 + $0x70] sm:$0xff]  ;;  %v1002_v32 = vld [vmem:[%s1615_s0 + $0xc0] sm:$0xff] }
   0xc   :  { %v1012_v33 = vld [vmem:[%s1615_s0 + $0x110] sm:$0xff]  ;;  %v993_v35 = vld [vmem:[%s1615_s0 + $0x78] sm:$0xff]  ;;  %v1003_v36 = vld [vmem:[%s1615_s0 + $0xc8] sm:$0xff] }
   0xd   :  { %v984_v34 = vld [vmem:[%s1615_s0 + $0x30] sm:$0xff]  ;;  %v1013_v37 = vld [vmem:[%s1615_s0 + $0x118] sm:$0xff]  ;;  %v994_v39 = vld [vmem:[%s1615_s0 + $0x80] sm:$0xff] }
   0xe   :  { %1254 = vmatpush.bf16.msra.mxu2 %v1019_v3  ;;  %1255 = vmatpush.bf16.msra.mxu3 %v1019_v3  ;;  %v985_v38 = vld [vmem:[%s1615_s0 + $0x38] sm:$0xff]  ;;  %v1004_v40 = vld [vmem:[%s1615_s0 + $0xd0] sm:$0xff]  ;;  %v1014_v41 = vld [vmem:[%s1615_s0 + $0x120] sm:$0xff] }
   0xf   :  { %381 = vmatpush.bf16.msra.mxu0 %v1019_v3  ;;  %1253 = vmatpush.bf16.msra.mxu1 %v1019_v3  ;;  %v986_v42 = vld [vmem:[%s1615_s0 + $0x40] sm:$0xff]  ;;  %v995_v43 = vld [vmem:[%s1615_s0 + $0x88] sm:$0xff]  ;;  %v1005_v3 = vld [vmem:[%s1615_s0 + $0xd8] sm:$0xff] }
  0x10   :  { %v1424_v46 = vld [vmem:[%s1616_s2] ss:$0 sm:$0xff] }
  0x12   :  { %1257 = vmatpush.bf16.msra.mxu2 %v1018_v4  ;;  %1258 = vmatpush.bf16.msra.mxu3 %v1018_v4 }
  0x13   :  { %382 = vmatpush.bf16.msra.mxu0 %v1018_v4  ;;  %1256 = vmatpush.bf16.msra.mxu1 %v1018_v4 }
  0x16   :  { %1260 = vmatpush.bf16.msra.mxu2 %v1017_v5  ;;  %1261 = vmatpush.bf16.msra.mxu3 %v1017_v5 }
  0x17   :  { %383 = vmatpush.bf16.msra.mxu0 %v1017_v5  ;;  %1259 = vmatpush.bf16.msra.mxu1 %v1017_v5 }
  0x1a   :  { %1263 = vmatpush.bf16.msra.mxu2 %v1016_v6  ;;  %1264 = vmatpush.bf16.msra.mxu3 %v1016_v6 }
  0x1b   :  { %384 = vmatpush.bf16.msra.mxu0 %v1016_v6  ;;  %1262 = vmatpush.bf16.msra.mxu1 %v1016_v6 }
  0x1e   :  { %1266 = vmatpush.bf16.msra.mxu2 %v1015_v7  ;;  %1267 = vmatpush.bf16.msra.mxu3 %v1015_v7 }
  0x1f   :  { %385 = vmatpush.bf16.msra.mxu0 %v1015_v7  ;;  %1265 = vmatpush.bf16.msra.mxu1 %v1015_v7 }
  0x21   :  { %476 = vmatmul.bf16.vlgmr.msra.gmra.mxu2 %v996_v8  ;;  %526 = vmatmul.bf16.vlgmr.msra.gmra.mxu3 %v1006_v9 }
  0x22   :  { %386 = vmatmul.bf16.vlgmr.msra.gmra.mxu0 %v978_v10  ;;  %431 = vmatmul.bf16.vlgmr.msra.gmra.mxu1 %v987_v11 }
  0x31   :  { %481 = vmatmul.bf16.gmra.mxu2 %v997_v12  ;;  %531 = vmatmul.bf16.gmra.mxu3 %v1007_v13 }
  0x32   :  { %391 = vmatmul.bf16.gmra.mxu0 %v979_v14  ;;  %436 = vmatmul.bf16.gmra.mxu1 %v988_v15 }
  0x41   :  { %486 = vmatmul.bf16.gmra.mxu2 %v998_v16  ;;  %536 = vmatmul.bf16.gmra.mxu3 %v1008_v17 }
  0x42   :  { %396 = vmatmul.bf16.gmra.mxu0 %v980_v18  ;;  %441 = vmatmul.bf16.gmra.mxu1 %v989_v19 }
  0x51   :  { %491 = vmatmul.bf16.gmra.mxu2 %v999_v20  ;;  %541 = vmatmul.bf16.gmra.mxu3 %v1009_v21 }
  0x52   :  { %401 = vmatmul.bf16.gmra.mxu0 %v981_v22  ;;  %446 = vmatmul.bf16.gmra.mxu1 %v990_v23 }
  0x61   :  { %496 = vmatmul.bf16.gmra.mxu2 %v1000_v24  ;;  %546 = vmatmul.bf16.gmra.mxu3 %v1010_v25 }
  0x62   :  { %406 = vmatmul.bf16.gmra.mxu0 %v982_v26  ;;  %451 = vmatmul.bf16.gmra.mxu1 %v991_v27 }
  0x71   :  { %501 = vmatmul.bf16.gmra.mxu2 %v1001_v28  ;;  %551 = vmatmul.bf16.gmra.mxu3 %v1011_v29 }
  0x72   :  { %411 = vmatmul.bf16.gmra.mxu0 %v983_v30  ;;  %456 = vmatmul.bf16.gmra.mxu1 %v992_v31 }
  0x81   :  { %506 = vmatmul.bf16.gmra.mxu2 %v1002_v32  ;;  %556 = vmatmul.bf16.gmra.mxu3 %v1012_v33 }
  0x82   :  { %416 = vmatmul.bf16.gmra.mxu0 %v984_v34  ;;  %461 = vmatmul.bf16.gmra.mxu1 %v993_v35 }
  0x91   :  { %511 = vmatmul.bf16.gmra.mxu2 %v1003_v36  ;;  %561 = vmatmul.bf16.gmra.mxu3 %v1013_v37 }
  0x92   :  { %421 = vmatmul.bf16.gmra.mxu0 %v985_v38  ;;  %466 = vmatmul.bf16.gmra.mxu1 %v994_v39 }
  0x9f   :  { %v387_v44 = vpop.f32.mrf.mxu0  ;;  %v432_v45 = vpop.f32.mrf.mxu1 }
  0xa0   :  { %v388_v48 = vadd.f32 %v1424_v46, %v387_v44  ;;  %v433_v49 = vadd.f32 %v1424_v46, %v432_v45 }
  0xa1   :  { %516 = vmatmul.bf16.gmra.mxu2 %v1004_v40  ;;  %566 = vmatmul.bf16.gmra.mxu3 %v1014_v41 }
  0xa2   :  { %426 = vmatmul.bf16.gmra.mxu0 %v986_v42  ;;  %471 = vmatmul.bf16.gmra.mxu1 %v995_v43  ;;  %v572_v53 = vmax.f32 %v388_v48, 0.0  ;;  %v590_v54 = vmax.f32 %v433_v49, 0.0 }
  0xa4   :  { %v477_v47 = vpop.f32.mrf.mxu2  ;;  %v527_v50 = vpop.f32.mrf.mxu3 }
  0xa5   :  { %v528_v57 = vadd.f32 %v1424_v46, %v527_v50  ;;  %v478_v60 = vadd.f32 %v1424_v46, %v477_v47 }
  0xa7   :  { %v389_v51 = vpop.f32.mrf.mxu0  ;;  %v434_v52 = vpop.f32.mrf.mxu1  ;;  %v628_v2 = vmax.f32 %v528_v57, 0.0  ;;  %v608_v5 = vmax.f32 %v478_v60, 0.0 }
  0xa8   :  { %v390_v55 = vadd.f32 %v1424_v46, %v389_v51  ;;  %v435_v56 = vadd.f32 %v1424_v46, %v434_v52 }
  0xaa   :  { %v573_v58 = vmax.f32 %v390_v55, 0.0  ;;  %v591_v59 = vmax.f32 %v435_v56, 0.0 }
  0xac   :  { %v479_v61 = vpop.f32.mrf.mxu2  ;;  %v1026_v62 = vpack.c.bf16 %v573_v58, %v572_v53  ;;  %v1071_v63 = vpack.c.bf16 %v591_v59, %v590_v54  ;;  %v529_v0 = vpop.f32.mrf.mxu3 }
  0xad   :  { %v480_v1 = vadd.f32 %v1424_v46, %v479_v61  ;;  %v530_v4 = vadd.f32 %v1424_v46, %v529_v0 }
  0xae   :  { %1027 = vst [vmem:[%s1617_s3] sm:$0xff] %v1026_v62  }
  0xaf   :  { %v609_v6 = vmax.f32 %v480_v1, 0.0  ;;  %1216 = vst [vmem:[%s1617_s3 + $0x48] sm:$0xff] %v1071_v63   ;;  %v629_v7 = vmax.f32 %v530_v4, 0.0  ;;  %v392_v8 = vpop.f32.mrf.mxu0  ;;  %v437_v9 = vpop.f32.mrf.mxu1 }
  0xb0   :  { %v393_v13 = vadd.f32 %v1424_v46, %v392_v8  ;;  %v438_v14 = vadd.f32 %v1424_v46, %v437_v9 }
  0xb1   :  { %v1116_v10 = vpack.c.bf16 %v609_v6, %v608_v5  ;;  %521 = vmatmul.bf16.gmra.mxu2 %v1005_v3  ;;  %v1166_v11 = vpack.c.bf16 %v629_v7, %v628_v2 }
  0xb2   :  { %v574_v18 = vmax.f32 %v393_v13, 0.0  ;;  %v592_v19 = vmax.f32 %v438_v14, 0.0 }
  0xb3   :  { %1225 = vst [vmem:[%s1617_s3 + $0x90] sm:$0xff] %v1116_v10  }
  0xb4   :  { %v482_v12 = vpop.f32.mrf.mxu2  ;;  %1235 = vst [vmem:[%s1617_s3 + $0xe0] sm:$0xff] %v1166_v11   ;;  %v532_v15 = vpop.f32.mrf.mxu3 }
  0xb5   :  { %v533_v22 = vadd.f32 %v1424_v46, %v532_v15  ;;  %v483_v25 = vadd.f32 %v1424_v46, %v482_v12 }
  0xb7   :  { %v394_v16 = vpop.f32.mrf.mxu0  ;;  %v439_v17 = vpop.f32.mrf.mxu1  ;;  %v630_v31 = vmax.f32 %v533_v22, 0.0  ;;  %v610_v33 = vmax.f32 %v483_v25, 0.0 }
  0xb8   :  { %v395_v20 = vadd.f32 %v1424_v46, %v394_v16  ;;  %v440_v21 = vadd.f32 %v1424_v46, %v439_v17 }
  0xba   :  { %v575_v23 = vmax.f32 %v395_v20, 0.0  ;;  %v593_v24 = vmax.f32 %v440_v21, 0.0 }
  0xbc   :  { %v484_v26 = vpop.f32.mrf.mxu2  ;;  %v1031_v27 = vpack.c.bf16 %v575_v23, %v574_v18  ;;  %v1076_v28 = vpack.c.bf16 %v593_v24, %v592_v19  ;;  %v534_v29 = vpop.f32.mrf.mxu3 }
  0xbd   :  { %v485_v30 = vadd.f32 %v1424_v46, %v484_v26  ;;  %v535_v32 = vadd.f32 %v1424_v46, %v534_v29 }
  0xbe   :  { %1208 = vst [vmem:[%s1617_s3 + $0x8] sm:$0xff] %v1031_v27  }
  0xbf   :  { %v611_v34 = vmax.f32 %v485_v30, 0.0  ;;  %1217 = vst [vmem:[%s1617_s3 + $0x50] sm:$0xff] %v1076_v28   ;;  %v631_v35 = vmax.f32 %v535_v32, 0.0  ;;  %v397_v36 = vpop.f32.mrf.mxu0  ;;  %v442_v37 = vpop.f32.mrf.mxu1 }
  0xc0   :  { %v398_v41 = vadd.f32 %v1424_v46, %v397_v36  ;;  %v443_v42 = vadd.f32 %v1424_v46, %v442_v37 }
  0xc1   :  { %v1121_v38 = vpack.c.bf16 %v611_v34, %v610_v33  ;;  %v1171_v39 = vpack.c.bf16 %v631_v35, %v630_v31 }
  0xc2   :  { %v576_v47 = vmax.f32 %v398_v41, 0.0  ;;  %v594_v48 = vmax.f32 %v443_v42, 0.0 }
  0xc3   :  { %1226 = vst [vmem:[%s1617_s3 + $0x98] sm:$0xff] %v1121_v38  }
  0xc4   :  { %v487_v40 = vpop.f32.mrf.mxu2  ;;  %1236 = vst [vmem:[%s1617_s3 + $0xe8] sm:$0xff] %v1171_v39   ;;  %v537_v43 = vpop.f32.mrf.mxu3 }
  0xc5   :  { %v538_v51 = vadd.f32 %v1424_v46, %v537_v43  ;;  %v488_v54 = vadd.f32 %v1424_v46, %v487_v40 }
  0xc7   :  { %v399_v44 = vpop.f32.mrf.mxu0  ;;  %v444_v45 = vpop.f32.mrf.mxu1  ;;  %v632_v60 = vmax.f32 %v538_v51, 0.0  ;;  %v612_v62 = vmax.f32 %v488_v54, 0.0 }
  0xc8   :  { %v400_v49 = vadd.f32 %v1424_v46, %v399_v44  ;;  %v445_v50 = vadd.f32 %v1424_v46, %v444_v45 }
  0xca   :  { %v577_v52 = vmax.f32 %v400_v49, 0.0  ;;  %v595_v53 = vmax.f32 %v445_v50, 0.0 }
  0xcc   :  { %v489_v55 = vpop.f32.mrf.mxu2  ;;  %v1036_v56 = vpack.c.bf16 %v577_v52, %v576_v47  ;;  %v1081_v57 = vpack.c.bf16 %v595_v53, %v594_v48  ;;  %v539_v58 = vpop.f32.mrf.mxu3 }
  0xcd   :  { %v490_v59 = vadd.f32 %v1424_v46, %v489_v55  ;;  %v540_v61 = vadd.f32 %v1424_v46, %v539_v58 }
  0xce   :  { %1209 = vst [vmem:[%s1617_s3 + $0x10] sm:$0xff] %v1036_v56  }
  0xcf   :  { %v613_v63 = vmax.f32 %v490_v59, 0.0  ;;  %1218 = vst [vmem:[%s1617_s3 + $0x58] sm:$0xff] %v1081_v57   ;;  %v633_v0 = vmax.f32 %v540_v61, 0.0  ;;  %v402_v1 = vpop.f32.mrf.mxu0  ;;  %v447_v2 = vpop.f32.mrf.mxu1 }
  0xd0   :  { %v403_v6 = vadd.f32 %v1424_v46, %v402_v1  ;;  %v448_v7 = vadd.f32 %v1424_v46, %v447_v2 }
  0xd1   :  { %v1126_v3 = vpack.c.bf16 %v613_v63, %v612_v62  ;;  %v1176_v4 = vpack.c.bf16 %v633_v0, %v632_v60 }
  0xd2   :  { %v578_v11 = vmax.f32 %v403_v6, 0.0  ;;  %v596_v12 = vmax.f32 %v448_v7, 0.0 }
  0xd3   :  { %1227 = vst [vmem:[%s1617_s3 + $0xa0] sm:$0xff] %v1126_v3  }
  0xd4   :  { %v492_v5 = vpop.f32.mrf.mxu2  ;;  %1237 = vst [vmem:[%s1617_s3 + $0xf0] sm:$0xff] %v1176_v4   ;;  %v542_v8 = vpop.f32.mrf.mxu3 }
  0xd5   :  { %v543_v15 = vadd.f32 %v1424_v46, %v542_v8  ;;  %v493_v18 = vadd.f32 %v1424_v46, %v492_v5 }
  0xd7   :  { %v404_v9 = vpop.f32.mrf.mxu0  ;;  %v449_v10 = vpop.f32.mrf.mxu1  ;;  %v634_v24 = vmax.f32 %v543_v15, 0.0  ;;  %v614_v26 = vmax.f32 %v493_v18, 0.0 }
  0xd8   :  { %v405_v13 = vadd.f32 %v1424_v46, %v404_v9  ;;  %v450_v14 = vadd.f32 %v1424_v46, %v449_v10 }
  0xda   :  { %v579_v16 = vmax.f32 %v405_v13, 0.0  ;;  %v597_v17 = vmax.f32 %v450_v14, 0.0 }
  0xdc   :  { %v494_v19 = vpop.f32.mrf.mxu2  ;;  %v1041_v20 = vpack.c.bf16 %v579_v16, %v578_v11  ;;  %v1086_v21 = vpack.c.bf16 %v597_v17, %v596_v12  ;;  %v544_v22 = vpop.f32.mrf.mxu3 }
  0xdd   :  { %v495_v23 = vadd.f32 %v1424_v46, %v494_v19  ;;  %v545_v25 = vadd.f32 %v1424_v46, %v544_v22 }
  0xde   :  { %1210 = vst [vmem:[%s1617_s3 + $0x18] sm:$0xff] %v1041_v20  }
  0xdf   :  { %v615_v27 = vmax.f32 %v495_v23, 0.0  ;;  %1219 = vst [vmem:[%s1617_s3 + $0x60] sm:$0xff] %v1086_v21   ;;  %v635_v28 = vmax.f32 %v545_v25, 0.0  ;;  %v407_v29 = vpop.f32.mrf.mxu0  ;;  %v452_v30 = vpop.f32.mrf.mxu1 }
  0xe0   :  { %v408_v34 = vadd.f32 %v1424_v46, %v407_v29  ;;  %v453_v35 = vadd.f32 %v1424_v46, %v452_v30 }
  0xe1   :  { %v1131_v31 = vpack.c.bf16 %v615_v27, %v614_v26  ;;  %v1181_v32 = vpack.c.bf16 %v635_v28, %v634_v24 }
  0xe2   :  { %v580_v39 = vmax.f32 %v408_v34, 0.0  ;;  %v598_v40 = vmax.f32 %v453_v35, 0.0 }
  0xe3   :  { %1228 = vst [vmem:[%s1617_s3 + $0xa8] sm:$0xff] %v1131_v31  }
  0xe4   :  { %v497_v33 = vpop.f32.mrf.mxu2  ;;  %1238 = vst [vmem:[%s1617_s3 + $0xf8] sm:$0xff] %v1181_v32   ;;  %v547_v36 = vpop.f32.mrf.mxu3 }
  0xe5   :  { %v548_v43 = vadd.f32 %v1424_v46, %v547_v36  ;;  %v498_v47 = vadd.f32 %v1424_v46, %v497_v33 }
  0xe7   :  { %v409_v37 = vpop.f32.mrf.mxu0  ;;  %v454_v38 = vpop.f32.mrf.mxu1  ;;  %v636_v53 = vmax.f32 %v548_v43, 0.0  ;;  %v616_v55 = vmax.f32 %v498_v47, 0.0 }
  0xe8   :  { %v410_v41 = vadd.f32 %v1424_v46, %v409_v37  ;;  %v455_v42 = vadd.f32 %v1424_v46, %v454_v38 }
  0xea   :  { %v581_v44 = vmax.f32 %v410_v41, 0.0  ;;  %v599_v45 = vmax.f32 %v455_v42, 0.0 }
  0xec   :  { %v499_v48 = vpop.f32.mrf.mxu2  ;;  %v1046_v49 = vpack.c.bf16 %v581_v44, %v580_v39  ;;  %v1091_v50 = vpack.c.bf16 %v599_v45, %v598_v40  ;;  %v549_v51 = vpop.f32.mrf.mxu3 }
  0xed   :  { %v500_v52 = vadd.f32 %v1424_v46, %v499_v48  ;;  %v550_v54 = vadd.f32 %v1424_v46, %v549_v51 }
  0xee   :  { %1211 = vst [vmem:[%s1617_s3 + $0x20] sm:$0xff] %v1046_v49  }
  0xef   :  { %v617_v56 = vmax.f32 %v500_v52, 0.0  ;;  %1220 = vst [vmem:[%s1617_s3 + $0x68] sm:$0xff] %v1091_v50   ;;  %v637_v57 = vmax.f32 %v550_v54, 0.0  ;;  %v412_v58 = vpop.f32.mrf.mxu0  ;;  %v457_v59 = vpop.f32.mrf.mxu1 }
  0xf0   :  { %v413_v63 = vadd.f32 %v1424_v46, %v412_v58  ;;  %v458_v0 = vadd.f32 %v1424_v46, %v457_v59 }
  0xf1   :  { %v1136_v60 = vpack.c.bf16 %v617_v56, %v616_v55  ;;  %v1186_v61 = vpack.c.bf16 %v637_v57, %v636_v53 }
  0xf2   :  { %v582_v4 = vmax.f32 %v413_v63, 0.0  ;;  %v600_v5 = vmax.f32 %v458_v0, 0.0 }
  0xf3   :  { %1229 = vst [vmem:[%s1617_s3 + $0xb0] sm:$0xff] %v1136_v60  }
  0xf4   :  { %v502_v62 = vpop.f32.mrf.mxu2  ;;  %1239 = vst [vmem:[%s1617_s3 + $0x100] sm:$0xff] %v1186_v61   ;;  %v552_v1 = vpop.f32.mrf.mxu3 }
  0xf5   :  { %v553_v8 = vadd.f32 %v1424_v46, %v552_v1  ;;  %v503_v11 = vadd.f32 %v1424_v46, %v502_v62 }
  0xf7   :  { %v414_v2 = vpop.f32.mrf.mxu0  ;;  %v459_v3 = vpop.f32.mrf.mxu1  ;;  %v638_v17 = vmax.f32 %v553_v8, 0.0  ;;  %v618_v19 = vmax.f32 %v503_v11, 0.0 }
  0xf8   :  { %v415_v6 = vadd.f32 %v1424_v46, %v414_v2  ;;  %v460_v7 = vadd.f32 %v1424_v46, %v459_v3 }
  0xfa   :  { %v583_v9 = vmax.f32 %v415_v6, 0.0  ;;  %v601_v10 = vmax.f32 %v460_v7, 0.0 }
  0xfc   :  { %v504_v12 = vpop.f32.mrf.mxu2  ;;  %v1051_v13 = vpack.c.bf16 %v583_v9, %v582_v4  ;;  %v1096_v14 = vpack.c.bf16 %v601_v10, %v600_v5  ;;  %v554_v15 = vpop.f32.mrf.mxu3 }
  0xfd   :  { %v505_v16 = vadd.f32 %v1424_v46, %v504_v12  ;;  %v555_v18 = vadd.f32 %v1424_v46, %v554_v15 }
  0xfe   :  { %1212 = vst [vmem:[%s1617_s3 + $0x28] sm:$0xff] %v1051_v13  }
  0xff   :  { %v619_v20 = vmax.f32 %v505_v16, 0.0  ;;  %1221 = vst [vmem:[%s1617_s3 + $0x70] sm:$0xff] %v1096_v14   ;;  %v639_v21 = vmax.f32 %v555_v18, 0.0  ;;  %v417_v22 = vpop.f32.mrf.mxu0  ;;  %v462_v23 = vpop.f32.mrf.mxu1 }
 0x100   :  { %v418_v27 = vadd.f32 %v1424_v46, %v417_v22  ;;  %v463_v28 = vadd.f32 %v1424_v46, %v462_v23 }
 0x101   :  { %v1141_v24 = vpack.c.bf16 %v619_v20, %v618_v19  ;;  %v1191_v25 = vpack.c.bf16 %v639_v21, %v638_v17 }
 0x102   :  { %v584_v32 = vmax.f32 %v418_v27, 0.0  ;;  %v602_v33 = vmax.f32 %v463_v28, 0.0 }
 0x103   :  { %1230 = vst [vmem:[%s1617_s3 + $0xb8] sm:$0xff] %v1141_v24  }
 0x104   :  { %v507_v26 = vpop.f32.mrf.mxu2  ;;  %1240 = vst [vmem:[%s1617_s3 + $0x108] sm:$0xff] %v1191_v25   ;;  %v557_v29 = vpop.f32.mrf.mxu3 }
 0x105   :  { %v558_v36 = vadd.f32 %v1424_v46, %v557_v29  ;;  %v508_v39 = vadd.f32 %v1424_v46, %v507_v26 }
 0x107   :  { %v419_v30 = vpop.f32.mrf.mxu0  ;;  %v464_v31 = vpop.f32.mrf.mxu1  ;;  %v640_v45 = vmax.f32 %v558_v36, 0.0  ;;  %v620_v48 = vmax.f32 %v508_v39, 0.0 }
 0x108   :  { %v420_v34 = vadd.f32 %v1424_v46, %v419_v30  ;;  %v465_v35 = vadd.f32 %v1424_v46, %v464_v31 }
 0x10a   :  { %v585_v37 = vmax.f32 %v420_v34, 0.0  ;;  %v603_v38 = vmax.f32 %v465_v35, 0.0 }
 0x10c   :  { %v509_v40 = vpop.f32.mrf.mxu2  ;;  %v1056_v41 = vpack.c.bf16 %v585_v37, %v584_v32  ;;  %v1101_v42 = vpack.c.bf16 %v603_v38, %v602_v33  ;;  %v559_v43 = vpop.f32.mrf.mxu3 }
 0x10d   :  { %v510_v44 = vadd.f32 %v1424_v46, %v509_v40  ;;  %v560_v47 = vadd.f32 %v1424_v46, %v559_v43 }
 0x10e   :  { %1213 = vst [vmem:[%s1617_s3 + $0x30] sm:$0xff] %v1056_v41  }
 0x10f   :  { %v621_v49 = vmax.f32 %v510_v44, 0.0  ;;  %1222 = vst [vmem:[%s1617_s3 + $0x78] sm:$0xff] %v1101_v42   ;;  %v641_v50 = vmax.f32 %v560_v47, 0.0  ;;  %v422_v51 = vpop.f32.mrf.mxu0  ;;  %v467_v52 = vpop.f32.mrf.mxu1 }
 0x110   :  { %v423_v56 = vadd.f32 %v1424_v46, %v422_v51  ;;  %v468_v57 = vadd.f32 %v1424_v46, %v467_v52 }
 0x111   :  { %v1146_v53 = vpack.c.bf16 %v621_v49, %v620_v48  ;;  %v1196_v54 = vpack.c.bf16 %v641_v50, %v640_v45 }
 0x112   :  { %v586_v61 = vmax.f32 %v423_v56, 0.0  ;;  %v604_v62 = vmax.f32 %v468_v57, 0.0 }
 0x113   :  { %1231 = vst [vmem:[%s1617_s3 + $0xc0] sm:$0xff] %v1146_v53  }
 0x114   :  { %v512_v55 = vpop.f32.mrf.mxu2  ;;  %1241 = vst [vmem:[%s1617_s3 + $0x110] sm:$0xff] %v1196_v54   ;;  %v562_v58 = vpop.f32.mrf.mxu3 }
 0x115   :  { %v563_v1 = vadd.f32 %v1424_v46, %v562_v58  ;;  %v513_v4 = vadd.f32 %v1424_v46, %v512_v55 }
 0x117   :  { %v424_v59 = vpop.f32.mrf.mxu0  ;;  %v469_v60 = vpop.f32.mrf.mxu1  ;;  %v642_v10 = vmax.f32 %v563_v1, 0.0  ;;  %v622_v12 = vmax.f32 %v513_v4, 0.0 }
 0x118   :  { %v425_v63 = vadd.f32 %v1424_v46, %v424_v59  ;;  %v470_v0 = vadd.f32 %v1424_v46, %v469_v60 }
 0x11a   :  { %v587_v2 = vmax.f32 %v425_v63, 0.0  ;;  %v605_v3 = vmax.f32 %v470_v0, 0.0 }
 0x11c   :  { %v514_v5 = vpop.f32.mrf.mxu2  ;;  %v1061_v6 = vpack.c.bf16 %v587_v2, %v586_v61  ;;  %v1106_v7 = vpack.c.bf16 %v605_v3, %v604_v62  ;;  %v564_v8 = vpop.f32.mrf.mxu3 }
 0x11d   :  { %v515_v9 = vadd.f32 %v1424_v46, %v514_v5  ;;  %v565_v11 = vadd.f32 %v1424_v46, %v564_v8 }
 0x11e   :  { %1214 = vst [vmem:[%s1617_s3 + $0x38] sm:$0xff] %v1061_v6  }
 0x11f   :  { %v623_v13 = vmax.f32 %v515_v9, 0.0  ;;  %1223 = vst [vmem:[%s1617_s3 + $0x80] sm:$0xff] %v1106_v7   ;;  %v643_v14 = vmax.f32 %v565_v11, 0.0  ;;  %v427_v15 = vpop.f32.mrf.mxu0  ;;  %v472_v16 = vpop.f32.mrf.mxu1 }
 0x120   :  { %v428_v20 = vadd.f32 %v1424_v46, %v427_v15  ;;  %v473_v21 = vadd.f32 %v1424_v46, %v472_v16 }
 0x121   :  { %v1151_v17 = vpack.c.bf16 %v623_v13, %v622_v12  ;;  %v1201_v18 = vpack.c.bf16 %v643_v14, %v642_v10 }
 0x122   :  { %v588_v25 = vmax.f32 %v428_v20, 0.0  ;;  %v606_v26 = vmax.f32 %v473_v21, 0.0 }
 0x123   :  { %1232 = vst [vmem:[%s1617_s3 + $0xc8] sm:$0xff] %v1151_v17  }
 0x124   :  { %v517_v19 = vpop.f32.mrf.mxu2  ;;  %1242 = vst [vmem:[%s1617_s3 + $0x118] sm:$0xff] %v1201_v18   ;;  %v567_v22 = vpop.f32.mrf.mxu3 }
 0x125   :  { %v568_v29 = vadd.f32 %v1424_v46, %v567_v22  ;;  %v518_v32 = vadd.f32 %v1424_v46, %v517_v19 }
 0x127   :  { %v429_v23 = vpop.f32.mrf.mxu0  ;;  %v474_v24 = vpop.f32.mrf.mxu1  ;;  %v644_v38 = vmax.f32 %v568_v29, 0.0  ;;  %v624_v40 = vmax.f32 %v518_v32, 0.0 }
 0x128   :  { %v430_v27 = vadd.f32 %v1424_v46, %v429_v23  ;;  %v475_v28 = vadd.f32 %v1424_v46, %v474_v24 }
 0x12a   :  { %v589_v30 = vmax.f32 %v430_v27, 0.0  ;;  %v607_v31 = vmax.f32 %v475_v28, 0.0 }
 0x12c   :  { %v519_v33 = vpop.f32.mrf.mxu2  ;;  %v1066_v34 = vpack.c.bf16 %v589_v30, %v588_v25  ;;  %v1111_v35 = vpack.c.bf16 %v607_v31, %v606_v26  ;;  %v569_v36 = vpop.f32.mrf.mxu3 }
 0x12d   :  { %v520_v37 = vadd.f32 %v1424_v46, %v519_v33  ;;  %v570_v39 = vadd.f32 %v1424_v46, %v569_v36 }
 0x12e   :  { %1215 = vst [vmem:[%s1617_s3 + $0x40] sm:$0xff] %v1066_v34  }
 0x12f   :  { %v625_v41 = vmax.f32 %v520_v37, 0.0  ;;  %1224 = vst [vmem:[%s1617_s3 + $0x88] sm:$0xff] %v1111_v35   ;;  %v645_v42 = vmax.f32 %v570_v39, 0.0 }
 0x131   :  { %v1156_v43 = vpack.c.bf16 %v625_v41, %v624_v40  ;;  %v1206_v44 = vpack.c.bf16 %v645_v42, %v644_v38 }
 0x133   :  { %1233 = vst [vmem:[%s1617_s3 + $0xd0] sm:$0xff] %v1156_v43  }
 0x134   :  { %v522_v45 = vpop.f32.mrf.mxu2  ;;  %1243 = vst [vmem:[%s1617_s3 + $0x120] sm:$0xff] %v1206_v44  }
 0x135   :  { %v523_v47 = vadd.f32 %v1424_v46, %v522_v45 }
 0x137   :  { %v626_v50 = vmax.f32 %v523_v47, 0.0 }
 0x13c   :  { %v524_v48 = vpop.f32.mrf.mxu2 }
 0x13d   :  { %v525_v49 = vadd.f32 %v1424_v46, %v524_v48 }
 0x13f   :  { %v627_v51 = vmax.f32 %v525_v49, 0.0 }
 0x141   :  { %v1161_v52 = vpack.c.bf16 %v627_v51, %v626_v50 }
 0x143   :  { %1234 = vst [vmem:[%s1617_s3 + $0xd8] sm:$0xff] %v1161_v52  }

// kernel: simpleconv64d_forward.9
= control target key start
LH: loop header
LB: loop body
LE: loop exit
PB: predicated region body
PF: predicated region fallthrough
CT: control target
= control target key end

     0   :  { %s1117_s12 = smov 0   ;;  %s1346_s0 = inlined_call_operand.vmem [shape: bf16[2240,128], index: 0, kind: input, shape index: {}]   ;;  %s1347_s1 = inlined_call_operand.vmem [shape: bf16[128,128], index: 1, kind: input, shape index: {}]   ;;  %s1348_s2 = inlined_call_operand.vmem [shape: f32[1,128], index: 2, kind: input, shape index: {}]   ;;  %s1349_s3 = inlined_call_operand.vmem [shape: f32[2240,128], index: 3, kind: output, shape index: {}]  }
   0x1 LB: > { %s832_s13 = sadd.s32 4294967295, %s1095_s12   ;;  %p836_p0 = scmp.ge.s32.totalorder %s1095_s12, 1  ;;  %s1095_s12 = sphi %s1117_s12, %s13_s12  }
   0x2   : > { %p138_p1 = scmp.lt.s32.totalorder %s1095_s12, 5 }
   0x4   : > { %p139_p2 = pnand %p836_p0, %p138_p1 }
   0x5   : > { %s162_s22 = smul.u32 (!%p139_p2), 70, %s832_s13 }
   0x6   : > { %142 = sbr.rel (%p139_p2) target bundleno = 315 (0x13b), region = 32 }
   0x7   : > { %p163_p3 = scmp.lt.s32.totalorder (!%p139_p2), %s162_s22, 279 }
   0xb   : > { %v1055_v0 = vld [vmem:[%s1347_s1 + $0x38] sm:$0xff]  ;;  %v1054_v1 = vld [vmem:[%s1347_s1 + $0x30] sm:$0xff]  ;;  %v1053_v2 = vld [vmem:[%s1347_s1 + $0x28] sm:$0xff]  ;;  %s1351_s22 = smov (!%p163_p3, %s162_s22), 279 }
   0xc   : > { %1056 = vmatpush.bf16.msra.mxu1 %v1055_v0  ;;  %1057 = vmatpush.bf16.msra.mxu2 %v1055_v0  ;;  %v1052_v3 = vld [vmem:[%s1347_s1 + $0x20] sm:$0xff]  ;;  %v1051_v4 = vld [vmem:[%s1347_s1 + $0x18] sm:$0xff]  ;;  %v1050_v5 = vld [vmem:[%s1347_s1 + $0x10] sm:$0xff]  ;;  %s837_s29 = sshll.u32 %s1351_s22, 2  ;;  %s838_s8 = sshll.u32 %s1351_s22, 3 }
   0xd   : > { %1058 = vmatpush.bf16.msra.mxu3 %v1055_v0  ;;  %522 = vmatpush.bf16.msra.mxu0 %v1055_v0  ;;  %v1049_v6 = vld [vmem:[%s1347_s1 + $0x8] sm:$0xff]  ;;  %v1048_v7 = vld [vmem:[%s1347_s1] sm:$0xff]  ;;  %s1155_s7 = scalar_lea.vmem %s1346_s0, %s837_s29  ;;  %s1200_s14 = scalar_lea.vmem %s1349_s3, %s838_s8 }
   0xe   : > { %v1021_v8 = vld [vmem:[%s1155_s7 + $0x40] sm:$0xff]  ;;  %v1030_v9 = vld [vmem:[%s1155_s7 + $0x88] sm:$0xff]  ;;  %v1039_v10 = vld [vmem:[%s1155_s7 + $0xd0] sm:$0xff] }
   0xf   : > { %v1013_v11 = vld [vmem:[%s1155_s7] sm:$0xff]  ;;  %v1022_v12 = vld [vmem:[%s1155_s7 + $0x48] sm:$0xff]  ;;  %v1031_v13 = vld [vmem:[%s1155_s7 + $0x90] sm:$0xff] }
  0x10   : > { %1059 = vmatpush.bf16.msra.mxu1 %v1054_v1  ;;  %1060 = vmatpush.bf16.msra.mxu2 %v1054_v1  ;;  %v1040_v14 = vld [vmem:[%s1155_s7 + $0xd8] sm:$0xff]  ;;  %v1014_v15 = vld [vmem:[%s1155_s7 + $0x8] sm:$0xff]  ;;  %v1023_v16 = vld [vmem:[%s1155_s7 + $0x50] sm:$0xff] }
  0x11   : > { %1061 = vmatpush.bf16.msra.mxu3 %v1054_v1  ;;  %523 = vmatpush.bf16.msra.mxu0 %v1054_v1  ;;  %v1032_v17 = vld [vmem:[%s1155_s7 + $0x98] sm:$0xff]  ;;  %v1041_v18 = vld [vmem:[%s1155_s7 + $0xe0] sm:$0xff]  ;;  %v1015_v19 = vld [vmem:[%s1155_s7 + $0x10] sm:$0xff] }
  0x12   : > { %v1024_v20 = vld [vmem:[%s1155_s7 + $0x58] sm:$0xff]  ;;  %v1033_v21 = vld [vmem:[%s1155_s7 + $0xa0] sm:$0xff]  ;;  %v1042_v22 = vld [vmem:[%s1155_s7 + $0xe8] sm:$0xff] }
  0x13   : > { %v1016_v23 = vld [vmem:[%s1155_s7 + $0x18] sm:$0xff]  ;;  %v1025_v24 = vld [vmem:[%s1155_s7 + $0x60] sm:$0xff]  ;;  %v1034_v25 = vld [vmem:[%s1155_s7 + $0xa8] sm:$0xff] }
  0x14   : > { %1062 = vmatpush.bf16.msra.mxu1 %v1053_v2  ;;  %1063 = vmatpush.bf16.msra.mxu2 %v1053_v2  ;;  %v1043_v26 = vld [vmem:[%s1155_s7 + $0xf0] sm:$0xff]  ;;  %v1017_v27 = vld [vmem:[%s1155_s7 + $0x20] sm:$0xff]  ;;  %v1026_v28 = vld [vmem:[%s1155_s7 + $0x68] sm:$0xff] }
  0x15   : > { %1064 = vmatpush.bf16.msra.mxu3 %v1053_v2  ;;  %524 = vmatpush.bf16.msra.mxu0 %v1053_v2  ;;  %v1035_v29 = vld [vmem:[%s1155_s7 + $0xb0] sm:$0xff]  ;;  %v1044_v30 = vld [vmem:[%s1155_s7 + $0xf8] sm:$0xff]  ;;  %v1018_v31 = vld [vmem:[%s1155_s7 + $0x28] sm:$0xff] }
  0x16   : > { %v1027_v32 = vld [vmem:[%s1155_s7 + $0x70] sm:$0xff]  ;;  %v1036_v33 = vld [vmem:[%s1155_s7 + $0xb8] sm:$0xff]  ;;  %v1045_v34 = vld [vmem:[%s1155_s7 + $0x100] sm:$0xff] }
  0x17   : > { %v1019_v35 = vld [vmem:[%s1155_s7 + $0x30] sm:$0xff]  ;;  %v1028_v36 = vld [vmem:[%s1155_s7 + $0x78] sm:$0xff]  ;;  %v1037_v37 = vld [vmem:[%s1155_s7 + $0xc0] sm:$0xff] }
  0x18   : > { %1065 = vmatpush.bf16.msra.mxu1 %v1052_v3  ;;  %1066 = vmatpush.bf16.msra.mxu2 %v1052_v3  ;;  %v1046_v38 = vld [vmem:[%s1155_s7 + $0x108] sm:$0xff]  ;;  %v1020_v39 = vld [vmem:[%s1155_s7 + $0x38] sm:$0xff]  ;;  %v1193_v40 = vld [vmem:[%s1348_s2] ss:$0 sm:$0xff] }
  0x19   : > { %1067 = vmatpush.bf16.msra.mxu3 %v1052_v3  ;;  %525 = vmatpush.bf16.msra.mxu0 %v1052_v3  ;;  %v1029_v41 = vld [vmem:[%s1155_s7 + $0x80] sm:$0xff]  ;;  %v1038_v42 = vld [vmem:[%s1155_s7 + $0xc8] sm:$0xff]  ;;  %v1047_v44 = vld [vmem:[%s1155_s7 + $0x110] sm:$0xff] }
  0x1c   : > { %1068 = vmatpush.bf16.msra.mxu1 %v1051_v4  ;;  %1069 = vmatpush.bf16.msra.mxu2 %v1051_v4 }
  0x1d   : > { %1070 = vmatpush.bf16.msra.mxu3 %v1051_v4  ;;  %526 = vmatpush.bf16.msra.mxu0 %v1051_v4 }
  0x20   : > { %1071 = vmatpush.bf16.msra.mxu1 %v1050_v5  ;;  %1072 = vmatpush.bf16.msra.mxu2 %v1050_v5 }
  0x21   : > { %1073 = vmatpush.bf16.msra.mxu3 %v1050_v5  ;;  %527 = vmatpush.bf16.msra.mxu0 %v1050_v5 }
  0x24   : > { %1074 = vmatpush.bf16.msra.mxu1 %v1049_v6  ;;  %1075 = vmatpush.bf16.msra.mxu2 %v1049_v6 }
  0x25   : > { %1076 = vmatpush.bf16.msra.mxu3 %v1049_v6  ;;  %528 = vmatpush.bf16.msra.mxu0 %v1049_v6 }
  0x28   : > { %1077 = vmatpush.bf16.msra.mxu1 %v1048_v7  ;;  %1078 = vmatpush.bf16.msra.mxu2 %v1048_v7 }
  0x29   : > { %1079 = vmatpush.bf16.msra.mxu3 %v1048_v7  ;;  %529 = vmatpush.bf16.msra.mxu0 %v1048_v7 }
  0x2b   : > { %570 = vmatmul.bf16.vlgmr.msra.gmra.mxu1 %v1021_v8  ;;  %615 = vmatmul.bf16.vlgmr.msra.gmra.mxu2 %v1030_v9 }
  0x2c   : > { %660 = vmatmul.bf16.vlgmr.msra.gmra.mxu3 %v1039_v10  ;;  %530 = vmatmul.bf16.vlgmr.msra.gmra.mxu0 %v1013_v11 }
  0x3b   : > { %575 = vmatmul.bf16.gmra.mxu1 %v1022_v12  ;;  %620 = vmatmul.bf16.gmra.mxu2 %v1031_v13 }
  0x3c   : > { %665 = vmatmul.bf16.gmra.mxu3 %v1040_v14  ;;  %535 = vmatmul.bf16.gmra.mxu0 %v1014_v15 }
  0x4b   : > { %580 = vmatmul.bf16.gmra.mxu1 %v1023_v16  ;;  %625 = vmatmul.bf16.gmra.mxu2 %v1032_v17 }
  0x4c   : > { %670 = vmatmul.bf16.gmra.mxu3 %v1041_v18  ;;  %540 = vmatmul.bf16.gmra.mxu0 %v1015_v19 }
  0x5b   : > { %585 = vmatmul.bf16.gmra.mxu1 %v1024_v20  ;;  %630 = vmatmul.bf16.gmra.mxu2 %v1033_v21 }
  0x5c   : > { %675 = vmatmul.bf16.gmra.mxu3 %v1042_v22  ;;  %545 = vmatmul.bf16.gmra.mxu0 %v1016_v23 }
  0x6b   : > { %590 = vmatmul.bf16.gmra.mxu1 %v1025_v24  ;;  %635 = vmatmul.bf16.gmra.mxu2 %v1034_v25 }
  0x6c   : > { %680 = vmatmul.bf16.gmra.mxu3 %v1043_v26  ;;  %550 = vmatmul.bf16.gmra.mxu0 %v1017_v27 }
  0x7b   : > { %595 = vmatmul.bf16.gmra.mxu1 %v1026_v28  ;;  %640 = vmatmul.bf16.gmra.mxu2 %v1035_v29 }
  0x7c   : > { %685 = vmatmul.bf16.gmra.mxu3 %v1044_v30  ;;  %555 = vmatmul.bf16.gmra.mxu0 %v1018_v31 }
  0x8b   : > { %600 = vmatmul.bf16.gmra.mxu1 %v1027_v32  ;;  %645 = vmatmul.bf16.gmra.mxu2 %v1036_v33 }
  0x8c   : > { %690 = vmatmul.bf16.gmra.mxu3 %v1045_v34  ;;  %560 = vmatmul.bf16.gmra.mxu0 %v1019_v35 }
  0x9b   : > { %605 = vmatmul.bf16.gmra.mxu1 %v1028_v36  ;;  %650 = vmatmul.bf16.gmra.mxu2 %v1037_v37 }
  0x9c   : > { %695 = vmatmul.bf16.gmra.mxu3 %v1046_v38  ;;  %565 = vmatmul.bf16.gmra.mxu0 %v1020_v39 }
  0xa8   : > { %v571_v43 = vpop.f32.mrf.mxu1 }
  0xa9   : > { %v572_v45 = vadd.f32 %v1193_v40, %v571_v43  ;;  %v531_v46 = vpop.f32.mrf.mxu0 }
  0xaa   : > { %v532_v47 = vadd.f32 %v1193_v40, %v531_v46 }
  0xab   : > { %722 = vst [vmem:[%s1200_s14 + $0x80] sm:$0xff] %v572_v45  ;;  %610 = vmatmul.bf16.gmra.mxu1 %v1029_v41  ;;  %655 = vmatmul.bf16.gmra.mxu2 %v1038_v42 }
  0xac   : > { %700 = vmatmul.bf16.gmra.mxu3 %v1047_v44  ;;  %706 = vst [vmem:[%s1200_s14] sm:$0xff] %v532_v47 }
  0xae   : > { %v616_v48 = vpop.f32.mrf.mxu2 }
  0xaf   : > { %v617_v49 = vadd.f32 %v1193_v40, %v616_v48  ;;  %v661_v50 = vpop.f32.mrf.mxu3 }
  0xb0   : > { %v662_v51 = vadd.f32 %v1193_v40, %v661_v50  ;;  %v573_v52 = vpop.f32.mrf.mxu1 }
  0xb1   : > { %740 = vst [vmem:[%s1200_s14 + $0x110] sm:$0xff] %v617_v49  ;;  %v574_v53 = vadd.f32 %v1193_v40, %v573_v52  ;;  %v533_v54 = vpop.f32.mrf.mxu0 }
  0xb2   : > { %758 = vst [vmem:[%s1200_s14 + $0x1a0] sm:$0xff] %v662_v51  ;;  %v534_v55 = vadd.f32 %v1193_v40, %v533_v54 }
  0xb3   : > { %723 = vst [vmem:[%s1200_s14 + $0x88] sm:$0xff] %v574_v53 }
  0xb4   : > { %707 = vst [vmem:[%s1200_s14 + $0x8] sm:$0xff] %v534_v55 }
  0xb6   : > { %v618_v56 = vpop.f32.mrf.mxu2 }
  0xb7   : > { %v619_v57 = vadd.f32 %v1193_v40, %v618_v56  ;;  %v663_v58 = vpop.f32.mrf.mxu3 }
  0xb8   : > { %v664_v59 = vadd.f32 %v1193_v40, %v663_v58  ;;  %v576_v60 = vpop.f32.mrf.mxu1 }
  0xb9   : > { %741 = vst [vmem:[%s1200_s14 + $0x118] sm:$0xff] %v619_v57  ;;  %v577_v61 = vadd.f32 %v1193_v40, %v576_v60  ;;  %v536_v62 = vpop.f32.mrf.mxu0 }
  0xba   : > { %759 = vst [vmem:[%s1200_s14 + $0x1a8] sm:$0xff] %v664_v59  ;;  %v537_v63 = vadd.f32 %v1193_v40, %v536_v62 }
  0xbb   : > { %724 = vst [vmem:[%s1200_s14 + $0x90] sm:$0xff] %v577_v61 }
  0xbc   : > { %708 = vst [vmem:[%s1200_s14 + $0x10] sm:$0xff] %v537_v63 }
  0xbe   : > { %v621_v0 = vpop.f32.mrf.mxu2 }
  0xbf   : > { %v622_v1 = vadd.f32 %v1193_v40, %v621_v0  ;;  %v666_v2 = vpop.f32.mrf.mxu3 }
  0xc0   : > { %v667_v3 = vadd.f32 %v1193_v40, %v666_v2  ;;  %v578_v4 = vpop.f32.mrf.mxu1 }
  0xc1   : > { %742 = vst [vmem:[%s1200_s14 + $0x120] sm:$0xff] %v622_v1  ;;  %v579_v5 = vadd.f32 %v1193_v40, %v578_v4  ;;  %v538_v6 = vpop.f32.mrf.mxu0 }
  0xc2   : > { %760 = vst [vmem:[%s1200_s14 + $0x1b0] sm:$0xff] %v667_v3  ;;  %v539_v7 = vadd.f32 %v1193_v40, %v538_v6 }
  0xc3   : > { %725 = vst [vmem:[%s1200_s14 + $0x98] sm:$0xff] %v579_v5 }
  0xc4   : > { %709 = vst [vmem:[%s1200_s14 + $0x18] sm:$0xff] %v539_v7 }
  0xc6   : > { %v623_v8 = vpop.f32.mrf.mxu2 }
  0xc7   : > { %v624_v9 = vadd.f32 %v1193_v40, %v623_v8  ;;  %v668_v10 = vpop.f32.mrf.mxu3 }
  0xc8   : > { %v669_v11 = vadd.f32 %v1193_v40, %v668_v10  ;;  %v581_v12 = vpop.f32.mrf.mxu1 }
  0xc9   : > { %743 = vst [vmem:[%s1200_s14 + $0x128] sm:$0xff] %v624_v9  ;;  %v582_v13 = vadd.f32 %v1193_v40, %v581_v12  ;;  %v541_v14 = vpop.f32.mrf.mxu0 }
  0xca   : > { %761 = vst [vmem:[%s1200_s14 + $0x1b8] sm:$0xff] %v669_v11  ;;  %v542_v15 = vadd.f32 %v1193_v40, %v541_v14 }
  0xcb   : > { %726 = vst [vmem:[%s1200_s14 + $0xa0] sm:$0xff] %v582_v13 }
  0xcc   : > { %710 = vst [vmem:[%s1200_s14 + $0x20] sm:$0xff] %v542_v15 }
  0xce   : > { %v626_v16 = vpop.f32.mrf.mxu2 }
  0xcf   : > { %v627_v17 = vadd.f32 %v1193_v40, %v626_v16  ;;  %v671_v18 = vpop.f32.mrf.mxu3 }
  0xd0   : > { %v672_v19 = vadd.f32 %v1193_v40, %v671_v18  ;;  %v583_v20 = vpop.f32.mrf.mxu1 }
  0xd1   : > { %744 = vst [vmem:[%s1200_s14 + $0x130] sm:$0xff] %v627_v17  ;;  %v584_v21 = vadd.f32 %v1193_v40, %v583_v20  ;;  %v543_v22 = vpop.f32.mrf.mxu0 }
  0xd2   : > { %762 = vst [vmem:[%s1200_s14 + $0x1c0] sm:$0xff] %v672_v19  ;;  %v544_v23 = vadd.f32 %v1193_v40, %v543_v22 }
  0xd3   : > { %727 = vst [vmem:[%s1200_s14 + $0xa8] sm:$0xff] %v584_v21 }
  0xd4   : > { %711 = vst [vmem:[%s1200_s14 + $0x28] sm:$0xff] %v544_v23 }
  0xd6   : > { %v628_v24 = vpop.f32.mrf.mxu2 }
  0xd7   : > { %v629_v25 = vadd.f32 %v1193_v40, %v628_v24  ;;  %v673_v26 = vpop.f32.mrf.mxu3 }
  0xd8   : > { %v674_v27 = vadd.f32 %v1193_v40, %v673_v26  ;;  %v586_v28 = vpop.f32.mrf.mxu1 }
  0xd9   : > { %745 = vst [vmem:[%s1200_s14 + $0x138] sm:$0xff] %v629_v25  ;;  %v587_v29 = vadd.f32 %v1193_v40, %v586_v28  ;;  %v546_v30 = vpop.f32.mrf.mxu0 }
  0xda   : > { %763 = vst [vmem:[%s1200_s14 + $0x1c8] sm:$0xff] %v674_v27  ;;  %v547_v31 = vadd.f32 %v1193_v40, %v546_v30 }
  0xdb   : > { %728 = vst [vmem:[%s1200_s14 + $0xb0] sm:$0xff] %v587_v29 }
  0xdc   : > { %712 = vst [vmem:[%s1200_s14 + $0x30] sm:$0xff] %v547_v31 }
  0xde   : > { %v631_v32 = vpop.f32.mrf.mxu2 }
  0xdf   : > { %v632_v33 = vadd.f32 %v1193_v40, %v631_v32  ;;  %v676_v34 = vpop.f32.mrf.mxu3 }
  0xe0   : > { %v677_v35 = vadd.f32 %v1193_v40, %v676_v34  ;;  %v588_v36 = vpop.f32.mrf.mxu1 }
  0xe1   : > { %746 = vst [vmem:[%s1200_s14 + $0x140] sm:$0xff] %v632_v33  ;;  %v589_v37 = vadd.f32 %v1193_v40, %v588_v36  ;;  %v548_v38 = vpop.f32.mrf.mxu0 }
  0xe2   : > { %764 = vst [vmem:[%s1200_s14 + $0x1d0] sm:$0xff] %v677_v35  ;;  %v549_v39 = vadd.f32 %v1193_v40, %v548_v38 }
  0xe3   : > { %729 = vst [vmem:[%s1200_s14 + $0xb8] sm:$0xff] %v589_v37 }
  0xe4   : > { %713 = vst [vmem:[%s1200_s14 + $0x38] sm:$0xff] %v549_v39 }
  0xe6   : > { %v633_v41 = vpop.f32.mrf.mxu2 }
  0xe7   : > { %v634_v42 = vadd.f32 %v1193_v40, %v633_v41  ;;  %v678_v43 = vpop.f32.mrf.mxu3 }
  0xe8   : > { %v679_v44 = vadd.f32 %v1193_v40, %v678_v43  ;;  %v591_v45 = vpop.f32.mrf.mxu1 }
  0xe9   : > { %747 = vst [vmem:[%s1200_s14 + $0x148] sm:$0xff] %v634_v42  ;;  %v592_v46 = vadd.f32 %v1193_v40, %v591_v45  ;;  %v551_v47 = vpop.f32.mrf.mxu0 }
  0xea   : > { %765 = vst [vmem:[%s1200_s14 + $0x1d8] sm:$0xff] %v679_v44  ;;  %v552_v48 = vadd.f32 %v1193_v40, %v551_v47 }
  0xeb   : > { %730 = vst [vmem:[%s1200_s14 + $0xc0] sm:$0xff] %v592_v46 }
  0xec   : > { %714 = vst [vmem:[%s1200_s14 + $0x40] sm:$0xff] %v552_v48 }
  0xee   : > { %v636_v49 = vpop.f32.mrf.mxu2 }
  0xef   : > { %v637_v50 = vadd.f32 %v1193_v40, %v636_v49  ;;  %v681_v51 = vpop.f32.mrf.mxu3 }
  0xf0   : > { %v682_v52 = vadd.f32 %v1193_v40, %v681_v51  ;;  %v593_v53 = vpop.f32.mrf.mxu1 }
  0xf1   : > { %748 = vst [vmem:[%s1200_s14 + $0x150] sm:$0xff] %v637_v50  ;;  %v594_v54 = vadd.f32 %v1193_v40, %v593_v53  ;;  %v553_v55 = vpop.f32.mrf.mxu0 }
  0xf2   : > { %766 = vst [vmem:[%s1200_s14 + $0x1e0] sm:$0xff] %v682_v52  ;;  %v554_v56 = vadd.f32 %v1193_v40, %v553_v55 }
  0xf3   : > { %731 = vst [vmem:[%s1200_s14 + $0xc8] sm:$0xff] %v594_v54 }
  0xf4   : > { %715 = vst [vmem:[%s1200_s14 + $0x48] sm:$0xff] %v554_v56 }
  0xf6   : > { %v638_v57 = vpop.f32.mrf.mxu2 }
  0xf7   : > { %v639_v58 = vadd.f32 %v1193_v40, %v638_v57  ;;  %v683_v59 = vpop.f32.mrf.mxu3 }
  0xf8   : > { %v684_v60 = vadd.f32 %v1193_v40, %v683_v59  ;;  %v596_v61 = vpop.f32.mrf.mxu1 }
  0xf9   : > { %749 = vst [vmem:[%s1200_s14 + $0x158] sm:$0xff] %v639_v58  ;;  %v597_v62 = vadd.f32 %v1193_v40, %v596_v61  ;;  %v556_v63 = vpop.f32.mrf.mxu0 }
  0xfa   : > { %767 = vst [vmem:[%s1200_s14 + $0x1e8] sm:$0xff] %v684_v60  ;;  %v557_v0 = vadd.f32 %v1193_v40, %v556_v63 }
  0xfb   : > { %732 = vst [vmem:[%s1200_s14 + $0xd0] sm:$0xff] %v597_v62 }
  0xfc   : > { %716 = vst [vmem:[%s1200_s14 + $0x50] sm:$0xff] %v557_v0 }
  0xfe   : > { %v641_v1 = vpop.f32.mrf.mxu2 }
  0xff   : > { %v642_v2 = vadd.f32 %v1193_v40, %v641_v1  ;;  %v686_v3 = vpop.f32.mrf.mxu3 }
 0x100   : > { %v687_v4 = vadd.f32 %v1193_v40, %v686_v3  ;;  %v598_v5 = vpop.f32.mrf.mxu1 }
 0x101   : > { %750 = vst [vmem:[%s1200_s14 + $0x160] sm:$0xff] %v642_v2  ;;  %v599_v6 = vadd.f32 %v1193_v40, %v598_v5  ;;  %v558_v7 = vpop.f32.mrf.mxu0 }
 0x102   : > { %768 = vst [vmem:[%s1200_s14 + $0x1f0] sm:$0xff] %v687_v4  ;;  %v559_v8 = vadd.f32 %v1193_v40, %v558_v7 }
 0x103   : > { %733 = vst [vmem:[%s1200_s14 + $0xd8] sm:$0xff] %v599_v6 }
 0x104   : > { %717 = vst [vmem:[%s1200_s14 + $0x58] sm:$0xff] %v559_v8 }
 0x106   : > { %v643_v9 = vpop.f32.mrf.mxu2 }
 0x107   : > { %v644_v10 = vadd.f32 %v1193_v40, %v643_v9  ;;  %v688_v11 = vpop.f32.mrf.mxu3 }
 0x108   : > { %v689_v12 = vadd.f32 %v1193_v40, %v688_v11  ;;  %v601_v13 = vpop.f32.mrf.mxu1 }
 0x109   : > { %751 = vst [vmem:[%s1200_s14 + $0x168] sm:$0xff] %v644_v10  ;;  %v602_v14 = vadd.f32 %v1193_v40, %v601_v13  ;;  %v561_v15 = vpop.f32.mrf.mxu0 }
 0x10a   : > { %769 = vst [vmem:[%s1200_s14 + $0x1f8] sm:$0xff] %v689_v12  ;;  %v562_v16 = vadd.f32 %v1193_v40, %v561_v15 }
 0x10b   : > { %734 = vst [vmem:[%s1200_s14 + $0xe0] sm:$0xff] %v602_v14 }
 0x10c   : > { %718 = vst [vmem:[%s1200_s14 + $0x60] sm:$0xff] %v562_v16 }
 0x10e   : > { %v646_v17 = vpop.f32.mrf.mxu2 }
 0x10f   : > { %v647_v18 = vadd.f32 %v1193_v40, %v646_v17  ;;  %v691_v19 = vpop.f32.mrf.mxu3 }
 0x110   : > { %v692_v20 = vadd.f32 %v1193_v40, %v691_v19  ;;  %v603_v21 = vpop.f32.mrf.mxu1 }
 0x111   : > { %752 = vst [vmem:[%s1200_s14 + $0x170] sm:$0xff] %v647_v18  ;;  %v604_v22 = vadd.f32 %v1193_v40, %v603_v21  ;;  %v563_v23 = vpop.f32.mrf.mxu0 }
 0x112   : > { %770 = vst [vmem:[%s1200_s14 + $0x200] sm:$0xff] %v692_v20  ;;  %v564_v24 = vadd.f32 %v1193_v40, %v563_v23 }
 0x113   : > { %735 = vst [vmem:[%s1200_s14 + $0xe8] sm:$0xff] %v604_v22 }
 0x114   : > { %719 = vst [vmem:[%s1200_s14 + $0x68] sm:$0xff] %v564_v24 }
 0x116   : > { %v648_v25 = vpop.f32.mrf.mxu2 }
 0x117   : > { %v649_v26 = vadd.f32 %v1193_v40, %v648_v25  ;;  %v693_v27 = vpop.f32.mrf.mxu3 }
 0x118   : > { %v694_v28 = vadd.f32 %v1193_v40, %v693_v27  ;;  %v606_v29 = vpop.f32.mrf.mxu1 }
 0x119   : > { %753 = vst [vmem:[%s1200_s14 + $0x178] sm:$0xff] %v649_v26  ;;  %v607_v30 = vadd.f32 %v1193_v40, %v606_v29  ;;  %v566_v31 = vpop.f32.mrf.mxu0 }
 0x11a   : > { %771 = vst [vmem:[%s1200_s14 + $0x208] sm:$0xff] %v694_v28  ;;  %v567_v32 = vadd.f32 %v1193_v40, %v566_v31 }
 0x11b   : > { %736 = vst [vmem:[%s1200_s14 + $0xf0] sm:$0xff] %v607_v30 }
 0x11c   : > { %720 = vst [vmem:[%s1200_s14 + $0x70] sm:$0xff] %v567_v32 }
 0x11e   : > { %v651_v33 = vpop.f32.mrf.mxu2 }
 0x11f   : > { %v652_v34 = vadd.f32 %v1193_v40, %v651_v33  ;;  %v696_v35 = vpop.f32.mrf.mxu3 }
 0x120   : > { %v697_v36 = vadd.f32 %v1193_v40, %v696_v35  ;;  %v608_v37 = vpop.f32.mrf.mxu1 }
 0x121   : > { %754 = vst [vmem:[%s1200_s14 + $0x180] sm:$0xff] %v652_v34  ;;  %v609_v38 = vadd.f32 %v1193_v40, %v608_v37  ;;  %v568_v39 = vpop.f32.mrf.mxu0 }
 0x122   : > { %772 = vst [vmem:[%s1200_s14 + $0x210] sm:$0xff] %v697_v36  ;;  %v569_v41 = vadd.f32 %v1193_v40, %v568_v39 }
 0x123   : > { %737 = vst [vmem:[%s1200_s14 + $0xf8] sm:$0xff] %v609_v38 }
 0x124   : > { %721 = vst [vmem:[%s1200_s14 + $0x78] sm:$0xff] %v569_v41 }
 0x126   : > { %v653_v42 = vpop.f32.mrf.mxu2 }
 0x127   : > { %v654_v43 = vadd.f32 %v1193_v40, %v653_v42  ;;  %v698_v44 = vpop.f32.mrf.mxu3 }
 0x128   : > { %v699_v45 = vadd.f32 %v1193_v40, %v698_v44  ;;  %v611_v46 = vpop.f32.mrf.mxu1 }
 0x129   : > { %755 = vst [vmem:[%s1200_s14 + $0x188] sm:$0xff] %v654_v43  ;;  %v612_v47 = vadd.f32 %v1193_v40, %v611_v46 }
 0x12a   : > { %773 = vst [vmem:[%s1200_s14 + $0x218] sm:$0xff] %v699_v45 }
 0x12b   : > { %738 = vst [vmem:[%s1200_s14 + $0x100] sm:$0xff] %v612_v47 }
 0x12e   : > { %v656_v48 = vpop.f32.mrf.mxu2 }
 0x12f   : > { %v657_v49 = vadd.f32 %v1193_v40, %v656_v48  ;;  %v701_v50 = vpop.f32.mrf.mxu3 }
 0x130   : > { %v702_v51 = vadd.f32 %v1193_v40, %v701_v50  ;;  %v613_v52 = vpop.f32.mrf.mxu1 }
 0x131   : > { %756 = vst [vmem:[%s1200_s14 + $0x190] sm:$0xff] %v657_v49  ;;  %v614_v53 = vadd.f32 %v1193_v40, %v613_v52 }
 0x132   : > { %774 = vst [vmem:[%s1200_s14 + $0x220] sm:$0xff] %v702_v51 }
 0x133   : > { %739 = vst [vmem:[%s1200_s14 + $0x108] sm:$0xff] %v614_v53 }
 0x136   : > { %v658_v54 = vpop.f32.mrf.mxu2 }
 0x137   : > { %v659_v55 = vadd.f32 %v1193_v40, %v658_v54  ;;  %v703_v56 = vpop.f32.mrf.mxu3 }
 0x138   : > { %v704_v57 = vadd.f32 %v1193_v40, %v703_v56 }
 0x139   : > { %757 = vst [vmem:[%s1200_s14 + $0x198] sm:$0xff] %v659_v55 }
 0x13a   : > { %775 = vst [vmem:[%s1200_s14 + $0x228] sm:$0xff] %v704_v57 }
 0x13b PF: > { %s13_s12 = sadd.s32 1, %s1095_s12  }
 0x13c   : > { %p10_p4 = scmp.ge.s32.totalorder %s13_s12, 6  }
 0x13e   :  { %12 = sbr.rel (!%p10_p4) target bundleno = 1 (0x1), region = 62 }

</bundles_post_ra>
